<compile_context>
chip_gen: v6e
topology: v6e:2x2x1
jax: 0.10.0
libtpu: 0.0.40
codegen_flags: <defaults>
</compile_context>

<pallas_src>
import functools
import math

import numpy as np
import jax
import jax.numpy as jnp
from jax import lax
from jax.experimental import pallas as pl
from jax.experimental.pallas import tpu as pltpu

EPS = 1e-5          # torch.nn.LayerNorm default eps
MIN_VALUE = -1e38   # matches wkv_cuda MIN_VALUE
WKV_GROUP = 8       # rows processed per WKV group (one sublane-aligned block)


# ----------------------------- kernel helpers (traced inside Pallas) -----------------

def _layernorm(x, w, b):
    mu = jnp.mean(x, axis=-1, keepdims=True)
    xc = x - mu
    var = jnp.mean(xc * xc, axis=-1, keepdims=True)
    return xc * lax.rsqrt(var + EPS) * w + b


def _sigmoid(x):
    # exp on EUP + approximate reciprocal on EUP (no full-precision divide).
    return pl.reciprocal(1.0 + jnp.exp(-x), approx=True)


def _time_shift(x, row0_mask):
    # nn.ZeroPad2d((0,0,1,-1)) on (T, C):  xx[0] = 0, xx[t] = x[t-1]
    # XLU sublane roll + select; no MXU work.
    rolled = pltpu.roll(x, shift=1, axis=0)
    return jnp.where(row0_mask, 0.0, rolled)


def _mm(a_f32, w_ref):
    # bf16 x bf16 matmul on the MXU with f32 accumulation.
    return jnp.dot(a_f32.astype(jnp.bfloat16), w_ref[...],
                   preferred_element_type=jnp.float32)


# ----------------------------- the Pallas kernel --------------------------------------

def block_kernel(x_ref,
                 ln0w_ref, ln0b_ref, ln1w_ref, ln1b_ref, ln2w_ref, ln2b_ref,
                 g1_ref, g2_ref,
                 amk_ref, amv_ref, amr_ref, adec_ref, afst_ref,
                 awk_ref, awv_ref, awr_ref, awo_ref,
                 fmk_ref, fmr_ref, fwk_ref, fwv_ref, fwr_ref,
                 o_ref,
                 k_scr, v_scr, wkv_scr,
                 *, T, C, apply_ln0):
    x = x_ref[0]  # (T, C) for the current batch element, f32

    row0_mask = lax.broadcasted_iota(jnp.int32, (T, C), 0) == 0  # built once, reused

    if apply_ln0:
        x = _layernorm(x, ln0w_ref[...], ln0b_ref[...])

    # ---------------- attention branch: TEMRWKV_SignalMix(ln1(x)) ----------------
    xn = _layernorm(x, ln1w_ref[...], ln1b_ref[...])
    xx = _time_shift(xn, row0_mask)
    d = xn - xx                                   # x*m + xx*(1-m) == xx + m*(x-xx)
    xk = xx + amk_ref[...] * d
    xv = xx + amv_ref[...] * d
    xr = xx + amr_ref[...] * d

    k = _mm(xk, awk_ref)       # f32 results of bf16 matmuls
    v = _mm(xv, awv_ref)
    r = _mm(xr, awr_ref)
    sr = _sigmoid(r)

    k_scr[...] = k
    v_scr[...] = v

    # WKV recurrence (reimplements wkv_cuda.forward), sequential over T, kept in f32.
    w = adec_ref[...] / float(T)   # (1, C)
    u = afst_ref[...] / float(T)   # (1, C)

    def process_rows(base, nrows, carry):
        # Load an (nrows, C) block of k/v once, unroll the steps, store wkv once.
        p, q, o = carry
        kblk = k_scr[pl.ds(base, nrows), :]
        vblk = v_scr[pl.ds(base, nrows), :]
        ukblk = kblk + u                      # hoisted: one add per block, not per step
        rows = []
        for i in range(nrows):                # Python-unrolled: LLO gets full visibility
            kt = kblk[i:i + 1, :]
            ukt = ukblk[i:i + 1, :]
            vt = vblk[i:i + 1, :]
            wo = w + o
            no = jnp.maximum(o, ukt)
            A = jnp.exp(o - no)
            Bc = jnp.exp(ukt - no)
            rows.append((A * p + Bc * vt) *
                        pl.reciprocal(A * q + Bc, approx=True))
            no2 = jnp.maximum(wo, kt)
            A2 = jnp.exp(wo - no2)
            B2 = jnp.exp(kt - no2)
            p = A2 * p + B2 * vt
            q = A2 * q + B2
            o = no2
        wkv_scr[pl.ds(base, nrows), :] = jnp.concatenate(rows, axis=0)
        return (p, q, o)

    carry = (jnp.zeros((1, C), jnp.float32),
             jnp.zeros((1, C), jnp.float32),
             jnp.full((1, C), MIN_VALUE, jnp.float32))

    num_full = T // WKV_GROUP
    rem = T - num_full * WKV_GROUP
    if num_full > 0:
        def blk_body(b, c):
            base = pl.multiple_of(b * WKV_GROUP, WKV_GROUP)
            return process_rows(base, WKV_GROUP, c)
        carry = lax.fori_loop(0, num_full, blk_body, carry,
                              unroll=(num_full <= 8))
    if rem > 0:
        process_rows(num_full * WKV_GROUP, rem, carry)

    rwkv = sr * wkv_scr[...]
    att_out = _mm(rwkv, awo_ref)
    x = x + g1_ref[...] * att_out

    # ---------------- FFN branch: TEMRWKV_ChannelMix(ln2(x)) ----------------
    xn2 = _layernorm(x, ln2w_ref[...], ln2b_ref[...])
    xx2 = _time_shift(xn2, row0_mask)
    d2 = xn2 - xx2
    xk2 = xx2 + fmk_ref[...] * d2
    xr2 = xx2 + fmr_ref[...] * d2

    kk = _mm(xk2, fwk_ref)
    kk = jnp.square(jnp.maximum(kk, 0.0))                      # square(relu(.))
    kv = _mm(kk, fwv_ref)
    rr = _sigmoid(_mm(xr2, fwr_ref))
    x = x + g2_ref[...] * (rr * kv)

    o_ref[0] = x


# ----------------------------- wrapper -------------------------------------------------

PARAM_ORDER = ["ln0w", "ln0b", "ln1w", "ln1b", "ln2w", "ln2b",
               "g1", "g2",
               "amk", "amv", "amr", "adec", "afst",
               "awk", "awv", "awr", "awo",
               "fmk", "fmr", "fwk", "fwv", "fwr"]

WEIGHT_NAMES = {"awk", "awv", "awr", "awo", "fwk", "fwv", "fwr"}  # cast to bf16


def block_forward(x, params, apply_ln0):
    B, T, C = x.shape
    plist = []
    for name in PARAM_ORDER:
        p = params[name]
        if name in WEIGHT_NAMES:
            p = p.astype(jnp.bfloat16)   # MXU-native dtype; halves weight DMA/VMEM bytes
        plist.append(p)

    kernel = functools.partial(block_kernel, T=T, C=C, apply_ln0=apply_ln0)

    # x is pipelined per batch element; parameters/weights are grid-invariant, so
    # place them whole in VMEM (single copy, no double buffering).
    param_spec = pl.BlockSpec(memory_space=pltpu.MemorySpace.VMEM)
    in_specs = [pl.BlockSpec((1, T, C), lambda b: (b, 0, 0))]
    in_specs += [param_spec] * len(plist)

    # Explicit VMEM budget: params + (double-buffered) x/out blocks + 3 scratch planes.
    param_bytes = sum(int(np.prod(p.shape)) * p.dtype.itemsize for p in plist)
    act_bytes = 2 * 2 * T * C * 4          # in + out blocks, double-buffered, f32
    scratch_bytes = 3 * T * C * 4
    vmem_limit = int(min(max(2 * (param_bytes + act_bytes + scratch_bytes),
                             16 * 1024 * 1024),
                         64 * 1024 * 1024))

    # TODO(synk): for very large T*C on v7x (64 MiB VMEM), add a second grid axis that
    # blocks T and carry the WKV (p,q,o) state in scratch across T-blocks.
    return pl.pallas_call(
        kernel,
        out_shape=jax.ShapeDtypeStruct((B, T, C), jnp.float32),
        grid_spec=pltpu.PrefetchScalarGridSpec(
            num_scalar_prefetch=0,
            grid=(B,),
            in_specs=in_specs,
            out_specs=pl.BlockSpec((1, T, C), lambda b: (b, 0, 0)),
            scratch_shapes=[pltpu.VMEM((T, C), jnp.float32),   # k
                            pltpu.VMEM((T, C), jnp.float32),   # v
                            pltpu.VMEM((T, C), jnp.float32)],  # wkv
        ),
        compiler_params=pltpu.CompilerParams(
            dimension_semantics=("parallel",),     # batch elements independent (2 TCs on v7x)
            vmem_limit_bytes=vmem_limit),
    )(x, *plist)


# ----------------------------- pure-JAX reference (for verification) -------------------

def ref_block_forward(x, P, apply_ln0):
    def ln(z, w, b):
        mu = jnp.mean(z, -1, keepdims=True)
        var = jnp.mean((z - mu) ** 2, -1, keepdims=True)
        return (z - mu) / jnp.sqrt(var + EPS) * w + b

    def shift(z):
        return jnp.concatenate([jnp.zeros_like(z[:, :1]), z[:, :-1]], axis=1)

    def sig(z):
        return 1.0 / (1.0 + jnp.exp(-z))

    B, T, C = x.shape
    if apply_ln0:
        x = ln(x, P["ln0w"], P["ln0b"])

    xn = ln(x, P["ln1w"], P["ln1b"])
    xx = shift(xn)
    xk = xn * P["amk"] + xx * (1 - P["amk"])
    xv = xn * P["amv"] + xx * (1 - P["amv"])
    xr = xn * P["amr"] + xx * (1 - P["amr"])
    k = xk @ P["awk"]
    v = xv @ P["awv"]
    sr = sig(xr @ P["awr"])

    w = P["adec"][0] / T
    u = P["afst"][0] / T

    def step(carry, kv_t):
        p, q, o = carry
        kt, vt = kv_t
        no = jnp.maximum(o, u + kt)
        A = jnp.exp(o - no)
        Bc = jnp.exp(u + kt - no)
        y = (A * p + Bc * vt) / (A * q + Bc)
        no2 = jnp.maximum(w + o, kt)
        A2 = jnp.exp(w + o - no2)
        B2 = jnp.exp(kt - no2)
        return (A2 * p + B2 * vt, A2 * q + B2, no2), y

    init = (jnp.zeros((B, C)), jnp.zeros((B, C)), jnp.full((B, C), MIN_VALUE))
    _, ys = lax.scan(step, init, (jnp.swapaxes(k, 0, 1), jnp.swapaxes(v, 0, 1)))
    rwkv = jnp.swapaxes(ys, 0, 1)
    x = x + P["g1"] * ((sr * rwkv) @ P["awo"])

    xn2 = ln(x, P["ln2w"], P["ln2b"])
    xx2 = shift(xn2)
    xk2 = xn2 * P["fmk"] + xx2 * (1 - P["fmk"])
    xr2 = xn2 * P["fmr"] + xx2 * (1 - P["fmr"])
    kk = jnp.square(jnp.maximum(xk2 @ P["fwk"], 0.0))
    kv = kk @ P["fwv"]
    rr = sig(xr2 @ P["fwr"])
    return x + P["g2"] * (rr * kv)


# ----------------------------- deterministic parameter construction --------------------

def make_params(n_embd, n_layer, layer_id, hidden_rate, key):
    C = n_embd
    H = hidden_rate * n_embd
    ks = jax.random.split(key, 8)

    def lin(k, fi, fo):  # stored transposed: (in, out)
        return (jax.random.normal(k, (fi, fo), dtype=jnp.float32) * 0.02)

    # 'fancy' init quantities from the module
    ratio_0_to_1 = layer_id / (n_layer - 1)
    ratio_1_to_almost0 = 1.0 - layer_id / n_layer
    h = jnp.arange(C, dtype=jnp.float32)
    decay_speed = -5.0 + 8.0 * (h / (C - 1)) ** (0.7 + 1.3 * ratio_0_to_1)
    zigzag = jnp.array([((i + 1) % 3 - 1) * 0.5 for i in range(C)], dtype=jnp.float32)
    spatial_first = jnp.ones(C, jnp.float32) * math.log(0.3) + zigzag
    xv = (jnp.arange(C, dtype=jnp.float32) / C)

    P = dict(
        ln0w=jnp.ones((1, C), jnp.float32), ln0b=jnp.zeros((1, C), jnp.float32),
        ln1w=jnp.ones((1, C), jnp.float32), ln1b=jnp.zeros((1, C), jnp.float32),
        ln2w=jnp.ones((1, C), jnp.float32), ln2b=jnp.zeros((1, C), jnp.float32),
        g1=jnp.ones((1, C), jnp.float32), g2=jnp.ones((1, C), jnp.float32),
        amk=(xv ** ratio_1_to_almost0).reshape(1, C),
        amv=(xv ** ratio_1_to_almost0 + 0.3 * ratio_0_to_1).reshape(1, C),
        amr=(xv ** (0.5 * ratio_1_to_almost0)).reshape(1, C),
        adec=decay_speed.reshape(1, C),
        afst=spatial_first.reshape(1, C),
        awk=lin(ks[0], C, C), awv=lin(ks[1], C, C),
        awr=lin(ks[2], C, C), awo=lin(ks[3], C, C),
        fmk=(xv ** ratio_1_to_almost0).reshape(1, C),
        fmr=(xv ** ratio_1_to_almost0).reshape(1, C),
        fwk=lin(ks[4], C, H), fwv=lin(ks[5], H, C), fwr=lin(ks[6], C, C),
    )
    return P


# ----------------------------- main -----------------------------------------------------

if __name__ == "__main__":
    n_embd, n_layer, layer_id, hidden_rate = 32, 4, 0, 4
    B, T = 2, 16

    key = jax.random.PRNGKey(0)
    kx, kp = jax.random.split(key)
    x = jax.random.normal(kx, (B, T, n_embd), dtype=jnp.float32)
    params = make_params(n_embd, n_layer, layer_id, hidden_rate, kp)

    apply_ln0 = (layer_id == 0)
    out = block_forward(x, params, apply_ln0)
    out = jax.block_until_ready(out)

    ref = jax.block_until_ready(ref_block_forward(x, params, apply_ln0))
    # Tolerance accounts for bf16 matmul inputs and approx (EUP) reciprocal/sigmoid;
    # LayerNorm and the WKV recurrence remain f32.
    np.testing.assert_allclose(np.asarray(out), np.asarray(ref), rtol=2e-2, atol=2e-2)

    print("KERNEL_OK")
</pallas_src>

<mosaic_0001>
module attributes {stable_mosaic.version = 11 : i64} {
  func.func @block_kernel(%arg0: i32, %arg1: memref<1x16x32xf32, #tpu.memory_space<vmem>>, %arg2: memref<1x32xf32, #tpu.memory_space<vmem>>, %arg3: memref<1x32xf32, #tpu.memory_space<vmem>>, %arg4: memref<1x32xf32, #tpu.memory_space<vmem>>, %arg5: memref<1x32xf32, #tpu.memory_space<vmem>>, %arg6: memref<1x32xf32, #tpu.memory_space<vmem>>, %arg7: memref<1x32xf32, #tpu.memory_space<vmem>>, %arg8: memref<1x32xf32, #tpu.memory_space<vmem>>, %arg9: memref<1x32xf32, #tpu.memory_space<vmem>>, %arg10: memref<1x32xf32, #tpu.memory_space<vmem>>, %arg11: memref<1x32xf32, #tpu.memory_space<vmem>>, %arg12: memref<1x32xf32, #tpu.memory_space<vmem>>, %arg13: memref<1x32xf32, #tpu.memory_space<vmem>>, %arg14: memref<1x32xf32, #tpu.memory_space<vmem>>, %arg15: memref<32x32xbf16, #tpu.memory_space<vmem>>, %arg16: memref<32x32xbf16, #tpu.memory_space<vmem>>, %arg17: memref<32x32xbf16, #tpu.memory_space<vmem>>, %arg18: memref<32x32xbf16, #tpu.memory_space<vmem>>, %arg19: memref<1x32xf32, #tpu.memory_space<vmem>>, %arg20: memref<1x32xf32, #tpu.memory_space<vmem>>, %arg21: memref<32x128xbf16, #tpu.memory_space<vmem>>, %arg22: memref<128x32xbf16, #tpu.memory_space<vmem>>, %arg23: memref<32x32xbf16, #tpu.memory_space<vmem>>, %arg24: memref<1x16x32xf32, #tpu.memory_space<vmem>>, %arg25: memref<16x32xf32, #tpu.memory_space<vmem>>, %arg26: memref<16x32xf32, #tpu.memory_space<vmem>>, %arg27: memref<16x32xf32, #tpu.memory_space<vmem>>) attributes {dimension_semantics = [#tpu.dimension_semantics<parallel>], iteration_bounds = array<i64: 2>, scalar_prefetch = 0 : i64, scratch_operands = 3 : i64, tpu.core_type = #tpu.core_type<tc>, window_params = [{transform_indices = @transform_0, window_bounds = array<i64: 1, 16, 32>}, {pipeline_mode = #tpu.pipeline_mode<synchronous>, transform_indices = @transform_1, window_bounds = array<i64: 1, 32>}, {pipeline_mode = #tpu.pipeline_mode<synchronous>, transform_indices = @transform_2, window_bounds = array<i64: 1, 32>}, {pipeline_mode = #tpu.pipeline_mode<synchronous>, transform_indices = @transform_3, window_bounds = array<i64: 1, 32>}, {pipeline_mode = #tpu.pipeline_mode<synchronous>, transform_indices = @transform_4, window_bounds = array<i64: 1, 32>}, {pipeline_mode = #tpu.pipeline_mode<synchronous>, transform_indices = @transform_5, window_bounds = array<i64: 1, 32>}, {pipeline_mode = #tpu.pipeline_mode<synchronous>, transform_indices = @transform_6, window_bounds = array<i64: 1, 32>}, {pipeline_mode = #tpu.pipeline_mode<synchronous>, transform_indices = @transform_7, window_bounds = array<i64: 1, 32>}, {pipeline_mode = #tpu.pipeline_mode<synchronous>, transform_indices = @transform_8, window_bounds = array<i64: 1, 32>}, {pipeline_mode = #tpu.pipeline_mode<synchronous>, transform_indices = @transform_9, window_bounds = array<i64: 1, 32>}, {pipeline_mode = #tpu.pipeline_mode<synchronous>, transform_indices = @transform_10, window_bounds = array<i64: 1, 32>}, {pipeline_mode = #tpu.pipeline_mode<synchronous>, transform_indices = @transform_11, window_bounds = array<i64: 1, 32>}, {pipeline_mode = #tpu.pipeline_mode<synchronous>, transform_indices = @transform_12, window_bounds = array<i64: 1, 32>}, {pipeline_mode = #tpu.pipeline_mode<synchronous>, transform_indices = @transform_13, window_bounds = array<i64: 1, 32>}, {pipeline_mode = #tpu.pipeline_mode<synchronous>, transform_indices = @transform_14, window_bounds = array<i64: 32, 32>}, {pipeline_mode = #tpu.pipeline_mode<synchronous>, transform_indices = @transform_15, window_bounds = array<i64: 32, 32>}, {pipeline_mode = #tpu.pipeline_mode<synchronous>, transform_indices = @transform_16, window_bounds = array<i64: 32, 32>}, {pipeline_mode = #tpu.pipeline_mode<synchronous>, transform_indices = @transform_17, window_bounds = array<i64: 32, 32>}, {pipeline_mode = #tpu.pipeline_mode<synchronous>, transform_indices = @transform_18, window_bounds = array<i64: 1, 32>}, {pipeline_mode = #tpu.pipeline_mode<synchronous>, transform_indices = @transform_19, window_bounds = array<i64: 1, 32>}, {pipeline_mode = #tpu.pipeline_mode<synchronous>, transform_indices = @transform_20, window_bounds = array<i64: 32, 128>}, {pipeline_mode = #tpu.pipeline_mode<synchronous>, transform_indices = @transform_21, window_bounds = array<i64: 128, 32>}, {pipeline_mode = #tpu.pipeline_mode<synchronous>, transform_indices = @transform_22, window_bounds = array<i64: 32, 32>}, {transform_indices = @transform_23, window_bounds = array<i64: 1, 16, 32>}]} {
    %c0 = arith.constant 0 : index
    %c0_0 = arith.constant 0 : index
    %c0_1 = arith.constant 0 : index
    %0 = vector.load %arg1[%c0, %c0_0, %c0_1] : memref<1x16x32xf32, #tpu.memory_space<vmem>>, vector<1x16x32xf32>
    %1 = vector.shape_cast %0 : vector<1x16x32xf32> to vector<16x32xf32>
    %2 = tpu.iota {dimensions = array<i32: 0>} : vector<16x32xi32>
    %c0_i32 = arith.constant 0 : i32
    %3 = vector.broadcast %c0_i32 : i32 to vector<16x32xi32>
    %4 = arith.cmpi eq, %2, %3 : vector<16x32xi32>
    %c0_2 = arith.constant 0 : index
    %c0_3 = arith.constant 0 : index
    %5 = vector.load %arg2[%c0_2, %c0_3] : memref<1x32xf32, #tpu.memory_space<vmem>>, vector<1x32xf32>
    %c0_4 = arith.constant 0 : index
    %c0_5 = arith.constant 0 : index
    %6 = vector.load %arg3[%c0_4, %c0_5] : memref<1x32xf32, #tpu.memory_space<vmem>>, vector<1x32xf32>
    %cst = arith.constant dense<0.000000e+00> : vector<16xf32>
    %7 = vector.multi_reduction <add>, %1, %cst [1] : vector<16x32xf32> to vector<16xf32>
    %8 = vector.shape_cast %7 : vector<16xf32> to vector<16x1xf32>
    %cst_6 = arith.constant 3.200000e+01 : f32
    %9 = vector.broadcast %cst_6 : f32 to vector<16x1xf32>
    %10 = arith.divf %8, %9 : vector<16x1xf32>
    %11 = vector.broadcast %10 : vector<16x1xf32> to vector<16x32xf32>
    %12 = arith.subf %1, %11 : vector<16x32xf32>
    %13 = arith.mulf %12, %12 : vector<16x32xf32>
    %cst_7 = arith.constant dense<0.000000e+00> : vector<16xf32>
    %14 = vector.multi_reduction <add>, %13, %cst_7 [1] : vector<16x32xf32> to vector<16xf32>
    %15 = vector.shape_cast %14 : vector<16xf32> to vector<16x1xf32>
    %cst_8 = arith.constant 3.200000e+01 : f32
    %16 = vector.broadcast %cst_8 : f32 to vector<16x1xf32>
    %17 = arith.divf %15, %16 : vector<16x1xf32>
    %cst_9 = arith.constant 9.99999974E-6 : f32
    %18 = vector.broadcast %cst_9 : f32 to vector<16x1xf32>
    %19 = arith.addf %17, %18 : vector<16x1xf32>
    %20 = math.rsqrt %19 : vector<16x1xf32>
    %21 = vector.broadcast %20 : vector<16x1xf32> to vector<16x32xf32>
    %22 = arith.mulf %12, %21 : vector<16x32xf32>
    %23 = vector.broadcast %5 : vector<1x32xf32> to vector<16x32xf32>
    %24 = arith.mulf %22, %23 : vector<16x32xf32>
    %25 = vector.broadcast %6 : vector<1x32xf32> to vector<16x32xf32>
    %26 = arith.addf %24, %25 : vector<16x32xf32>
    %c0_10 = arith.constant 0 : index
    %c0_11 = arith.constant 0 : index
    %27 = vector.load %arg4[%c0_10, %c0_11] : memref<1x32xf32, #tpu.memory_space<vmem>>, vector<1x32xf32>
    %c0_12 = arith.constant 0 : index
    %c0_13 = arith.constant 0 : index
    %28 = vector.load %arg5[%c0_12, %c0_13] : memref<1x32xf32, #tpu.memory_space<vmem>>, vector<1x32xf32>
    %cst_14 = arith.constant dense<0.000000e+00> : vector<16xf32>
    %29 = vector.multi_reduction <add>, %26, %cst_14 [1] : vector<16x32xf32> to vector<16xf32>
    %30 = vector.shape_cast %29 : vector<16xf32> to vector<16x1xf32>
    %cst_15 = arith.constant 3.200000e+01 : f32
    %31 = vector.broadcast %cst_15 : f32 to vector<16x1xf32>
    %32 = arith.divf %30, %31 : vector<16x1xf32>
    %33 = vector.broadcast %32 : vector<16x1xf32> to vector<16x32xf32>
    %34 = arith.subf %26, %33 : vector<16x32xf32>
    %35 = arith.mulf %34, %34 : vector<16x32xf32>
    %cst_16 = arith.constant dense<0.000000e+00> : vector<16xf32>
    %36 = vector.multi_reduction <add>, %35, %cst_16 [1] : vector<16x32xf32> to vector<16xf32>
    %37 = vector.shape_cast %36 : vector<16xf32> to vector<16x1xf32>
    %cst_17 = arith.constant 3.200000e+01 : f32
    %38 = vector.broadcast %cst_17 : f32 to vector<16x1xf32>
    %39 = arith.divf %37, %38 : vector<16x1xf32>
    %cst_18 = arith.constant 9.99999974E-6 : f32
    %40 = vector.broadcast %cst_18 : f32 to vector<16x1xf32>
    %41 = arith.addf %39, %40 : vector<16x1xf32>
    %42 = math.rsqrt %41 : vector<16x1xf32>
    %43 = vector.broadcast %42 : vector<16x1xf32> to vector<16x32xf32>
    %44 = arith.mulf %34, %43 : vector<16x32xf32>
    %45 = vector.broadcast %27 : vector<1x32xf32> to vector<16x32xf32>
    %46 = arith.mulf %44, %45 : vector<16x32xf32>
    %47 = vector.broadcast %28 : vector<1x32xf32> to vector<16x32xf32>
    %48 = arith.addf %46, %47 : vector<16x32xf32>
    %c1_i32 = arith.constant 1 : i32
    %49 = tpu.dynamic_rotate %48 by %c1_i32 dim 0 : vector<16x32xf32>, i32 -> vector<16x32xf32>
    %cst_19 = arith.constant 0.000000e+00 : f32
    %50 = vector.broadcast %cst_19 : f32 to vector<16x32xf32>
    %51 = arith.select %4, %50, %49 : vector<16x32xi1>, vector<16x32xf32>
    %52 = arith.subf %48, %51 : vector<16x32xf32>
    %c0_20 = arith.constant 0 : index
    %c0_21 = arith.constant 0 : index
    %53 = vector.load %arg10[%c0_20, %c0_21] : memref<1x32xf32, #tpu.memory_space<vmem>>, vector<1x32xf32>
    %54 = vector.broadcast %53 : vector<1x32xf32> to vector<16x32xf32>
    %55 = arith.mulf %54, %52 : vector<16x32xf32>
    %56 = arith.addf %51, %55 : vector<16x32xf32>
    %c0_22 = arith.constant 0 : index
    %c0_23 = arith.constant 0 : index
    %57 = vector.load %arg11[%c0_22, %c0_23] : memref<1x32xf32, #tpu.memory_space<vmem>>, vector<1x32xf32>
    %58 = vector.broadcast %57 : vector<1x32xf32> to vector<16x32xf32>
    %59 = arith.mulf %58, %52 : vector<16x32xf32>
    %60 = arith.addf %51, %59 : vector<16x32xf32>
    %c0_24 = arith.constant 0 : index
    %c0_25 = arith.constant 0 : index
    %61 = vector.load %arg12[%c0_24, %c0_25] : memref<1x32xf32, #tpu.memory_space<vmem>>, vector<1x32xf32>
    %62 = vector.broadcast %61 : vector<1x32xf32> to vector<16x32xf32>
    %63 = arith.mulf %62, %52 : vector<16x32xf32>
    %64 = arith.addf %51, %63 : vector<16x32xf32>
    %65 = arith.truncf %56 : vector<16x32xf32> to vector<16x32xbf16>
    %c0_26 = arith.constant 0 : index
    %c0_27 = arith.constant 0 : index
    %66 = vector.load %arg15[%c0_26, %c0_27] : memref<32x32xbf16, #tpu.memory_space<vmem>>, vector<32x32xbf16>
    %cst_28 = arith.constant dense<0.000000e+00> : vector<16x32xf32>
    %67 = tpu.matmul %65, %66, %cst_28 {dimension_numbers = #tpu.dot_dimension_numbers<[1], [0], [0], [1], [0, 0, 1, 1], [], []>} : vector<16x32xbf16>, vector<32x32xbf16>, vector<16x32xf32> -> vector<16x32xf32>
    %68 = arith.truncf %60 : vector<16x32xf32> to vector<16x32xbf16>
    %c0_29 = arith.constant 0 : index
    %c0_30 = arith.constant 0 : index
    %69 = vector.load %arg16[%c0_29, %c0_30] : memref<32x32xbf16, #tpu.memory_space<vmem>>, vector<32x32xbf16>
    %cst_31 = arith.constant dense<0.000000e+00> : vector<16x32xf32>
    %70 = tpu.matmul %68, %69, %cst_31 {dimension_numbers = #tpu.dot_dimension_numbers<[1], [0], [0], [1], [0, 0, 1, 1], [], []>} : vector<16x32xbf16>, vector<32x32xbf16>, vector<16x32xf32> -> vector<16x32xf32>
    %71 = arith.truncf %64 : vector<16x32xf32> to vector<16x32xbf16>
    %c0_32 = arith.constant 0 : index
    %c0_33 = arith.constant 0 : index
    %72 = vector.load %arg17[%c0_32, %c0_33] : memref<32x32xbf16, #tpu.memory_space<vmem>>, vector<32x32xbf16>
    %cst_34 = arith.constant dense<0.000000e+00> : vector<16x32xf32>
    %73 = tpu.matmul %71, %72, %cst_34 {dimension_numbers = #tpu.dot_dimension_numbers<[1], [0], [0], [1], [0, 0, 1, 1], [], []>} : vector<16x32xbf16>, vector<32x32xbf16>, vector<16x32xf32> -> vector<16x32xf32>
    %cst_35 = arith.constant 0.000000e+00 : f32
    %74 = vector.broadcast %cst_35 : f32 to vector<16x32xf32>
    %75 = arith.subf %74, %73 : vector<16x32xf32>
    %76 = math.exp %75 : vector<16x32xf32>
    %cst_36 = arith.constant 1.000000e+00 : f32
    %77 = vector.broadcast %cst_36 : f32 to vector<16x32xf32>
    %78 = arith.addf %77, %76 : vector<16x32xf32>
    %79 = tpu.reciprocal %78 {approx = true} : vector<16x32xf32> -> vector<16x32xf32>
    %c0_37 = arith.constant 0 : index
    %c0_38 = arith.constant 0 : index
    %80 = vector.load %arg25[%c0_37, %c0_38] : memref<16x32xf32, #tpu.memory_space<vmem>>, vector<16x32xf32>
    tpu.vector_store %arg25[%c0_37, %c0_38], %67 {strides = array<i32>} : memref<16x32xf32, #tpu.memory_space<vmem>>, vector<16x32xf32>,
    %c0_39 = arith.constant 0 : index
    %c0_40 = arith.constant 0 : index
    %81 = vector.load %arg26[%c0_39, %c0_40] : memref<16x32xf32, #tpu.memory_space<vmem>>, vector<16x32xf32>
    tpu.vector_store %arg26[%c0_39, %c0_40], %70 {strides = array<i32>} : memref<16x32xf32, #tpu.memory_space<vmem>>, vector<16x32xf32>,
    %c0_41 = arith.constant 0 : index
    %c0_42 = arith.constant 0 : index
    %82 = vector.load %arg13[%c0_41, %c0_42] : memref<1x32xf32, #tpu.memory_space<vmem>>, vector<1x32xf32>
    %cst_43 = arith.constant 1.600000e+01 : f32
    %83 = vector.broadcast %cst_43 : f32 to vector<1x32xf32>
    %84 = arith.divf %82, %83 : vector<1x32xf32>
    %c0_44 = arith.constant 0 : index
    %c0_45 = arith.constant 0 : index
    %85 = vector.load %arg14[%c0_44, %c0_45] : memref<1x32xf32, #tpu.memory_space<vmem>>, vector<1x32xf32>
    %cst_46 = arith.constant 1.600000e+01 : f32
    %86 = vector.broadcast %cst_46 : f32 to vector<1x32xf32>
    %87 = arith.divf %85, %86 : vector<1x32xf32>
    %cst_47 = arith.constant 0.000000e+00 : f32
    %88 = vector.broadcast %cst_47 : f32 to vector<1x32xf32>
    %cst_48 = arith.constant 0.000000e+00 : f32
    %89 = vector.broadcast %cst_48 : f32 to vector<1x32xf32>
    %cst_49 = arith.constant -9.99999968E+37 : f32
    %90 = vector.broadcast %cst_49 : f32 to vector<1x32xf32>
    %c0_i32_50 = arith.constant 0 : i32
    %c8_i32 = arith.constant 8 : i32
    %91 = arith.muli %c0_i32_50, %c8_i32 : i32
    %92 = tpu.assume_multiple %91, 8 : i32
    %93 = arith.index_cast %92 : i32 to index
    %c0_51 = arith.constant 0 : index
    %94 = vector.load %arg25[%93, %c0_51] : memref<16x32xf32, #tpu.memory_space<vmem>>, vector<8x32xf32>
    %95 = arith.index_cast %92 : i32 to index
    %c0_52 = arith.constant 0 : index
    %96 = vector.load %arg26[%95, %c0_52] : memref<16x32xf32, #tpu.memory_space<vmem>>, vector<8x32xf32>
    %97 = vector.broadcast %87 : vector<1x32xf32> to vector<8x32xf32>
    %98 = arith.addf %94, %97 : vector<8x32xf32>
    %99 = vector.extract_strided_slice %94 {offsets = [0, 0], sizes = [1, 32], strides = [1, 1]} : vector<8x32xf32> to vector<1x32xf32>
    %100 = vector.extract_strided_slice %98 {offsets = [0, 0], sizes = [1, 32], strides = [1, 1]} : vector<8x32xf32> to vector<1x32xf32>
    %101 = vector.extract_strided_slice %96 {offsets = [0, 0], sizes = [1, 32], strides = [1, 1]} : vector<8x32xf32> to vector<1x32xf32>
    %102 = arith.addf %84, %90 : vector<1x32xf32>
    %103 = arith.maximumf %90, %100 : vector<1x32xf32>
    %104 = arith.subf %90, %103 : vector<1x32xf32>
    %105 = math.exp %104 : vector<1x32xf32>
    %106 = arith.subf %100, %103 : vector<1x32xf32>
    %107 = math.exp %106 : vector<1x32xf32>
    %108 = arith.mulf %105, %88 : vector<1x32xf32>
    %109 = arith.mulf %107, %101 : vector<1x32xf32>
    %110 = arith.addf %108, %109 : vector<1x32xf32>
    %111 = arith.mulf %105, %89 : vector<1x32xf32>
    %112 = arith.addf %111, %107 : vector<1x32xf32>
    %113 = tpu.reciprocal %112 {approx = true} : vector<1x32xf32> -> vector<1x32xf32>
    %114 = arith.mulf %110, %113 : vector<1x32xf32>
    %115 = arith.maximumf %102, %99 : vector<1x32xf32>
    %116 = arith.subf %102, %115 : vector<1x32xf32>
    %117 = math.exp %116 : vector<1x32xf32>
    %118 = arith.subf %99, %115 : vector<1x32xf32>
    %119 = math.exp %118 : vector<1x32xf32>
    %120 = arith.mulf %117, %88 : vector<1x32xf32>
    %121 = arith.mulf %119, %101 : vector<1x32xf32>
    %122 = arith.addf %120, %121 : vector<1x32xf32>
    %123 = arith.mulf %117, %89 : vector<1x32xf32>
    %124 = arith.addf %123, %119 : vector<1x32xf32>
    %125 = vector.extract_strided_slice %94 {offsets = [1, 0], sizes = [1, 32], strides = [1, 1]} : vector<8x32xf32> to vector<1x32xf32>
    %126 = vector.extract_strided_slice %98 {offsets = [1, 0], sizes = [1, 32], strides = [1, 1]} : vector<8x32xf32> to vector<1x32xf32>
    %127 = vector.extract_strided_slice %96 {offsets = [1, 0], sizes = [1, 32], strides = [1, 1]} : vector<8x32xf32> to vector<1x32xf32>
    %128 = arith.addf %84, %115 : vector<1x32xf32>
    %129 = arith.maximumf %115, %126 : vector<1x32xf32>
    %130 = arith.subf %115, %129 : vector<1x32xf32>
    %131 = math.exp %130 : vector<1x32xf32>
    %132 = arith.subf %126, %129 : vector<1x32xf32>
    %133 = math.exp %132 : vector<1x32xf32>
    %134 = arith.mulf %131, %122 : vector<1x32xf32>
    %135 = arith.mulf %133, %127 : vector<1x32xf32>
    %136 = arith.addf %134, %135 : vector<1x32xf32>
    %137 = arith.mulf %131, %124 : vector<1x32xf32>
    %138 = arith.addf %137, %133 : vector<1x32xf32>
    %139 = tpu.reciprocal %138 {approx = true} : vector<1x32xf32> -> vector<1x32xf32>
    %140 = arith.mulf %136, %139 : vector<1x32xf32>
    %141 = arith.maximumf %128, %125 : vector<1x32xf32>
    %142 = arith.subf %128, %141 : vector<1x32xf32>
    %143 = math.exp %142 : vector<1x32xf32>
    %144 = arith.subf %125, %141 : vector<1x32xf32>
    %145 = math.exp %144 : vector<1x32xf32>
    %146 = arith.mulf %143, %122 : vector<1x32xf32>
    %147 = arith.mulf %145, %127 : vector<1x32xf32>
    %148 = arith.addf %146, %147 : vector<1x32xf32>
    %149 = arith.mulf %143, %124 : vector<1x32xf32>
    %150 = arith.addf %149, %145 : vector<1x32xf32>
    %151 = vector.extract_strided_slice %94 {offsets = [2, 0], sizes = [1, 32], strides = [1, 1]} : vector<8x32xf32> to vector<1x32xf32>
    %152 = vector.extract_strided_slice %98 {offsets = [2, 0], sizes = [1, 32], strides = [1, 1]} : vector<8x32xf32> to vector<1x32xf32>
    %153 = vector.extract_strided_slice %96 {offsets = [2, 0], sizes = [1, 32], strides = [1, 1]} : vector<8x32xf32> to vector<1x32xf32>
    %154 = arith.addf %84, %141 : vector<1x32xf32>
    %155 = arith.maximumf %141, %152 : vector<1x32xf32>
    %156 = arith.subf %141, %155 : vector<1x32xf32>
    %157 = math.exp %156 : vector<1x32xf32>
    %158 = arith.subf %152, %155 : vector<1x32xf32>
    %159 = math.exp %158 : vector<1x32xf32>
    %160 = arith.mulf %157, %148 : vector<1x32xf32>
    %161 = arith.mulf %159, %153 : vector<1x32xf32>
    %162 = arith.addf %160, %161 : vector<1x32xf32>
    %163 = arith.mulf %157, %150 : vector<1x32xf32>
    %164 = arith.addf %163, %159 : vector<1x32xf32>
    %165 = tpu.reciprocal %164 {approx = true} : vector<1x32xf32> -> vector<1x32xf32>
    %166 = arith.mulf %162, %165 : vector<1x32xf32>
    %167 = arith.maximumf %154, %151 : vector<1x32xf32>
    %168 = arith.subf %154, %167 : vector<1x32xf32>
    %169 = math.exp %168 : vector<1x32xf32>
    %170 = arith.subf %151, %167 : vector<1x32xf32>
    %171 = math.exp %170 : vector<1x32xf32>
    %172 = arith.mulf %169, %148 : vector<1x32xf32>
    %173 = arith.mulf %171, %153 : vector<1x32xf32>
    %174 = arith.addf %172, %173 : vector<1x32xf32>
    %175 = arith.mulf %169, %150 : vector<1x32xf32>
    %176 = arith.addf %175, %171 : vector<1x32xf32>
    %177 = vector.extract_strided_slice %94 {offsets = [3, 0], sizes = [1, 32], strides = [1, 1]} : vector<8x32xf32> to vector<1x32xf32>
    %178 = vector.extract_strided_slice %98 {offsets = [3, 0], sizes = [1, 32], strides = [1, 1]} : vector<8x32xf32> to vector<1x32xf32>
    %179 = vector.extract_strided_slice %96 {offsets = [3, 0], sizes = [1, 32], strides = [1, 1]} : vector<8x32xf32> to vector<1x32xf32>
    %180 = arith.addf %84, %167 : vector<1x32xf32>
    %181 = arith.maximumf %167, %178 : vector<1x32xf32>
    %182 = arith.subf %167, %181 : vector<1x32xf32>
    %183 = math.exp %182 : vector<1x32xf32>
    %184 = arith.subf %178, %181 : vector<1x32xf32>
    %185 = math.exp %184 : vector<1x32xf32>
    %186 = arith.mulf %183, %174 : vector<1x32xf32>
    %187 = arith.mulf %185, %179 : vector<1x32xf32>
    %188 = arith.addf %186, %187 : vector<1x32xf32>
    %189 = arith.mulf %183, %176 : vector<1x32xf32>
    %190 = arith.addf %189, %185 : vector<1x32xf32>
    %191 = tpu.reciprocal %190 {approx = true} : vector<1x32xf32> -> vector<1x32xf32>
    %192 = arith.mulf %188, %191 : vector<1x32xf32>
    %193 = arith.maximumf %180, %177 : vector<1x32xf32>
    %194 = arith.subf %180, %193 : vector<1x32xf32>
    %195 = math.exp %194 : vector<1x32xf32>
    %196 = arith.subf %177, %193 : vector<1x32xf32>
    %197 = math.exp %196 : vector<1x32xf32>
    %198 = arith.mulf %195, %174 : vector<1x32xf32>
    %199 = arith.mulf %197, %179 : vector<1x32xf32>
    %200 = arith.addf %198, %199 : vector<1x32xf32>
    %201 = arith.mulf %195, %176 : vector<1x32xf32>
    %202 = arith.addf %201, %197 : vector<1x32xf32>
    %203 = vector.extract_strided_slice %94 {offsets = [4, 0], sizes = [1, 32], strides = [1, 1]} : vector<8x32xf32> to vector<1x32xf32>
    %204 = vector.extract_strided_slice %98 {offsets = [4, 0], sizes = [1, 32], strides = [1, 1]} : vector<8x32xf32> to vector<1x32xf32>
    %205 = vector.extract_strided_slice %96 {offsets = [4, 0], sizes = [1, 32], strides = [1, 1]} : vector<8x32xf32> to vector<1x32xf32>
    %206 = arith.addf %84, %193 : vector<1x32xf32>
    %207 = arith.maximumf %193, %204 : vector<1x32xf32>
    %208 = arith.subf %193, %207 : vector<1x32xf32>
    %209 = math.exp %208 : vector<1x32xf32>
    %210 = arith.subf %204, %207 : vector<1x32xf32>
    %211 = math.exp %210 : vector<1x32xf32>
    %212 = arith.mulf %209, %200 : vector<1x32xf32>
    %213 = arith.mulf %211, %205 : vector<1x32xf32>
    %214 = arith.addf %212, %213 : vector<1x32xf32>
    %215 = arith.mulf %209, %202 : vector<1x32xf32>
    %216 = arith.addf %215, %211 : vector<1x32xf32>
    %217 = tpu.reciprocal %216 {approx = true} : vector<1x32xf32> -> vector<1x32xf32>
    %218 = arith.mulf %214, %217 : vector<1x32xf32>
    %219 = arith.maximumf %206, %203 : vector<1x32xf32>
    %220 = arith.subf %206, %219 : vector<1x32xf32>
    %221 = math.exp %220 : vector<1x32xf32>
    %222 = arith.subf %203, %219 : vector<1x32xf32>
    %223 = math.exp %222 : vector<1x32xf32>
    %224 = arith.mulf %221, %200 : vector<1x32xf32>
    %225 = arith.mulf %223, %205 : vector<1x32xf32>
    %226 = arith.addf %224, %225 : vector<1x32xf32>
    %227 = arith.mulf %221, %202 : vector<1x32xf32>
    %228 = arith.addf %227, %223 : vector<1x32xf32>
    %229 = vector.extract_strided_slice %94 {offsets = [5, 0], sizes = [1, 32], strides = [1, 1]} : vector<8x32xf32> to vector<1x32xf32>
    %230 = vector.extract_strided_slice %98 {offsets = [5, 0], sizes = [1, 32], strides = [1, 1]} : vector<8x32xf32> to vector<1x32xf32>
    %231 = vector.extract_strided_slice %96 {offsets = [5, 0], sizes = [1, 32], strides = [1, 1]} : vector<8x32xf32> to vector<1x32xf32>
    %232 = arith.addf %84, %219 : vector<1x32xf32>
    %233 = arith.maximumf %219, %230 : vector<1x32xf32>
    %234 = arith.subf %219, %233 : vector<1x32xf32>
    %235 = math.exp %234 : vector<1x32xf32>
    %236 = arith.subf %230, %233 : vector<1x32xf32>
    %237 = math.exp %236 : vector<1x32xf32>
    %238 = arith.mulf %235, %226 : vector<1x32xf32>
    %239 = arith.mulf %237, %231 : vector<1x32xf32>
    %240 = arith.addf %238, %239 : vector<1x32xf32>
    %241 = arith.mulf %235, %228 : vector<1x32xf32>
    %242 = arith.addf %241, %237 : vector<1x32xf32>
    %243 = tpu.reciprocal %242 {approx = true} : vector<1x32xf32> -> vector<1x32xf32>
    %244 = arith.mulf %240, %243 : vector<1x32xf32>
    %245 = arith.maximumf %232, %229 : vector<1x32xf32>
    %246 = arith.subf %232, %245 : vector<1x32xf32>
    %247 = math.exp %246 : vector<1x32xf32>
    %248 = arith.subf %229, %245 : vector<1x32xf32>
    %249 = math.exp %248 : vector<1x32xf32>
    %250 = arith.mulf %247, %226 : vector<1x32xf32>
    %251 = arith.mulf %249, %231 : vector<1x32xf32>
    %252 = arith.addf %250, %251 : vector<1x32xf32>
    %253 = arith.mulf %247, %228 : vector<1x32xf32>
    %254 = arith.addf %253, %249 : vector<1x32xf32>
    %255 = vector.extract_strided_slice %94 {offsets = [6, 0], sizes = [1, 32], strides = [1, 1]} : vector<8x32xf32> to vector<1x32xf32>
    %256 = vector.extract_strided_slice %98 {offsets = [6, 0], sizes = [1, 32], strides = [1, 1]} : vector<8x32xf32> to vector<1x32xf32>
    %257 = vector.extract_strided_slice %96 {offsets = [6, 0], sizes = [1, 32], strides = [1, 1]} : vector<8x32xf32> to vector<1x32xf32>
    %258 = arith.addf %84, %245 : vector<1x32xf32>
    %259 = arith.maximumf %245, %256 : vector<1x32xf32>
    %260 = arith.subf %245, %259 : vector<1x32xf32>
    %261 = math.exp %260 : vector<1x32xf32>
    %262 = arith.subf %256, %259 : vector<1x32xf32>
    %263 = math.exp %262 : vector<1x32xf32>
    %264 = arith.mulf %261, %252 : vector<1x32xf32>
    %265 = arith.mulf %263, %257 : vector<1x32xf32>
    %266 = arith.addf %264, %265 : vector<1x32xf32>
    %267 = arith.mulf %261, %254 : vector<1x32xf32>
    %268 = arith.addf %267, %263 : vector<1x32xf32>
    %269 = tpu.reciprocal %268 {approx = true} : vector<1x32xf32> -> vector<1x32xf32>
    %270 = arith.mulf %266, %269 : vector<1x32xf32>
    %271 = arith.maximumf %258, %255 : vector<1x32xf32>
    %272 = arith.subf %258, %271 : vector<1x32xf32>
    %273 = math.exp %272 : vector<1x32xf32>
    %274 = arith.subf %255, %271 : vector<1x32xf32>
    %275 = math.exp %274 : vector<1x32xf32>
    %276 = arith.mulf %273, %252 : vector<1x32xf32>
    %277 = arith.mulf %275, %257 : vector<1x32xf32>
    %278 = arith.addf %276, %277 : vector<1x32xf32>
    %279 = arith.mulf %273, %254 : vector<1x32xf32>
    %280 = arith.addf %279, %275 : vector<1x32xf32>
    %281 = vector.extract_strided_slice %94 {offsets = [7, 0], sizes = [1, 32], strides = [1, 1]} : vector<8x32xf32> to vector<1x32xf32>
    %282 = vector.extract_strided_slice %98 {offsets = [7, 0], sizes = [1, 32], strides = [1, 1]} : vector<8x32xf32> to vector<1x32xf32>
    %283 = vector.extract_strided_slice %96 {offsets = [7, 0], sizes = [1, 32], strides = [1, 1]} : vector<8x32xf32> to vector<1x32xf32>
    %284 = arith.addf %84, %271 : vector<1x32xf32>
    %285 = arith.maximumf %271, %282 : vector<1x32xf32>
    %286 = arith.subf %271, %285 : vector<1x32xf32>
    %287 = math.exp %286 : vector<1x32xf32>
    %288 = arith.subf %282, %285 : vector<1x32xf32>
    %289 = math.exp %288 : vector<1x32xf32>
    %290 = arith.mulf %287, %278 : vector<1x32xf32>
    %291 = arith.mulf %289, %283 : vector<1x32xf32>
    %292 = arith.addf %290, %291 : vector<1x32xf32>
    %293 = arith.mulf %287, %280 : vector<1x32xf32>
    %294 = arith.addf %293, %289 : vector<1x32xf32>
    %295 = tpu.reciprocal %294 {approx = true} : vector<1x32xf32> -> vector<1x32xf32>
    %296 = arith.mulf %292, %295 : vector<1x32xf32>
    %297 = arith.maximumf %284, %281 : vector<1x32xf32>
    %298 = arith.subf %284, %297 : vector<1x32xf32>
    %299 = math.exp %298 : vector<1x32xf32>
    %300 = arith.subf %281, %297 : vector<1x32xf32>
    %301 = math.exp %300 : vector<1x32xf32>
    %302 = arith.mulf %299, %278 : vector<1x32xf32>
    %303 = arith.mulf %301, %283 : vector<1x32xf32>
    %304 = arith.addf %302, %303 : vector<1x32xf32>
    %305 = arith.mulf %299, %280 : vector<1x32xf32>
    %306 = arith.addf %305, %301 : vector<1x32xf32>
    %307 = tpu.concatenate %114, %140, %166, %192, %218, %244, %270, %296 in 0 : vector<1x32xf32>, vector<1x32xf32>, vector<1x32xf32>, vector<1x32xf32>, vector<1x32xf32>, vector<1x32xf32>, vector<1x32xf32>, vector<1x32xf32> -> vector<8x32xf32>
    %308 = arith.index_cast %92 : i32 to index
    %c0_53 = arith.constant 0 : index
    %309 = vector.load %arg27[%308, %c0_53] : memref<16x32xf32, #tpu.memory_space<vmem>>, vector<8x32xf32>
    tpu.vector_store %arg27[%308, %c0_53], %307 {strides = array<i32>} : memref<16x32xf32, #tpu.memory_space<vmem>>, vector<8x32xf32>,
    %c1_i32_54 = arith.constant 1 : i32
    %c8_i32_55 = arith.constant 8 : i32
    %310 = arith.muli %c1_i32_54, %c8_i32_55 : i32
    %311 = tpu.assume_multiple %310, 8 : i32
    %312 = arith.index_cast %311 : i32 to index
    %c0_56 = arith.constant 0 : index
    %313 = vector.load %arg25[%312, %c0_56] : memref<16x32xf32, #tpu.memory_space<vmem>>, vector<8x32xf32>
    %314 = arith.index_cast %311 : i32 to index
    %c0_57 = arith.constant 0 : index
    %315 = vector.load %arg26[%314, %c0_57] : memref<16x32xf32, #tpu.memory_space<vmem>>, vector<8x32xf32>
    %316 = vector.broadcast %87 : vector<1x32xf32> to vector<8x32xf32>
    %317 = arith.addf %313, %316 : vector<8x32xf32>
    %318 = vector.extract_strided_slice %313 {offsets = [0, 0], sizes = [1, 32], strides = [1, 1]} : vector<8x32xf32> to vector<1x32xf32>
    %319 = vector.extract_strided_slice %317 {offsets = [0, 0], sizes = [1, 32], strides = [1, 1]} : vector<8x32xf32> to vector<1x32xf32>
    %320 = vector.extract_strided_slice %315 {offsets = [0, 0], sizes = [1, 32], strides = [1, 1]} : vector<8x32xf32> to vector<1x32xf32>
    %321 = arith.addf %84, %297 : vector<1x32xf32>
    %322 = arith.maximumf %297, %319 : vector<1x32xf32>
    %323 = arith.subf %297, %322 : vector<1x32xf32>
    %324 = math.exp %323 : vector<1x32xf32>
    %325 = arith.subf %319, %322 : vector<1x32xf32>
    %326 = math.exp %325 : vector<1x32xf32>
    %327 = arith.mulf %324, %304 : vector<1x32xf32>
    %328 = arith.mulf %326, %320 : vector<1x32xf32>
    %329 = arith.addf %327, %328 : vector<1x32xf32>
    %330 = arith.mulf %324, %306 : vector<1x32xf32>
    %331 = arith.addf %330, %326 : vector<1x32xf32>
    %332 = tpu.reciprocal %331 {approx = true} : vector<1x32xf32> -> vector<1x32xf32>
    %333 = arith.mulf %329, %332 : vector<1x32xf32>
    %334 = arith.maximumf %321, %318 : vector<1x32xf32>
    %335 = arith.subf %321, %334 : vector<1x32xf32>
    %336 = math.exp %335 : vector<1x32xf32>
    %337 = arith.subf %318, %334 : vector<1x32xf32>
    %338 = math.exp %337 : vector<1x32xf32>
    %339 = arith.mulf %336, %304 : vector<1x32xf32>
    %340 = arith.mulf %338, %320 : vector<1x32xf32>
    %341 = arith.addf %339, %340 : vector<1x32xf32>
    %342 = arith.mulf %336, %306 : vector<1x32xf32>
    %343 = arith.addf %342, %338 : vector<1x32xf32>
    %344 = vector.extract_strided_slice %313 {offsets = [1, 0], sizes = [1, 32], strides = [1, 1]} : vector<8x32xf32> to vector<1x32xf32>
    %345 = vector.extract_strided_slice %317 {offsets = [1, 0], sizes = [1, 32], strides = [1, 1]} : vector<8x32xf32> to vector<1x32xf32>
    %346 = vector.extract_strided_slice %315 {offsets = [1, 0], sizes = [1, 32], strides = [1, 1]} : vector<8x32xf32> to vector<1x32xf32>
    %347 = arith.addf %84, %334 : vector<1x32xf32>
    %348 = arith.maximumf %334, %345 : vector<1x32xf32>
    %349 = arith.subf %334, %348 : vector<1x32xf32>
    %350 = math.exp %349 : vector<1x32xf32>
    %351 = arith.subf %345, %348 : vector<1x32xf32>
    %352 = math.exp %351 : vector<1x32xf32>
    %353 = arith.mulf %350, %341 : vector<1x32xf32>
    %354 = arith.mulf %352, %346 : vector<1x32xf32>
    %355 = arith.addf %353, %354 : vector<1x32xf32>
    %356 = arith.mulf %350, %343 : vector<1x32xf32>
    %357 = arith.addf %356, %352 : vector<1x32xf32>
    %358 = tpu.reciprocal %357 {approx = true} : vector<1x32xf32> -> vector<1x32xf32>
    %359 = arith.mulf %355, %358 : vector<1x32xf32>
    %360 = arith.maximumf %347, %344 : vector<1x32xf32>
    %361 = arith.subf %347, %360 : vector<1x32xf32>
    %362 = math.exp %361 : vector<1x32xf32>
    %363 = arith.subf %344, %360 : vector<1x32xf32>
    %364 = math.exp %363 : vector<1x32xf32>
    %365 = arith.mulf %362, %341 : vector<1x32xf32>
    %366 = arith.mulf %364, %346 : vector<1x32xf32>
    %367 = arith.addf %365, %366 : vector<1x32xf32>
    %368 = arith.mulf %362, %343 : vector<1x32xf32>
    %369 = arith.addf %368, %364 : vector<1x32xf32>
    %370 = vector.extract_strided_slice %313 {offsets = [2, 0], sizes = [1, 32], strides = [1, 1]} : vector<8x32xf32> to vector<1x32xf32>
    %371 = vector.extract_strided_slice %317 {offsets = [2, 0], sizes = [1, 32], strides = [1, 1]} : vector<8x32xf32> to vector<1x32xf32>
    %372 = vector.extract_strided_slice %315 {offsets = [2, 0], sizes = [1, 32], strides = [1, 1]} : vector<8x32xf32> to vector<1x32xf32>
    %373 = arith.addf %84, %360 : vector<1x32xf32>
    %374 = arith.maximumf %360, %371 : vector<1x32xf32>
    %375 = arith.subf %360, %374 : vector<1x32xf32>
    %376 = math.exp %375 : vector<1x32xf32>
    %377 = arith.subf %371, %374 : vector<1x32xf32>
    %378 = math.exp %377 : vector<1x32xf32>
    %379 = arith.mulf %376, %367 : vector<1x32xf32>
    %380 = arith.mulf %378, %372 : vector<1x32xf32>
    %381 = arith.addf %379, %380 : vector<1x32xf32>
    %382 = arith.mulf %376, %369 : vector<1x32xf32>
    %383 = arith.addf %382, %378 : vector<1x32xf32>
    %384 = tpu.reciprocal %383 {approx = true} : vector<1x32xf32> -> vector<1x32xf32>
    %385 = arith.mulf %381, %384 : vector<1x32xf32>
    %386 = arith.maximumf %373, %370 : vector<1x32xf32>
    %387 = arith.subf %373, %386 : vector<1x32xf32>
    %388 = math.exp %387 : vector<1x32xf32>
    %389 = arith.subf %370, %386 : vector<1x32xf32>
    %390 = math.exp %389 : vector<1x32xf32>
    %391 = arith.mulf %388, %367 : vector<1x32xf32>
    %392 = arith.mulf %390, %372 : vector<1x32xf32>
    %393 = arith.addf %391, %392 : vector<1x32xf32>
    %394 = arith.mulf %388, %369 : vector<1x32xf32>
    %395 = arith.addf %394, %390 : vector<1x32xf32>
    %396 = vector.extract_strided_slice %313 {offsets = [3, 0], sizes = [1, 32], strides = [1, 1]} : vector<8x32xf32> to vector<1x32xf32>
    %397 = vector.extract_strided_slice %317 {offsets = [3, 0], sizes = [1, 32], strides = [1, 1]} : vector<8x32xf32> to vector<1x32xf32>
    %398 = vector.extract_strided_slice %315 {offsets = [3, 0], sizes = [1, 32], strides = [1, 1]} : vector<8x32xf32> to vector<1x32xf32>
    %399 = arith.addf %84, %386 : vector<1x32xf32>
    %400 = arith.maximumf %386, %397 : vector<1x32xf32>
    %401 = arith.subf %386, %400 : vector<1x32xf32>
    %402 = math.exp %401 : vector<1x32xf32>
    %403 = arith.subf %397, %400 : vector<1x32xf32>
    %404 = math.exp %403 : vector<1x32xf32>
    %405 = arith.mulf %402, %393 : vector<1x32xf32>
    %406 = arith.mulf %404, %398 : vector<1x32xf32>
    %407 = arith.addf %405, %406 : vector<1x32xf32>
    %408 = arith.mulf %402, %395 : vector<1x32xf32>
    %409 = arith.addf %408, %404 : vector<1x32xf32>
    %410 = tpu.reciprocal %409 {approx = true} : vector<1x32xf32> -> vector<1x32xf32>
    %411 = arith.mulf %407, %410 : vector<1x32xf32>
    %412 = arith.maximumf %399, %396 : vector<1x32xf32>
    %413 = arith.subf %399, %412 : vector<1x32xf32>
    %414 = math.exp %413 : vector<1x32xf32>
    %415 = arith.subf %396, %412 : vector<1x32xf32>
    %416 = math.exp %415 : vector<1x32xf32>
    %417 = arith.mulf %414, %393 : vector<1x32xf32>
    %418 = arith.mulf %416, %398 : vector<1x32xf32>
    %419 = arith.addf %417, %418 : vector<1x32xf32>
    %420 = arith.mulf %414, %395 : vector<1x32xf32>
    %421 = arith.addf %420, %416 : vector<1x32xf32>
    %422 = vector.extract_strided_slice %313 {offsets = [4, 0], sizes = [1, 32], strides = [1, 1]} : vector<8x32xf32> to vector<1x32xf32>
    %423 = vector.extract_strided_slice %317 {offsets = [4, 0], sizes = [1, 32], strides = [1, 1]} : vector<8x32xf32> to vector<1x32xf32>
    %424 = vector.extract_strided_slice %315 {offsets = [4, 0], sizes = [1, 32], strides = [1, 1]} : vector<8x32xf32> to vector<1x32xf32>
    %425 = arith.addf %84, %412 : vector<1x32xf32>
    %426 = arith.maximumf %412, %423 : vector<1x32xf32>
    %427 = arith.subf %412, %426 : vector<1x32xf32>
    %428 = math.exp %427 : vector<1x32xf32>
    %429 = arith.subf %423, %426 : vector<1x32xf32>
    %430 = math.exp %429 : vector<1x32xf32>
    %431 = arith.mulf %428, %419 : vector<1x32xf32>
    %432 = arith.mulf %430, %424 : vector<1x32xf32>
    %433 = arith.addf %431, %432 : vector<1x32xf32>
    %434 = arith.mulf %428, %421 : vector<1x32xf32>
    %435 = arith.addf %434, %430 : vector<1x32xf32>
    %436 = tpu.reciprocal %435 {approx = true} : vector<1x32xf32> -> vector<1x32xf32>
    %437 = arith.mulf %433, %436 : vector<1x32xf32>
    %438 = arith.maximumf %425, %422 : vector<1x32xf32>
    %439 = arith.subf %425, %438 : vector<1x32xf32>
    %440 = math.exp %439 : vector<1x32xf32>
    %441 = arith.subf %422, %438 : vector<1x32xf32>
    %442 = math.exp %441 : vector<1x32xf32>
    %443 = arith.mulf %440, %419 : vector<1x32xf32>
    %444 = arith.mulf %442, %424 : vector<1x32xf32>
    %445 = arith.addf %443, %444 : vector<1x32xf32>
    %446 = arith.mulf %440, %421 : vector<1x32xf32>
    %447 = arith.addf %446, %442 : vector<1x32xf32>
    %448 = vector.extract_strided_slice %313 {offsets = [5, 0], sizes = [1, 32], strides = [1, 1]} : vector<8x32xf32> to vector<1x32xf32>
    %449 = vector.extract_strided_slice %317 {offsets = [5, 0], sizes = [1, 32], strides = [1, 1]} : vector<8x32xf32> to vector<1x32xf32>
    %450 = vector.extract_strided_slice %315 {offsets = [5, 0], sizes = [1, 32], strides = [1, 1]} : vector<8x32xf32> to vector<1x32xf32>
    %451 = arith.addf %84, %438 : vector<1x32xf32>
    %452 = arith.maximumf %438, %449 : vector<1x32xf32>
    %453 = arith.subf %438, %452 : vector<1x32xf32>
    %454 = math.exp %453 : vector<1x32xf32>
    %455 = arith.subf %449, %452 : vector<1x32xf32>
    %456 = math.exp %455 : vector<1x32xf32>
    %457 = arith.mulf %454, %445 : vector<1x32xf32>
    %458 = arith.mulf %456, %450 : vector<1x32xf32>
    %459 = arith.addf %457, %458 : vector<1x32xf32>
    %460 = arith.mulf %454, %447 : vector<1x32xf32>
    %461 = arith.addf %460, %456 : vector<1x32xf32>
    %462 = tpu.reciprocal %461 {approx = true} : vector<1x32xf32> -> vector<1x32xf32>
    %463 = arith.mulf %459, %462 : vector<1x32xf32>
    %464 = arith.maximumf %451, %448 : vector<1x32xf32>
    %465 = arith.subf %451, %464 : vector<1x32xf32>
    %466 = math.exp %465 : vector<1x32xf32>
    %467 = arith.subf %448, %464 : vector<1x32xf32>
    %468 = math.exp %467 : vector<1x32xf32>
    %469 = arith.mulf %466, %445 : vector<1x32xf32>
    %470 = arith.mulf %468, %450 : vector<1x32xf32>
    %471 = arith.addf %469, %470 : vector<1x32xf32>
    %472 = arith.mulf %466, %447 : vector<1x32xf32>
    %473 = arith.addf %472, %468 : vector<1x32xf32>
    %474 = vector.extract_strided_slice %313 {offsets = [6, 0], sizes = [1, 32], strides = [1, 1]} : vector<8x32xf32> to vector<1x32xf32>
    %475 = vector.extract_strided_slice %317 {offsets = [6, 0], sizes = [1, 32], strides = [1, 1]} : vector<8x32xf32> to vector<1x32xf32>
    %476 = vector.extract_strided_slice %315 {offsets = [6, 0], sizes = [1, 32], strides = [1, 1]} : vector<8x32xf32> to vector<1x32xf32>
    %477 = arith.addf %84, %464 : vector<1x32xf32>
    %478 = arith.maximumf %464, %475 : vector<1x32xf32>
    %479 = arith.subf %464, %478 : vector<1x32xf32>
    %480 = math.exp %479 : vector<1x32xf32>
    %481 = arith.subf %475, %478 : vector<1x32xf32>
    %482 = math.exp %481 : vector<1x32xf32>
    %483 = arith.mulf %480, %471 : vector<1x32xf32>
    %484 = arith.mulf %482, %476 : vector<1x32xf32>
    %485 = arith.addf %483, %484 : vector<1x32xf32>
    %486 = arith.mulf %480, %473 : vector<1x32xf32>
    %487 = arith.addf %486, %482 : vector<1x32xf32>
    %488 = tpu.reciprocal %487 {approx = true} : vector<1x32xf32> -> vector<1x32xf32>
    %489 = arith.mulf %485, %488 : vector<1x32xf32>
    %490 = arith.maximumf %477, %474 : vector<1x32xf32>
    %491 = arith.subf %477, %490 : vector<1x32xf32>
    %492 = math.exp %491 : vector<1x32xf32>
    %493 = arith.subf %474, %490 : vector<1x32xf32>
    %494 = math.exp %493 : vector<1x32xf32>
    %495 = arith.mulf %492, %471 : vector<1x32xf32>
    %496 = arith.mulf %494, %476 : vector<1x32xf32>
    %497 = arith.addf %495, %496 : vector<1x32xf32>
    %498 = arith.mulf %492, %473 : vector<1x32xf32>
    %499 = arith.addf %498, %494 : vector<1x32xf32>
    %500 = vector.extract_strided_slice %313 {offsets = [7, 0], sizes = [1, 32], strides = [1, 1]} : vector<8x32xf32> to vector<1x32xf32>
    %501 = vector.extract_strided_slice %317 {offsets = [7, 0], sizes = [1, 32], strides = [1, 1]} : vector<8x32xf32> to vector<1x32xf32>
    %502 = vector.extract_strided_slice %315 {offsets = [7, 0], sizes = [1, 32], strides = [1, 1]} : vector<8x32xf32> to vector<1x32xf32>
    %503 = arith.addf %84, %490 : vector<1x32xf32>
    %504 = arith.maximumf %490, %501 : vector<1x32xf32>
    %505 = arith.subf %490, %504 : vector<1x32xf32>
    %506 = math.exp %505 : vector<1x32xf32>
    %507 = arith.subf %501, %504 : vector<1x32xf32>
    %508 = math.exp %507 : vector<1x32xf32>
    %509 = arith.mulf %506, %497 : vector<1x32xf32>
    %510 = arith.mulf %508, %502 : vector<1x32xf32>
    %511 = arith.addf %509, %510 : vector<1x32xf32>
    %512 = arith.mulf %506, %499 : vector<1x32xf32>
    %513 = arith.addf %512, %508 : vector<1x32xf32>
    %514 = tpu.reciprocal %513 {approx = true} : vector<1x32xf32> -> vector<1x32xf32>
    %515 = arith.mulf %511, %514 : vector<1x32xf32>
    %516 = arith.maximumf %503, %500 : vector<1x32xf32>
    %517 = arith.subf %503, %516 : vector<1x32xf32>
    %518 = math.exp %517 : vector<1x32xf32>
    %519 = arith.subf %500, %516 : vector<1x32xf32>
    %520 = math.exp %519 : vector<1x32xf32>
    %521 = arith.mulf %518, %497 : vector<1x32xf32>
    %522 = arith.mulf %520, %502 : vector<1x32xf32>
    %523 = arith.addf %521, %522 : vector<1x32xf32>
    %524 = arith.mulf %518, %499 : vector<1x32xf32>
    %525 = arith.addf %524, %520 : vector<1x32xf32>
    %526 = tpu.concatenate %333, %359, %385, %411, %437, %463, %489, %515 in 0 : vector<1x32xf32>, vector<1x32xf32>, vector<1x32xf32>, vector<1x32xf32>, vector<1x32xf32>, vector<1x32xf32>, vector<1x32xf32>, vector<1x32xf32> -> vector<8x32xf32>
    %527 = arith.index_cast %311 : i32 to index
    %c0_58 = arith.constant 0 : index
    %528 = vector.load %arg27[%527, %c0_58] : memref<16x32xf32, #tpu.memory_space<vmem>>, vector<8x32xf32>
    tpu.vector_store %arg27[%527, %c0_58], %526 {strides = array<i32>} : memref<16x32xf32, #tpu.memory_space<vmem>>, vector<8x32xf32>,
    %c2_i32 = arith.constant 2 : i32
    %c0_59 = arith.constant 0 : index
    %c0_60 = arith.constant 0 : index
    %529 = vector.load %arg27[%c0_59, %c0_60] : memref<16x32xf32, #tpu.memory_space<vmem>>, vector<16x32xf32>
    %530 = arith.mulf %79, %529 : vector<16x32xf32>
    %531 = arith.truncf %530 : vector<16x32xf32> to vector<16x32xbf16>
    %c0_61 = arith.constant 0 : index
    %c0_62 = arith.constant 0 : index
    %532 = vector.load %arg18[%c0_61, %c0_62] : memref<32x32xbf16, #tpu.memory_space<vmem>>, vector<32x32xbf16>
    %cst_63 = arith.constant dense<0.000000e+00> : vector<16x32xf32>
    %533 = tpu.matmul %531, %532, %cst_63 {dimension_numbers = #tpu.dot_dimension_numbers<[1], [0], [0], [1], [0, 0, 1, 1], [], []>} : vector<16x32xbf16>, vector<32x32xbf16>, vector<16x32xf32> -> vector<16x32xf32>
    %c0_64 = arith.constant 0 : index
    %c0_65 = arith.constant 0 : index
    %534 = vector.load %arg8[%c0_64, %c0_65] : memref<1x32xf32, #tpu.memory_space<vmem>>, vector<1x32xf32>
    %535 = vector.broadcast %534 : vector<1x32xf32> to vector<16x32xf32>
    %536 = arith.mulf %535, %533 : vector<16x32xf32>
    %537 = arith.addf %26, %536 : vector<16x32xf32>
    %c0_66 = arith.constant 0 : index
    %c0_67 = arith.constant 0 : index
    %538 = vector.load %arg6[%c0_66, %c0_67] : memref<1x32xf32, #tpu.memory_space<vmem>>, vector<1x32xf32>
    %c0_68 = arith.constant 0 : index
    %c0_69 = arith.constant 0 : index
    %539 = vector.load %arg7[%c0_68, %c0_69] : memref<1x32xf32, #tpu.memory_space<vmem>>, vector<1x32xf32>
    %cst_70 = arith.constant dense<0.000000e+00> : vector<16xf32>
    %540 = vector.multi_reduction <add>, %537, %cst_70 [1] : vector<16x32xf32> to vector<16xf32>
    %541 = vector.shape_cast %540 : vector<16xf32> to vector<16x1xf32>
    %cst_71 = arith.constant 3.200000e+01 : f32
    %542 = vector.broadcast %cst_71 : f32 to vector<16x1xf32>
    %543 = arith.divf %541, %542 : vector<16x1xf32>
    %544 = vector.broadcast %543 : vector<16x1xf32> to vector<16x32xf32>
    %545 = arith.subf %537, %544 : vector<16x32xf32>
    %546 = arith.mulf %545, %545 : vector<16x32xf32>
    %cst_72 = arith.constant dense<0.000000e+00> : vector<16xf32>
    %547 = vector.multi_reduction <add>, %546, %cst_72 [1] : vector<16x32xf32> to vector<16xf32>
    %548 = vector.shape_cast %547 : vector<16xf32> to vector<16x1xf32>
    %cst_73 = arith.constant 3.200000e+01 : f32
    %549 = vector.broadcast %cst_73 : f32 to vector<16x1xf32>
    %550 = arith.divf %548, %549 : vector<16x1xf32>
    %cst_74 = arith.constant 9.99999974E-6 : f32
    %551 = vector.broadcast %cst_74 : f32 to vector<16x1xf32>
    %552 = arith.addf %550, %551 : vector<16x1xf32>
    %553 = math.rsqrt %552 : vector<16x1xf32>
    %554 = vector.broadcast %553 : vector<16x1xf32> to vector<16x32xf32>
    %555 = arith.mulf %545, %554 : vector<16x32xf32>
    %556 = vector.broadcast %538 : vector<1x32xf32> to vector<16x32xf32>
    %557 = arith.mulf %555, %556 : vector<16x32xf32>
    %558 = vector.broadcast %539 : vector<1x32xf32> to vector<16x32xf32>
    %559 = arith.addf %557, %558 : vector<16x32xf32>
    %c1_i32_75 = arith.constant 1 : i32
    %560 = tpu.dynamic_rotate %559 by %c1_i32_75 dim 0 : vector<16x32xf32>, i32 -> vector<16x32xf32>
    %cst_76 = arith.constant 0.000000e+00 : f32
    %561 = vector.broadcast %cst_76 : f32 to vector<16x32xf32>
    %562 = arith.select %4, %561, %560 : vector<16x32xi1>, vector<16x32xf32>
    %563 = arith.subf %559, %562 : vector<16x32xf32>
    %c0_77 = arith.constant 0 : index
    %c0_78 = arith.constant 0 : index
    %564 = vector.load %arg19[%c0_77, %c0_78] : memref<1x32xf32, #tpu.memory_space<vmem>>, vector<1x32xf32>
    %565 = vector.broadcast %564 : vector<1x32xf32> to vector<16x32xf32>
    %566 = arith.mulf %565, %563 : vector<16x32xf32>
    %567 = arith.addf %562, %566 : vector<16x32xf32>
    %c0_79 = arith.constant 0 : index
    %c0_80 = arith.constant 0 : index
    %568 = vector.load %arg20[%c0_79, %c0_80] : memref<1x32xf32, #tpu.memory_space<vmem>>, vector<1x32xf32>
    %569 = vector.broadcast %568 : vector<1x32xf32> to vector<16x32xf32>
    %570 = arith.mulf %569, %563 : vector<16x32xf32>
    %571 = arith.addf %562, %570 : vector<16x32xf32>
    %572 = arith.truncf %567 : vector<16x32xf32> to vector<16x32xbf16>
    %c0_81 = arith.constant 0 : index
    %c0_82 = arith.constant 0 : index
    %573 = vector.load %arg21[%c0_81, %c0_82] : memref<32x128xbf16, #tpu.memory_space<vmem>>, vector<32x128xbf16>
    %cst_83 = arith.constant dense<0.000000e+00> : vector<16x128xf32>
    %574 = tpu.matmul %572, %573, %cst_83 {dimension_numbers = #tpu.dot_dimension_numbers<[1], [0], [0], [1], [0, 0, 1, 1], [], []>} : vector<16x32xbf16>, vector<32x128xbf16>, vector<16x128xf32> -> vector<16x128xf32>
    %cst_84 = arith.constant 0.000000e+00 : f32
    %575 = vector.broadcast %cst_84 : f32 to vector<16x128xf32>
    %576 = arith.maximumf %574, %575 : vector<16x128xf32>
    %577 = arith.mulf %576, %576 : vector<16x128xf32>
    %578 = arith.truncf %577 : vector<16x128xf32> to vector<16x128xbf16>
    %c0_85 = arith.constant 0 : index
    %c0_86 = arith.constant 0 : index
    %579 = vector.load %arg22[%c0_85, %c0_86] : memref<128x32xbf16, #tpu.memory_space<vmem>>, vector<128x32xbf16>
    %cst_87 = arith.constant dense<0.000000e+00> : vector<16x32xf32>
    %580 = tpu.matmul %578, %579, %cst_87 {dimension_numbers = #tpu.dot_dimension_numbers<[1], [0], [0], [1], [0, 0, 1, 1], [], []>} : vector<16x128xbf16>, vector<128x32xbf16>, vector<16x32xf32> -> vector<16x32xf32>
    %581 = arith.truncf %571 : vector<16x32xf32> to vector<16x32xbf16>
    %c0_88 = arith.constant 0 : index
    %c0_89 = arith.constant 0 : index
    %582 = vector.load %arg23[%c0_88, %c0_89] : memref<32x32xbf16, #tpu.memory_space<vmem>>, vector<32x32xbf16>
    %cst_90 = arith.constant dense<0.000000e+00> : vector<16x32xf32>
    %583 = tpu.matmul %581, %582, %cst_90 {dimension_numbers = #tpu.dot_dimension_numbers<[1], [0], [0], [1], [0, 0, 1, 1], [], []>} : vector<16x32xbf16>, vector<32x32xbf16>, vector<16x32xf32> -> vector<16x32xf32>
    %cst_91 = arith.constant 0.000000e+00 : f32
    %584 = vector.broadcast %cst_91 : f32 to vector<16x32xf32>
    %585 = arith.subf %584, %583 : vector<16x32xf32>
    %586 = math.exp %585 : vector<16x32xf32>
    %cst_92 = arith.constant 1.000000e+00 : f32
    %587 = vector.broadcast %cst_92 : f32 to vector<16x32xf32>
    %588 = arith.addf %587, %586 : vector<16x32xf32>
    %589 = tpu.reciprocal %588 {approx = true} : vector<16x32xf32> -> vector<16x32xf32>
    %c0_93 = arith.constant 0 : index
    %c0_94 = arith.constant 0 : index
    %590 = vector.load %arg9[%c0_93, %c0_94] : memref<1x32xf32, #tpu.memory_space<vmem>>, vector<1x32xf32>
    %591 = arith.mulf %589, %580 : vector<16x32xf32>
    %592 = vector.broadcast %590 : vector<1x32xf32> to vector<16x32xf32>
    %593 = arith.mulf %592, %591 : vector<16x32xf32>
    %594 = arith.addf %537, %593 : vector<16x32xf32>
    %c0_95 = arith.constant 0 : index
    %c0_96 = arith.constant 0 : index
    %c0_97 = arith.constant 0 : index
    %595 = vector.load %arg24[%c0_95, %c0_96, %c0_97] : memref<1x16x32xf32, #tpu.memory_space<vmem>>, vector<1x16x32xf32>
    %596 = vector.shape_cast %595 : vector<1x16x32xf32> to vector<16x32xf32>
    %597 = vector.shape_cast %594 : vector<16x32xf32> to vector<1x16x32xf32>
    tpu.vector_store %arg24[%c0_95, %c0_96, %c0_97], %597 {strides = array<i32>} : memref<1x16x32xf32, #tpu.memory_space<vmem>>, vector<1x16x32xf32>,
    return
  }
  func.func @transform_0(%arg0: i32) -> (i32, i32, i32) {
    %c0_i32 = arith.constant 0 : i32
    %c0_i32_0 = arith.constant 0 : i32
    %c0_i32_1 = arith.constant 0 : i32
    return %arg0, %c0_i32, %c0_i32_0 : i32, i32, i32
  }
  func.func @transform_1(%arg0: i32) -> (i32, i32) {
    %c0_i32 = arith.constant 0 : i32
    %c0_i32_0 = arith.constant 0 : i32
    %c0_i32_1 = arith.constant 0 : i32
    return %c0_i32, %c0_i32_0 : i32, i32
  }
  func.func @transform_2(%arg0: i32) -> (i32, i32) {
    %c0_i32 = arith.constant 0 : i32
    %c0_i32_0 = arith.constant 0 : i32
    %c0_i32_1 = arith.constant 0 : i32
    return %c0_i32, %c0_i32_0 : i32, i32
  }
  func.func @transform_3(%arg0: i32) -> (i32, i32) {
    %c0_i32 = arith.constant 0 : i32
    %c0_i32_0 = arith.constant 0 : i32
    %c0_i32_1 = arith.constant 0 : i32
    return %c0_i32, %c0_i32_0 : i32, i32
  }
  func.func @transform_4(%arg0: i32) -> (i32, i32) {
    %c0_i32 = arith.constant 0 : i32
    %c0_i32_0 = arith.constant 0 : i32
    %c0_i32_1 = arith.constant 0 : i32
    return %c0_i32, %c0_i32_0 : i32, i32
  }
  func.func @transform_5(%arg0: i32) -> (i32, i32) {
    %c0_i32 = arith.constant 0 : i32
    %c0_i32_0 = arith.constant 0 : i32
    %c0_i32_1 = arith.constant 0 : i32
    return %c0_i32, %c0_i32_0 : i32, i32
  }
  func.func @transform_6(%arg0: i32) -> (i32, i32) {
    %c0_i32 = arith.constant 0 : i32
    %c0_i32_0 = arith.constant 0 : i32
    %c0_i32_1 = arith.constant 0 : i32
    return %c0_i32, %c0_i32_0 : i32, i32
  }
  func.func @transform_7(%arg0: i32) -> (i32, i32) {
    %c0_i32 = arith.constant 0 : i32
    %c0_i32_0 = arith.constant 0 : i32
    %c0_i32_1 = arith.constant 0 : i32
    return %c0_i32, %c0_i32_0 : i32, i32
  }
  func.func @transform_8(%arg0: i32) -> (i32, i32) {
    %c0_i32 = arith.constant 0 : i32
    %c0_i32_0 = arith.constant 0 : i32
    %c0_i32_1 = arith.constant 0 : i32
    return %c0_i32, %c0_i32_0 : i32, i32
  }
  func.func @transform_9(%arg0: i32) -> (i32, i32) {
    %c0_i32 = arith.constant 0 : i32
    %c0_i32_0 = arith.constant 0 : i32
    %c0_i32_1 = arith.constant 0 : i32
    return %c0_i32, %c0_i32_0 : i32, i32
  }
  func.func @transform_10(%arg0: i32) -> (i32, i32) {
    %c0_i32 = arith.constant 0 : i32
    %c0_i32_0 = arith.constant 0 : i32
    %c0_i32_1 = arith.constant 0 : i32
    return %c0_i32, %c0_i32_0 : i32, i32
  }
  func.func @transform_11(%arg0: i32) -> (i32, i32) {
    %c0_i32 = arith.constant 0 : i32
    %c0_i32_0 = arith.constant 0 : i32
    %c0_i32_1 = arith.constant 0 : i32
    return %c0_i32, %c0_i32_0 : i32, i32
  }
  func.func @transform_12(%arg0: i32) -> (i32, i32) {
    %c0_i32 = arith.constant 0 : i32
    %c0_i32_0 = arith.constant 0 : i32
    %c0_i32_1 = arith.constant 0 : i32
    return %c0_i32, %c0_i32_0 : i32, i32
  }
  func.func @transform_13(%arg0: i32) -> (i32, i32) {
    %c0_i32 = arith.constant 0 : i32
    %c0_i32_0 = arith.constant 0 : i32
    %c0_i32_1 = arith.constant 0 : i32
    return %c0_i32, %c0_i32_0 : i32, i32
  }
  func.func @transform_14(%arg0: i32) -> (i32, i32) {
    %c0_i32 = arith.constant 0 : i32
    %c0_i32_0 = arith.constant 0 : i32
    %c0_i32_1 = arith.constant 0 : i32
    return %c0_i32, %c0_i32_0 : i32, i32
  }
  func.func @transform_15(%arg0: i32) -> (i32, i32) {
    %c0_i32 = arith.constant 0 : i32
    %c0_i32_0 = arith.constant 0 : i32
    %c0_i32_1 = arith.constant 0 : i32
    return %c0_i32, %c0_i32_0 : i32, i32
  }
  func.func @transform_16(%arg0: i32) -> (i32, i32) {
    %c0_i32 = arith.constant 0 : i32
    %c0_i32_0 = arith.constant 0 : i32
    %c0_i32_1 = arith.constant 0 : i32
    return %c0_i32, %c0_i32_0 : i32, i32
  }
  func.func @transform_17(%arg0: i32) -> (i32, i32) {
    %c0_i32 = arith.constant 0 : i32
    %c0_i32_0 = arith.constant 0 : i32
    %c0_i32_1 = arith.constant 0 : i32
    return %c0_i32, %c0_i32_0 : i32, i32
  }
  func.func @transform_18(%arg0: i32) -> (i32, i32) {
    %c0_i32 = arith.constant 0 : i32
    %c0_i32_0 = arith.constant 0 : i32
    %c0_i32_1 = arith.constant 0 : i32
    return %c0_i32, %c0_i32_0 : i32, i32
  }
  func.func @transform_19(%arg0: i32) -> (i32, i32) {
    %c0_i32 = arith.constant 0 : i32
    %c0_i32_0 = arith.constant 0 : i32
    %c0_i32_1 = arith.constant 0 : i32
    return %c0_i32, %c0_i32_0 : i32, i32
  }
  func.func @transform_20(%arg0: i32) -> (i32, i32) {
    %c0_i32 = arith.constant 0 : i32
    %c0_i32_0 = arith.constant 0 : i32
    %c0_i32_1 = arith.constant 0 : i32
    return %c0_i32, %c0_i32_0 : i32, i32
  }
  func.func @transform_21(%arg0: i32) -> (i32, i32) {
    %c0_i32 = arith.constant 0 : i32
    %c0_i32_0 = arith.constant 0 : i32
    %c0_i32_1 = arith.constant 0 : i32
    return %c0_i32, %c0_i32_0 : i32, i32
  }
  func.func @transform_22(%arg0: i32) -> (i32, i32) {
    %c0_i32 = arith.constant 0 : i32
    %c0_i32_0 = arith.constant 0 : i32
    %c0_i32_1 = arith.constant 0 : i32
    return %c0_i32, %c0_i32_0 : i32, i32
  }
  func.func @transform_23(%arg0: i32) -> (i32, i32, i32) {
    %c0_i32 = arith.constant 0 : i32
    %c0_i32_0 = arith.constant 0 : i32
    %c0_i32_1 = arith.constant 0 : i32
    return %arg0, %c0_i32, %c0_i32_0 : i32, i32, i32
  }
}

</mosaic_0001>

<bundles_post_ra>
// kernel: tpu_custom_call.1
= control target key start
LH: loop header
LB: loop body
LE: loop exit
PB: predicated region body
PF: predicated region fallthrough
CT: control target
= control target key end

     0   :  { %s6201_s0 = inlined_call_operand.vmem [shape: f32[2,16,32], index: 0, kind: input, shape index: {}]   ;;  %s6202_s1 = inlined_call_operand.hbm [shape: f32[1,32], index: 1, kind: input, shape index: {}]   ;;  %s6203_s2 = inlined_call_operand.hbm [shape: f32[1,32], index: 2, kind: input, shape index: {}]   ;;  %s6204_s3 = inlined_call_operand.hbm [shape: f32[1,32], index: 3, kind: input, shape index: {}]   ;;  %s6205_s4 = inlined_call_operand.hbm [shape: f32[1,32], index: 4, kind: input, shape index: {}]   ;;  %s6206_s5 = inlined_call_operand.hbm [shape: f32[1,32], index: 5, kind: input, shape index: {}]   ;;  %s6207_s6 = inlined_call_operand.hbm [shape: f32[1,32], index: 6, kind: input, shape index: {}]   ;;  %s6208_s7 = inlined_call_operand.hbm [shape: f32[1,32], index: 7, kind: input, shape index: {}]   ;;  %s6209_s8 = inlined_call_operand.hbm [shape: f32[1,32], index: 8, kind: input, shape index: {}]   ;;  %s6210_s9 = inlined_call_operand.hbm [shape: f32[1,32], index: 9, kind: input, shape index: {}]   ;;  %s6211_s10 = inlined_call_operand.hbm [shape: f32[1,32], index: 10, kind: input, shape index: {}]   ;;  %s6212_s11 = inlined_call_operand.hbm [shape: f32[1,32], index: 11, kind: input, shape index: {}]   ;;  %s6213_s12 = inlined_call_operand.hbm [shape: f32[1,32], index: 12, kind: input, shape index: {}]   ;;  %s6214_s13 = inlined_call_operand.hbm [shape: f32[1,32], index: 13, kind: input, shape index: {}]   ;;  %s6215_s14 = inlined_call_operand.vmem [shape: bf16[32,32], index: 14, kind: input, shape index: {}]   ;;  %s6216_s15 = inlined_call_operand.vmem [shape: bf16[32,32], index: 15, kind: input, shape index: {}]   ;;  %s6217_s16 = inlined_call_operand.vmem [shape: bf16[32,32], index: 16, kind: input, shape index: {}]   ;;  %s6218_s17 = inlined_call_operand.vmem [shape: bf16[32,32], index: 17, kind: input, shape index: {}]   ;;  %s6219_s18 = inlined_call_operand.hbm [shape: f32[1,32], index: 18, kind: input, shape index: {}]   ;;  %s6220_s19 = inlined_call_operand.vmem [shape: f32[1,32], index: 19, kind: input, shape index: {}]   ;;  %s6221_s20 = inlined_call_operand.hbm [shape: bf16[32,128], index: 20, kind: input, shape index: {}]   ;;  %s6222_s21 = inlined_call_operand.vmem [shape: bf16[128,32], index: 21, kind: input, shape index: {}]   ;;  %s6223_s22 = inlined_call_operand.hbm [shape: bf16[32,32], index: 22, kind: input, shape index: {}]   ;;  %s6224_s23 = inlined_call_operand.hbm [shape: f32[2,16,32], index: 23, kind: output, shape index: {}]  }
   0x1   :  { %6254 = sst [smem:[#allocation61_spill]] %s6201_s0 }
   0x2   :  { %6255 = sst [smem:[#allocation62_spill]] %s6202_s1 }
   0x3   :  { %6256 = sst [smem:[#allocation63_spill]] %s6203_s2 }
   0x4   :  { %6257 = sst [smem:[#allocation64_spill]] %s6204_s3 }
   0x5   :  { %6258 = sst [smem:[#allocation65_spill]] %s6205_s4 }
   0x6   :  { %6259 = sst [smem:[#allocation66_spill]] %s6206_s5 }
   0x7   :  { %6260 = sst [smem:[#allocation67_spill]] %s6207_s6 }
   0x8   :  { %6261 = sst [smem:[#allocation68_spill]] %s6208_s7 }
   0x9   :  { %6262 = sst [smem:[#allocation69_spill]] %s6224_s23 }
   0xa   :  { %28 = vsyncpa [#allocation6], 0 }
   0xb   :  { %29 = vsyncpa [#allocation9], 0 }
   0xc   :  { %30 = vsyncpa [#allocation12], 0 }
   0xd   :  { %31 = vsyncpa [#allocation15], 0 }
   0xe   :  { %32 = vsyncpa [#allocation18], 0 }
   0xf   :  { %33 = vsyncpa [#allocation21], 0 }
  0x10   :  { %34 = vsyncpa [#allocation24], 0 }
  0x11   :  { %35 = vsyncpa [#allocation27], 0 }
  0x12   :  { %36 = vsyncpa [#allocation30], 0 }
  0x13   :  { %37 = vsyncpa [#allocation7], 0 }
  0x14   :  { %39 = vsyncpa [#allocation7 + $0x1], 0  ;;  %s5026_s4 = smov 0   ;;  %s5028_s30 = smov 0  }
  0x15   :  { %s5030_s24 = smov 0   ;;  %s5032_s25 = smov 0  }
  0x16 LB: > { %6263 = sst [smem:[#allocation42_spill]] %s4868_s4  ;;  %s5047_s5 = sadd.s32 4294967295, %s4880_s25   ;;  %s4880_s25 = sphi %s5032_s25, %s6340_s25   ;;  %s4876_s24 = sphi %s5030_s24, %s6342_s24   ;;  %s4872_s30 = sphi %s5028_s30, %s6344_s30   ;;  %s4868_s4 = sphi %s5026_s4, %s6343_s4  }
  0x17   : > { %6264 = sst [smem:[#allocation43_spill]] %s4876_s24  ;;  %s3775_s1 = sadd.s32 4294967294, %s4880_s25  }
  0x18   : > { %6265 = sst [smem:[#allocation44_spill]] %s4880_s25  ;;  %s5051_s26 = sadd.s32 1, %s4880_s25  }
  0x19   : > { %6266 = sst [smem:[#allocation45_spill]] %s5051_s26  ;;  %s540_s2 = sadd.s32 1, %s4876_s24 }
  0x1a   : > { %s537_s6 = ssub.s32 %s4880_s25, %s5051_s26  ;;  %p550_p0 = scmp.ne.s32.totalorder %s4876_s24, %s4872_s30 }
  0x1b   : > { %p538_p1 = scmp.eq.s32.totalorder %s537_s6, 0  ;;  %p551_p2 = scmp.eq.s32.totalorder %s5047_s5, 1 }
  0x1c   : > { %p556_p3 = scmp.ne.s32.totalorder %s4872_s30, %s4868_s4  ;;  %p557_p4 = scmp.eq.s32.totalorder %s3775_s1, 1 }
  0x1d   : > { %s5062_s27 = scalar_select %p538_p1, %s4876_s24, %s540_s2  }
  0x1e   : > { %p5064_p5 = por %p551_p2, %p550_p0  ;;  %p5068_p6 = por %p557_p4, %p556_p3 }
  0x1f   : > { %6267 = sst [smem:[#allocation46_spill]] %s5062_s27  ;;  %p3776_p7 = scmp.ge.s32.totalorder %s4880_s25, 1 }
  0x20   : > { %s6268_s7 = scalar_select %p5064_p5, 1, 0 }
  0x21   : > { %s6270_s28 = scalar_select %p5068_p6, 1, 0 }
  0x22   : > { %6269 = sst [smem:[#allocation47_spill]] %s6268_s7  ;;  %p564_p8 = scmp.lt.s32.totalorder %s4880_s25, 3 }
  0x23   : > { %6271 = sst [smem:[#allocation48_spill]] %s6270_s28  ;;  %p6231_p9 = scmp.eq.s32.totalorder %s5047_s5, 0 }
  0x24   : > { %p5075_p10 = pnand %p3776_p7, %p564_p8  ;;  %s4882_s3 = smov [#allocation8]  }
  0x25   : > { %s588_s0 = sshll.u32 %s4882_s3, 4  ;;  %s4883_s1 = smov [#allocation11]   ;;  %s589_s0 = int_to_ptr.vmem [resolvable:$true] %s588_s0 }
  0x26   : > { %s6272_s29 = scalar_select %p5075_p10, 1, 0 }
  0x27   : > { %p4021_p11 = pneg %p5075_p10  ;;  %s610_s2 = sshll.u32 %s4883_s1, 4  ;;  %s611_s2 = int_to_ptr.vmem [resolvable:$true] %s610_s2 }
  0x28   : > { %s4884_s27 = smov [#allocation14]   ;;  %s4379_s3 = scalar_lea.vmem %s589_s0, 16 }
  0x29   : > { %p5083_p12 = pnand %p6231_p9, %p4021_p11  ;;  %s632_s24 = sshll.u32 %s4884_s27, 4  ;;  %s5087_s24 = int_to_ptr.vmem [resolvable:$true] %s632_s24 }
  0x2a   : > { %p4380_p0 = scmp.ne.s32.totalorder %s589_s0, %s4379_s3  ;;  %s4386_s1 = scalar_lea.vmem %s589_s0, 32 }
  0x2b   : > { %p5091_p13 = pneg %p5083_p12  ;;  %p4387_p3 = scmp.lt.s32.totalorder %s589_s0, %s589_s0 }
  0x2c   : > { %p4388_p4 = scmp.lt.s32.totalorder %s4386_s1, %s4379_s3 }
  0x2d   : > { %p4382_p1 = pnand %p4380_p0, %p5091_p13 }
  0x2e   : > { %p4389_p7 = por %p4388_p4, %p4387_p3 }
  0x2f   : > { %p4383_p2 = pneg %p4382_p1 }
  0x31   : > { %p4390_p8 = pnand %p4389_p7, %p4383_p2 }
  0x33   : > { %4393 = shalt.err (!%p4390_p8)
}
  0x34   : > { %s6275_s4 = sld [smem:[#allocation63_spill]]  ;;  %s4405_s25 = scalar_lea.vmem %s611_s2, 16 }
  0x35   : > { %p4406_p11 = scmp.ne.s32.totalorder %s611_s2, %s4405_s25  ;;  %s4412_s23 = scalar_lea.vmem %s611_s2, 32 }
  0x36   : > { %p4413_p0 = scmp.lt.s32.totalorder %s611_s2, %s611_s2  ;;  %p4414_p1 = scmp.lt.s32.totalorder %s4412_s23, %s4405_s25 }
  0x37   : > { %p4408_p9 = pnand %p4406_p11, %p5091_p13 }
  0x38   : > { %p4415_p5 = por %p4414_p1, %p4413_p0 }
  0x39   : > { %p4409_p6 = pneg %p4408_p9 }
  0x3a   : > { %4027 = dma.hbm_to_vmem [thread:$0]  (!%p5083_p12), %s6275_s4, 16, %s589_s0, [#allocation9]  }
  0x3b   : > { %p4416_p10 = pnand %p4415_p5, %p4409_p6 }
  0x3d   : > { %4419 = shalt.err (!%p4416_p10)
}
  0x3e   : > { %s6276_s7 = sld [smem:[#allocation65_spill]]  ;;  %s4431_s4 = scalar_lea.vmem %s5087_s24, 16 }
  0x3f   : > { %p4432_p2 = scmp.ne.s32.totalorder %s5087_s24, %s4431_s4  ;;  %s4438_s23 = scalar_lea.vmem %s5087_s24, 32 }
  0x40   : > { %p4439_p5 = scmp.lt.s32.totalorder %s5087_s24, %s5087_s24  ;;  %p4440_p6 = scmp.lt.s32.totalorder %s4438_s23, %s4431_s4 }
  0x41   : > { %p4434_p9 = pnand %p4432_p2, %p5091_p13 }
  0x42   : > { %p4441_p10 = por %p4440_p6, %p4439_p5 }
  0x43   : > { %p4435_p3 = pneg %p4434_p9 }
  0x44   : > { %4033 = dma.hbm_to_vmem [thread:$0]  (!%p5083_p12), %s6276_s7, 16, %s611_s2, [#allocation12]  }
  0x45   : > { %p4442_p4 = pnand %p4441_p10, %p4435_p3 }
  0x47   : > { %4445 = shalt.err (!%p4442_p4)
}
  0x48   : > { %s6277_s0 = sld [smem:[#allocation67_spill]]  ;;  %s4885_s7 = smov [#allocation17]  }
  0x49   : > { %s654_s2 = sshll.u32 %s4885_s7, 4  ;;  %s4886_s27 = smov [#allocation20]   ;;  %s655_s2 = int_to_ptr.vmem [resolvable:$true] %s654_s2 }
  0x4a   : > { %s676_s3 = sshll.u32 %s4886_s27, 4  ;;  %s4457_s1 = scalar_lea.vmem %s655_s2, 16  ;;  %s677_s3 = int_to_ptr.vmem [resolvable:$true] %s676_s3 }
  0x4b   : > { %p4458_p7 = scmp.ne.s32.totalorder %s655_s2, %s4457_s1  ;;  %s4464_s4 = scalar_lea.vmem %s655_s2, 32 }
  0x4c   : > { %p4465_p0 = scmp.lt.s32.totalorder %s655_s2, %s655_s2  ;;  %p4466_p1 = scmp.lt.s32.totalorder %s4464_s4, %s4457_s1 }
  0x4d   : > { %p4460_p8 = pnand %p4458_p7, %p5091_p13 }
  0x4e   : > { %4039 = dma.hbm_to_vmem [thread:$0]  (!%p5083_p12), %s6277_s0, 16, %s5087_s24, [#allocation15]  }
  0x4f   : > { %p4461_p11 = pneg %p4460_p8  ;;  %p4467_p2 = por %p4466_p1, %p4465_p0 }
  0x51   : > { %p4468_p9 = pnand %p4467_p2, %p4461_p11 }
  0x53   : > { %4471 = shalt.err (!%p4468_p9)
}
  0x54   : > { %4045 = dma.hbm_to_vmem [thread:$0]  (!%p5083_p12), %s6209_s8, 16, %s655_s2, [#allocation18]  }
  0x55   : > { %s4483_s25 = scalar_lea.vmem %s677_s3, 16  ;;  %s4490_s28 = scalar_lea.vmem %s677_s3, 32 }
  0x56   : > { %p4484_p3 = scmp.ne.s32.totalorder %s677_s3, %s4483_s25  ;;  %p4491_p10 = scmp.lt.s32.totalorder %s677_s3, %s677_s3 }
  0x57   : > { %p4492_p4 = scmp.lt.s32.totalorder %s4490_s28, %s4483_s25 }
  0x58   : > { %p4486_p5 = pnand %p4484_p3, %p5091_p13 }
  0x59   : > { %p4493_p7 = por %p4492_p4, %p4491_p10 }
  0x5a   : > { %p4487_p6 = pneg %p4486_p5 }
  0x5c   : > { %p4494_p8 = pnand %p4493_p7, %p4487_p6 }
  0x5e   : > { %4497 = shalt.err (!%p4494_p8)
}
  0x5f   : > { %4051 = dma.hbm_to_vmem [thread:$0]  (!%p5083_p12), %s6211_s10, 16, %s677_s3, [#allocation21]  }
  0x60   : > { %s4887_s2 = smov [#allocation23]   ;;  %s4888_s1 = smov [#allocation26]  }
  0x61   : > { %s698_s27 = sshll.u32 %s4887_s2, 4  ;;  %s732_s4 = sshll.u32 %s4888_s1, 4  ;;  %s699_s27 = int_to_ptr.vmem [resolvable:$true] %s698_s27  ;;  %s733_s4 = int_to_ptr.vmem [resolvable:$true] %s732_s4 }
  0x62   : > { %s4509_s23 = scalar_lea.vmem %s699_s27, 16  ;;  %s4516_s24 = scalar_lea.vmem %s699_s27, 32 }
  0x63   : > { %p4510_p11 = scmp.ne.s32.totalorder %s699_s27, %s4509_s23  ;;  %p4517_p2 = scmp.lt.s32.totalorder %s699_s27, %s699_s27 }
  0x64   : > { %p4518_p9 = scmp.lt.s32.totalorder %s4516_s24, %s4509_s23 }
  0x65   : > { %p4512_p0 = pnand %p4510_p11, %p5091_p13 }
  0x66   : > { %p4519_p3 = por %p4518_p9, %p4517_p2 }
  0x67   : > { %p4513_p1 = pneg %p4512_p0 }
  0x69   : > { %p4520_p5 = pnand %p4519_p3, %p4513_p1 }
  0x6b   : > { %4523 = shalt.err (!%p4520_p5)
}
  0x6c   : > { %4057 = dma.hbm_to_vmem [thread:$0]  (!%p5083_p12), %s6213_s12, 16, %s699_s27, [#allocation24]  }
  0x6d   : > { %s4535_s28 = scalar_lea.vmem %s733_s4, 16  ;;  %s4542_s0 = scalar_lea.vmem %s733_s4, 32 }
  0x6e   : > { %p4536_p6 = scmp.ne.s32.totalorder %s733_s4, %s4535_s28  ;;  %p4543_p7 = scmp.lt.s32.totalorder %s733_s4, %s733_s4 }
  0x6f   : > { %p4544_p8 = scmp.lt.s32.totalorder %s4542_s0, %s4535_s28 }
  0x70   : > { %p4538_p10 = pnand %p4536_p6, %p5091_p13 }
  0x71   : > { %p4545_p11 = por %p4544_p8, %p4543_p7 }
  0x72   : > { %p4539_p4 = pneg %p4538_p10 }
  0x74   : > { %p4546_p0 = pnand %p4545_p11, %p4539_p4 }
  0x76   : > { %4549 = shalt.err (!%p4546_p0)
}
  0x77   : > { %4063 = dma.hbm_to_vmem [thread:$0]  (!%p5083_p12), %s6219_s18, 16, %s733_s4, [#allocation27]  }
  0x78   : > { %s4889_s27 = smov [#allocation5]   ;;  %s4890_s23 = smov [#allocation10]  }
  0x79   : > { %s577_s1 = sshll.u32 %s4889_s27, 4  ;;  %s599_s24 = sshll.u32 %s4890_s23, 4  ;;  %s578_s1 = int_to_ptr.vmem [resolvable:$true] %s577_s1  ;;  %s600_s24 = int_to_ptr.vmem [resolvable:$true] %s599_s24 }
  0x7a   : > { %s4561_s25 = scalar_lea.vmem %s578_s1, 16  ;;  %s4568_s3 = scalar_lea.vmem %s578_s1, 32 }
  0x7b   : > { %p4562_p1 = scmp.ne.s32.totalorder %s578_s1, %s4561_s25  ;;  %p4569_p3 = scmp.lt.s32.totalorder %s578_s1, %s578_s1 }
  0x7c   : > { %p4570_p5 = scmp.lt.s32.totalorder %s4568_s3, %s4561_s25 }
  0x7d   : > { %p4564_p2 = pnand %p4562_p1, %p5091_p13 }
  0x7e   : > { %p4571_p6 = por %p4570_p5, %p4569_p3 }
  0x7f   : > { %p4565_p9 = pneg %p4564_p2 }
  0x81   : > { %p4572_p10 = pnand %p4571_p6, %p4565_p9 }
  0x83   : > { %4575 = shalt.err (!%p4572_p10)
}
  0x84   : > { %s6278_s0 = sld [smem:[#allocation62_spill]]  ;;  %s4587_s7 = scalar_lea.vmem %s600_s24, 16 }
  0x85   : > { %p4588_p4 = scmp.ne.s32.totalorder %s600_s24, %s4587_s7  ;;  %s4594_s2 = scalar_lea.vmem %s600_s24, 32 }
  0x86   : > { %p4595_p11 = scmp.lt.s32.totalorder %s600_s24, %s600_s24  ;;  %p4596_p0 = scmp.lt.s32.totalorder %s4594_s2, %s4587_s7 }
  0x87   : > { %p4590_p7 = pnand %p4588_p4, %p5091_p13 }
  0x88   : > { %p4597_p1 = por %p4596_p0, %p4595_p11 }
  0x89   : > { %p4591_p8 = pneg %p4590_p7 }
  0x8a   : > { %4024 = dma.hbm_to_vmem [thread:$0]  (!%p5083_p12), %s6278_s0, 16, %s578_s1, [#allocation6]  }
  0x8b   : > { %p4598_p2 = pnand %p4597_p1, %p4591_p8 }
  0x8d   : > { %4601 = shalt.err (!%p4598_p2)
}
  0x8e   : > { %s6279_s25 = sld [smem:[#allocation64_spill]]  ;;  %s4891_s1 = smov [#allocation13]  }
  0x8f   : > { %s621_s3 = sshll.u32 %s4891_s1, 4  ;;  %s4892_s28 = smov [#allocation16]   ;;  %s622_s3 = int_to_ptr.vmem [resolvable:$true] %s621_s3 }
  0x90   : > { %s643_s4 = sshll.u32 %s4892_s28, 4  ;;  %s4613_s0 = scalar_lea.vmem %s622_s3, 16  ;;  %s644_s4 = int_to_ptr.vmem [resolvable:$true] %s643_s4 }
  0x91   : > { %p4614_p9 = scmp.ne.s32.totalorder %s622_s3, %s4613_s0  ;;  %s4620_s7 = scalar_lea.vmem %s622_s3, 32 }
  0x92   : > { %p4621_p6 = scmp.lt.s32.totalorder %s622_s3, %s622_s3  ;;  %p4622_p10 = scmp.lt.s32.totalorder %s4620_s7, %s4613_s0 }
  0x93   : > { %p4616_p3 = pnand %p4614_p9, %p5091_p13 }
  0x94   : > { %4030 = dma.hbm_to_vmem [thread:$0]  (!%p5083_p12), %s6279_s25, 16, %s600_s24, [#allocation9]  }
  0x95   : > { %p4617_p5 = pneg %p4616_p3  ;;  %p4623_p4 = por %p4622_p10, %p4621_p6 }
  0x97   : > { %p4624_p7 = pnand %p4623_p4, %p4617_p5 }
  0x99   : > { %4627 = shalt.err (!%p4624_p7)
}
  0x9a   : > { %s6280_s27 = sld [smem:[#allocation66_spill]]  ;;  %s4639_s23 = scalar_lea.vmem %s644_s4, 16 }
  0x9b   : > { %p4640_p8 = scmp.ne.s32.totalorder %s644_s4, %s4639_s23  ;;  %s4646_s25 = scalar_lea.vmem %s644_s4, 32 }
  0x9c   : > { %p4647_p1 = scmp.lt.s32.totalorder %s644_s4, %s644_s4  ;;  %p4648_p2 = scmp.lt.s32.totalorder %s4646_s25, %s4639_s23 }
  0x9d   : > { %p4642_p11 = pnand %p4640_p8, %p5091_p13 }
  0x9e   : > { %p4649_p9 = por %p4648_p2, %p4647_p1 }
  0x9f   : > { %p4643_p0 = pneg %p4642_p11 }
  0xa0   : > { %4036 = dma.hbm_to_vmem [thread:$0]  (!%p5083_p12), %s6280_s27, 16, %s622_s3, [#allocation12]  }
  0xa1   : > { %p4650_p3 = pnand %p4649_p9, %p4643_p0 }
  0xa3   : > { %4653 = shalt.err (!%p4650_p3)
}
  0xa4   : > { %s6281_s0 = sld [smem:[#allocation68_spill]]  ;;  %s4893_s3 = smov [#allocation19]  }
  0xa5   : > { %s665_s7 = sshll.u32 %s4893_s3, 4  ;;  %s4894_s2 = smov [#allocation22]   ;;  %s666_s7 = int_to_ptr.vmem [resolvable:$true] %s665_s7 }
  0xa6   : > { %s687_s24 = sshll.u32 %s4894_s2, 4  ;;  %s4665_s27 = scalar_lea.vmem %s666_s7, 16  ;;  %s688_s24 = int_to_ptr.vmem [resolvable:$true] %s687_s24 }
  0xa7   : > { %p4666_p5 = scmp.ne.s32.totalorder %s666_s7, %s4665_s27  ;;  %s4672_s23 = scalar_lea.vmem %s666_s7, 32 }
  0xa8   : > { %p4673_p4 = scmp.lt.s32.totalorder %s666_s7, %s666_s7  ;;  %p4674_p7 = scmp.lt.s32.totalorder %s4672_s23, %s4665_s27 }
  0xa9   : > { %p4668_p6 = pnand %p4666_p5, %p5091_p13 }
  0xaa   : > { %4042 = dma.hbm_to_vmem [thread:$0]  (!%p5083_p12), %s6281_s0, 16, %s644_s4, [#allocation15]  }
  0xab   : > { %p4669_p10 = pneg %p4668_p6  ;;  %p4675_p8 = por %p4674_p7, %p4673_p4 }
  0xad   : > { %p4676_p11 = pnand %p4675_p8, %p4669_p10 }
  0xaf   : > { %4679 = shalt.err (!%p4676_p11)
}
  0xb0   : > { %4048 = dma.hbm_to_vmem [thread:$0]  (!%p5083_p12), %s6210_s9, 16, %s666_s7, [#allocation18]  }
  0xb1   : > { %s4691_s1 = scalar_lea.vmem %s688_s24, 16  ;;  %s4698_s28 = scalar_lea.vmem %s688_s24, 32 }
  0xb2   : > { %p4692_p0 = scmp.ne.s32.totalorder %s688_s24, %s4691_s1  ;;  %p4699_p9 = scmp.lt.s32.totalorder %s688_s24, %s688_s24 }
  0xb3   : > { %p4700_p3 = scmp.lt.s32.totalorder %s4698_s28, %s4691_s1 }
  0xb4   : > { %p4694_p1 = pnand %p4692_p0, %p5091_p13 }
  0xb5   : > { %p4701_p5 = por %p4700_p3, %p4699_p9 }
  0xb6   : > { %p4695_p2 = pneg %p4694_p1 }
  0xb8   : > { %p4702_p6 = pnand %p4701_p5, %p4695_p2 }
  0xba   : > { %4705 = shalt.err (!%p4702_p6)
}
  0xbb   : > { %4054 = dma.hbm_to_vmem [thread:$0]  (!%p5083_p12), %s6212_s11, 16, %s688_s24, [#allocation21]  }
  0xbc   : > { %s4895_s7 = smov [#allocation25]   ;;  %s4896_s27 = smov [#allocation28]  }
  0xbd   : > { %s709_s2 = sshll.u32 %s4895_s7, 4  ;;  %s745_s23 = sshll.u32 %s4896_s27, 4  ;;  %s710_s2 = int_to_ptr.vmem [resolvable:$true] %s709_s2  ;;  %s746_s23 = int_to_ptr.vmem [resolvable:$true] %s745_s23 }
  0xbe   : > { %s4717_s25 = scalar_lea.vmem %s710_s2, 16  ;;  %s4724_s4 = scalar_lea.vmem %s710_s2, 32 }
  0xbf   : > { %p4718_p10 = scmp.ne.s32.totalorder %s710_s2, %s4717_s25  ;;  %p4725_p8 = scmp.lt.s32.totalorder %s710_s2, %s710_s2 }
  0xc0   : > { %p4726_p11 = scmp.lt.s32.totalorder %s4724_s4, %s4717_s25 }
  0xc1   : > { %p4720_p4 = pnand %p4718_p10, %p5091_p13 }
  0xc2   : > { %p4727_p0 = por %p4726_p11, %p4725_p8 }
  0xc3   : > { %p4721_p7 = pneg %p4720_p4 }
  0xc5   : > { %p4728_p1 = pnand %p4727_p0, %p4721_p7 }
  0xc7   : > { %4731 = shalt.err (!%p4728_p1)
}
  0xc8   : > { %4060 = dma.hbm_to_vmem [thread:$0]  (!%p5083_p12), %s6214_s13, 16, %s710_s2, [#allocation24]  }
  0xc9   : > { %s4743_s28 = scalar_lea.vmem %s746_s23, 256  ;;  %p4751_p5 = scmp.lt.s32.totalorder %s746_s23, %s746_s23 }
  0xca   : > { %p4744_p2 = scmp.ne.s32.totalorder %s746_s23, %s4743_s28  ;;  %p4752_p6 = scmp.lt.s32.totalorder %s4743_s28, %s4743_s28 }
  0xcc   : > { %p4746_p9 = pnand %p4744_p2, %p5091_p13  ;;  %p4753_p10 = por %p4752_p6, %p4751_p5 }
  0xce   : > { %p4747_p3 = pneg %p4746_p9 }
  0xd0   : > { %p4754_p4 = pnand %p4753_p10, %p4747_p3 }
  0xd2   : > { %4757 = shalt.err (!%p4754_p4)
}
  0xd3   : > { %s4897_s0 = smov 64   ;;  %s4898_s3 = smov 4  }
  0xd4   : > { %4066 = dma.hbm_to_vmem [thread:$0]  (!%p5083_p12), %s6221_s20, 256, %s746_s23, [#allocation27], %s4897_s0, %s4897_s0, %s4898_s3  }
  0xd5   : > { %s4899_s2 = smov [#allocation29]  }
  0xd6   : > { %s761_s25 = sshll.u32 %s4899_s2, 4  ;;  %s762_s25 = int_to_ptr.vmem [resolvable:$true] %s761_s25 }
  0xd7   : > { %s4769_s4 = scalar_lea.vmem %s762_s25, 256  ;;  %p4777_p0 = scmp.lt.s32.totalorder %s762_s25, %s762_s25 }
  0xd8   : > { %p4770_p7 = scmp.ne.s32.totalorder %s762_s25, %s4769_s4  ;;  %p4778_p1 = scmp.lt.s32.totalorder %s4769_s4, %s4769_s4 }
  0xda   : > { %p4772_p8 = pnand %p4770_p7, %p5091_p13  ;;  %p4779_p2 = por %p4778_p1, %p4777_p0 }
  0xdc   : > { %p4773_p11 = pneg %p4772_p8 }
  0xde   : > { %p4780_p9 = pnand %p4779_p2, %p4773_p11 }
  0xe0   : > { %4783 = shalt.err (!%p4780_p9)
}
  0xe1   : > { %4069 = dma.hbm_to_vmem [thread:$0]  (!%p5083_p12), %s6223_s22, 256, %s762_s25, [#allocation30], %s4897_s0, %s4897_s0, %s4898_s3  }
  0xe2   : > { %p6282_p3 = scmp.ne.s32.totalorder %s6272_s29, 0 }
  0xe4   : > { %785 = sbr.rel (%p6282_p3) target bundleno = 2270 (0x8de), region = 112 }
  0xe9   : > { %p6283_p5 = scmp.eq.s32.totalorder %s5047_s5, 0 }
  0xeb   : > { %4827 = dma.done.wait (%p6283_p5), [#allocation6], 16   ;;  %p6284_p13 = pmov %p6283_p5 }
  0xec   : > { %p6285_p6 = pmov %p6283_p5 }
  0xed   : > { %4829 = vsyncadd (%p6284_p13), [#allocation6], 4294967280 }
  0xee   : > { %4831 = dma.done.wait (%p6285_p6), [#allocation9], 32   ;;  %p6286_p10 = pmov %p6283_p5 }
  0xef   : > { %p6287_p4 = pmov %p6283_p5 }
  0xf0   : > { %4833 = vsyncadd (%p6286_p10), [#allocation9], 4294967264 }
  0xf1   : > { %4835 = dma.done.wait (%p6287_p4), [#allocation12], 32   ;;  %p6288_p12 = pmov %p6287_p4 }
  0xf2   : > { %p6289_p7 = pmov %p6287_p4 }
  0xf3   : > { %4837 = vsyncadd (%p6288_p12), [#allocation12], 4294967264 }
  0xf4   : > { %4839 = dma.done.wait (%p6289_p7), [#allocation15], 32   ;;  %p6290_p8 = pmov %p6287_p4 }
  0xf5   : > { %p6291_p11 = pmov %p6287_p4 }
  0xf6   : > { %4841 = vsyncadd (%p6290_p8), [#allocation15], 4294967264 }
  0xf7   : > { %4843 = dma.done.wait (%p6291_p11), [#allocation18], 32   ;;  %p6292_p0 = pmov %p6287_p4 }
  0xf9   : > { %4845 = vsyncadd (%p6292_p0), [#allocation18], 4294967264  ;;  %p6293_p1 = pmov %p6292_p0 }
  0xfa   : > { %p6294_p2 = pmov %p6292_p0 }
  0xfb   : > { %4847 = dma.done.wait (%p6293_p1), [#allocation21], 32  }
  0xfc   : > { %4849 = vsyncadd (%p6294_p2), [#allocation21], 4294967264  ;;  %p6295_p9 = pmov %p6292_p0 }
  0xfd   : > { %p6296_p3 = pmov %p6292_p0 }
  0xfe   : > { %4851 = dma.done.wait (%p6295_p9), [#allocation24], 32  }
  0xff   : > { %4853 = vsyncadd (%p6296_p3), [#allocation24], 4294967264  ;;  %p6297_p5 = pmov %p6292_p0 }
 0x100   : > { %p6298_p13 = pmov %p6292_p0 }
 0x101   : > { %4855 = dma.done.wait (%p6297_p5), [#allocation27], 272  }
 0x102   : > { %4857 = vsyncadd (%p6298_p13), [#allocation27], 4294967024  ;;  %p6299_p6 = pmov %p6292_p0 }
 0x103   : > { %p6300_p10 = pmov %p6292_p0 }
 0x104   : > { %4859 = dma.done.wait (%p6299_p6), [#allocation30], 256  }
 0x105   : > { %4861 = vsyncadd (%p6300_p10), [#allocation30], 4294967040  ;;  %p909_p4 = scmp.lt.s32.totalorder %s5047_s5, 1  ;;  %s6301_s28 = sld [smem:[#allocation61_spill]]  ;;  %vm924_vm0 = vcmask 261120   ;;  %v4162_v42 = vld [vmem:[%s6215_s14 + $0x8] sm:$0xff]   ;;  %v917_v54 = vlaneseq }
 0x106   : > { %v3814_v21 = vld [vmem:[#allocation5] ss:$0 sm:$0xff]  ;;  %v3815_v23 = vld [vmem:[#allocation8] ss:$0 sm:$0xff]  ;;  %v6237_v43 = vmov 0.0   ;;  %vm4901_vm1 = vmmov 0  }
 0x107   : > { %s910_s26 = scalar_select %p909_p4, %s5047_s5, 1  ;;  %3887 = vmatprep.subr.bf16.mxu0 %v6237_v43  ;;  %3891 = vmatprep.mubr.msk.bf16.mxu0 %vm4901_vm1, %v6237_v43  ;;  %v4163_v44 = vld [vmem:[%s6215_s14] sm:$0xff]   ;;  %v3816_v52 = vld [vmem:[#allocation10] ss:$0 sm:$0xff]  ;;  %v3817_v57 = vld [vmem:[#allocation11] ss:$0 sm:$0xff] }
 0x108   : > { %3888 = vmatpush3.bf16.msra.mxu0 %v4162_v42  ;;  %3911 = vmatprep.subr.bf16.mxu1 %v6237_v43  ;;  %v5286_v59 = vshrl.u32 %v917_v54, 7  ;;  %v1254_v42 = vld [vmem:[#allocation25] sm:$0x1]  ;;  %vm2215_vm4 = vcmask 1040384   ;;  %vm2217_vm5 = vcmask 1041408   ;;  %vm2219_vm6 = vcmask 1042432  }
 0x109   : > { %s3858_s29 = sshll.u32 %s910_s26, 4  ;;  %3889 = vmatprep.subr.bf16.mxu0 %v6237_v43  ;;  %3915 = vmatprep.mubr.msk.bf16.mxu1 %vm4901_vm1, %v6237_v43  ;;  %vm2221_vm7 = vcmask 1043456   ;;  %vm2223_vm8 = vcmask 1044480   ;;  %vm2225_vm9 = vcmask 1045504   ;;  %vm2227_vm10 = vcmask 1046528   ;;  %s906_s1 = sand.u32 1, %s4872_s30  }
 0x10a   : > { %6304 = vst [vmem:[#allocation51_spill] sm:$0xff] %v5286_v59  ;;  %vm1014_vm2 = vcmp.lt.s32.totalorder %v5286_v59, 1  ;;  %vm920_vm3 = vcmp.eq.s32.totalorder %v5286_v59, 0  ;;  %s3811_s24 = sshll.u32 %s906_s1, 4  ;;  %s6333_s26 = sld [smem:[#allocation47_spill]] }
 0x10b   : > { %s913_s0 = scalar_lea.vmem %s6301_s28, %s3858_s29  ;;  %s3859_s29 = sshll.u32 %s5047_s5, 8 }
 0x10c   : > { %v915_v0 = vld [vmem:[%s913_s0] sm:$0xff]  ;;  %v916_v1 = vld [vmem:[%s913_s0 + $0x8] sm:$0xff]  ;;  %3890 = vmatpush3.bf16.msra.mxu0 %v4163_v44  ;;  %s908_s6 = scalar_lea.vmem [#allocation31], %s3811_s24  ;;  %s6334_s3 = sld [smem:[#allocation69_spill]] }
 0x10d   : > { %v925_v2 = vsel %vm924_vm0, %v915_v0, 0.0  ;;  %v928_v3 = vsel %vm924_vm0, %v916_v1, 0.0  ;;  %3895 = vmatprep.subr.bf16.mxu0 %v6237_v43  ;;  %s3558_s23 = sshll.u32 %s908_s6, 4  ;;  %s6161_s5 = scalar_lea.sflag [#allocation7], %s906_s1  ;;  %s6157_s23 = int_to_ptr.vmem [resolvable:$true] %s3558_s23 }
 0x10e   : > { %926 = vadd.xlane.f32.xlu0 %v925_v2  ;;  %s4784_s27 = scalar_lea.vmem %s6157_s23, 256  ;;  %s4903_s2 = smov [#allocation31]  }
 0x10f   : > { %p4785_p12 = scmp.ne.s32.totalorder %s6157_s23, %s4784_s27  ;;  %s4788_s25 = sshll.u32 %s4903_s2, 4  ;;  %s4789_s25 = int_to_ptr.vmem [resolvable:$false] %s4788_s25 }
 0x110   : > { %p6335_p7 = scmp.ne.s32.totalorder %s6333_s26, 0  ;;  %s4790_s4 = scalar_lea.vmem %s4789_s25, 512 }
 0x111   : > { %p4791_p0 = scmp.lt.s32.totalorder %s6157_s23, %s4789_s25  ;;  %p4792_p1 = scmp.lt.s32.totalorder %s4790_s4, %s4784_s27 }
 0x112   : > { %929 = vadd.xlane.f32.xlu0 %v928_v3  ;;  %v3818_v3 = vld [vmem:[#allocation19] ss:$0 sm:$0xff]  ;;  %s6155_s7 = scalar_lea.hbm %s6334_s3, %s3859_s29  ;;  %p4786_p8 = pnand %p4785_p12, %p6335_p7 }
 0x113   : > { %p4793_p2 = por %p4792_p1, %p4791_p0 }
 0x114   : > { %p4787_p11 = pneg %p4786_p8 }
 0x116   : > { %p4794_p9 = pnand %p4793_p2, %p4787_p11 }
 0x197   : > { %v927_v4 = vpop.xlane.xlu0 %926 }
 0x198   : > { %v932_v5 = vmul.f32 0.03125, %v927_v4 }
 0x19a   : > { %v934_v6 = vsub.f32 %v915_v0, %v932_v5 }
 0x19b   : > { %v930_v7 = vpop.xlane.xlu0 %929 }
 0x19c   : > { %v933_v8 = vmul.f32 0.03125, %v930_v7  ;;  %v936_v9 = vmul.f32 %v934_v6, %v934_v6 }
 0x19e   : > { %v935_v10 = vsub.f32 %v916_v1, %v933_v8  ;;  %v938_v11 = vsel %vm924_vm0, %v936_v9, 0.0 }
 0x19f   : > { %939 = vadd.xlane.f32.xlu1 %v938_v11 }
 0x1a0   : > { %v937_v12 = vmul.f32 %v935_v10, %v935_v10 }
 0x1a2   : > { %v941_v13 = vsel %vm924_vm0, %v937_v12, 0.0  ;;  %v4164_v12 = vld [vmem:[%s6216_s15 + $0x8] sm:$0xff]  }
 0x1a3   : > { %942 = vadd.xlane.f32.xlu1 %v941_v13 }
 0x228   : > { %v940_v14 = vpop.xlane.xlu1 %939 }
 0x229   : > { %v944_v15 = vmul.f32 0.03125, %v940_v14 }
 0x22b   : > { %v946_v16 = vadd.f32 1e-05, %v944_v15 }
 0x22c   : > { %v943_v17 = vpop.xlane.xlu1 %942 }
 0x22d   : > { %4184 = vrsqrt.f32 %v946_v16  ;;  %v945_v18 = vmul.f32 0.03125, %v943_v17  ;;  %v4165_v16 = vld [vmem:[%s6216_s15] sm:$0xff]  }
 0x22f   : > { %v947_v19 = vadd.f32 1e-05, %v945_v18 }
 0x231   : > { %4186 = vrsqrt.f32 %v947_v19  ;;  %v3820_v19 = vld [vmem:[#allocation22] ss:$0 sm:$0xff] }
 0x23a   : > { %v4185_v20 = vpop.eup %4184 }
 0x23b   : > { %v950_v22 = vmul.f32 %v4185_v20, %v934_v6  ;;  %v4166_v20 = vld [vmem:[%s6217_s16 + $0x8] sm:$0xff]  }
 0x23d   : > { %v958_v24 = vmul.f32 %v3814_v21, %v950_v22 }
 0x23e   : > { %v4187_v25 = vpop.eup %4186 }
 0x23f   : > { %v5260_v26 = vadd.f32 %v3815_v23, %v958_v24  ;;  %v951_v27 = vmul.f32 %v4187_v25, %v935_v10  ;;  %v3819_v10 = vld [vmem:[#allocation20] ss:$0 sm:$0xff] }
 0x240   : > { %v4167_v24 = vld [vmem:[%s6217_s16] sm:$0xff]  }
 0x241   : > { %6302 = vst [vmem:[#allocation49_spill] sm:$0xff] %v5260_v26  ;;  %v970_v28 = vsel %vm924_vm0, %v5260_v26, 0.0  ;;  %v959_v29 = vmul.f32 %v3814_v21, %v951_v27 }
 0x242   : > { %971 = vadd.xlane.f32.xlu0 %v970_v28 }
 0x243   : > { %v5264_v30 = vadd.f32 %v3815_v23, %v959_v29  ;;  %v4170_v29 = vld [vmem:[%s6218_s17 + $0x8] sm:$0xff]  }
 0x244   : > { %3912 = vmatpush3.bf16.msra.mxu1 %v4170_v29 }
 0x245   : > { %6303 = vst [vmem:[#allocation50_spill] sm:$0xff] %v5264_v30  ;;  %v973_v31 = vsel %vm924_vm0, %v5264_v30, 0.0  ;;  %3913 = vmatprep.subr.bf16.mxu1 %v6237_v43 }
 0x246   : > { %974 = vadd.xlane.f32.xlu1 %v973_v31  ;;  %v4171_v31 = vld [vmem:[%s6218_s17] sm:$0xff]  }
 0x248   : > { %3914 = vmatpush3.bf16.msra.mxu1 %v4171_v31 }
 0x249   : > { %3927 = vmatprep.subr.bf16.mxu1 %v6237_v43 }
 0x2cb   : > { %v972_v32 = vpop.xlane.xlu0 %971 }
 0x2cc   : > { %v976_v33 = vmul.f32 0.03125, %v972_v32  ;;  %v4902_v32 = vmov 1966171168  }
 0x2ce   : > { %v978_v34 = vsub.f32 %v5260_v26, %v976_v33  ;;  %v1293_v33 = vunpack.c.l.s4 %v4902_v32 }
 0x2cf   : > { %v975_v35 = vpop.xlane.xlu1 %974 }
 0x2d0   : > { %v977_v36 = vmul.f32 0.03125, %v975_v35  ;;  %v980_v37 = vmul.f32 %v978_v34, %v978_v34 }
 0x2d2   : > { %v979_v38 = vsub.f32 %v5264_v30, %v977_v36  ;;  %v982_v39 = vsel %vm924_vm0, %v980_v37, 0.0  ;;  %v1294_v36 = vunpack.c.0.s8 %v1293_v33 }
 0x2d3   : > { %983 = vadd.xlane.f32.xlu0 %v982_v39 }
 0x2d4   : > { %v981_v40 = vmul.f32 %v979_v38, %v979_v38 }
 0x2d6   : > { %v985_v41 = vsel %vm924_vm0, %v981_v40, 0.0  ;;  %v5333_v40 = vsub.s32 %v1294_v36, %v5286_v59 }
 0x2d7   : > { %986 = vadd.xlane.f32.xlu1 %v985_v41 }
 0x35c   : > { %v984_v45 = vpop.xlane.xlu0 %983 }
 0x35d   : > { %v988_v46 = vmul.f32 0.03125, %v984_v45  ;;  %v5338_v45 = vsub.s32 0, %v5286_v59 }
 0x35f   : > { %v990_v47 = vadd.f32 1e-05, %v988_v46 }
 0x360   : > { %v987_v48 = vpop.xlane.xlu1 %986 }
 0x361   : > { %4188 = vrsqrt.f32 %v990_v47  ;;  %v989_v49 = vmul.f32 0.03125, %v987_v48  ;;  %v1255_v47 = vmul.f32 0.0625, %v1254_v42 }
 0x363   : > { %v991_v50 = vadd.f32 1e-05, %v989_v49 }
 0x365   : > { %4190 = vrsqrt.f32 %v991_v50 }
 0x36e   : > { %v4189_v51 = vpop.eup %4188 }
 0x36f   : > { %v994_v53 = vmul.f32 %v4189_v51, %v978_v34  ;;  %v1251_v34 = vld [vmem:[#allocation23] sm:$0x1] }
 0x370   : > { %v5330_v37 = vmul.f32 0.0625, %v1251_v34 }
 0x371   : > { %v1002_v55 = vmul.f32 %v3816_v52, %v994_v53 }
 0x372   : > { %v4191_v56 = vpop.eup %4190  ;;  %v1265_v41 = vadd.f32 -1e+38, %v5330_v37 }
 0x373   : > { %v995_v58 = vmul.f32 %v4191_v56, %v979_v38  ;;  %v1010_v61 = vadd.f32 %v3817_v57, %v1002_v55  ;;  %v1262_v56 = vrot.slane %v1255_v47, %v5338_v45 }
 0x375   : > { %v1003_v60 = vmul.f32 %v3816_v52, %v995_v58  ;;  %v1012_v63 = vrot.slane %v1010_v61, 7 }
 0x377   : > { %v1011_v62 = vadd.f32 %v3817_v57, %v1003_v60 }
 0x379   : > { %v1013_v0 = vrot.slane %v1011_v62, 7 }
 0x37b   : > { %v1015_v1 = vsel %vm1014_vm2, %v1012_v63, %v1013_v0  ;;  %v1016_v2 = vsel %vm1014_vm2, %v1013_v0, %v1012_v63 }
 0x37c   : > { %v1017_v4 = vsel %vm920_vm3, 0.0, %v1016_v2  ;;  %v1020_v5 = vsub.f32 %v1011_v62, %v1015_v1 }
 0x37d   : > { %v1019_v6 = vsub.f32 %v1010_v61, %v1017_v4 }
 0x37e   : > { %v1029_v7 = vmul.f32 %v3818_v3, %v1020_v5  ;;  %v1040_v15 = vmul.f32 %v3819_v10, %v1020_v5  ;;  %v1051_v23 = vmul.f32 %v3820_v19, %v1020_v5 }
 0x37f   : > { %v1028_v8 = vmul.f32 %v3818_v3, %v1019_v6  ;;  %v1039_v14 = vmul.f32 %v3819_v10, %v1019_v6  ;;  %v1050_v22 = vmul.f32 %v3820_v19, %v1019_v6 }
 0x380   : > { %v1031_v9 = vadd.f32 %v1029_v7, %v1015_v1  ;;  %v1042_v18 = vadd.f32 %v1040_v15, %v1015_v1  ;;  %v1053_v27 = vadd.f32 %v1051_v23, %v1015_v1 }
 0x381   : > { %v1030_v11 = vadd.f32 %v1028_v8, %v1017_v4  ;;  %v1041_v17 = vadd.f32 %v1039_v14, %v1017_v4  ;;  %v1052_v25 = vadd.f32 %v1050_v22, %v1017_v4 }
 0x383   : > { %v1054_v13 = vpack.c.bf16 %v1031_v9, %v1030_v11  ;;  %v1115_v21 = vpack.c.bf16 %v1042_v18, %v1041_v17  ;;  %v1176_v28 = vpack.c.bf16 %v1053_v27, %v1052_v25 }
 0x385   : > { %3892 = vmatmul.mubr.msk.bf16.vlgmr.msra.gmra.mxu0 %vm924_vm0, %v1054_v13 }
 0x386   : > { %3896 = vmatpush3.bf16.msra.mxu0 %v4164_v12  ;;  %3899 = vmatprep.mubr.msk.bf16.mxu0 %vm4901_vm1, %v6237_v43 }
 0x387   : > { %3897 = vmatprep.subr.bf16.mxu0 %v6237_v43 }
 0x38a   : > { %3898 = vmatpush3.bf16.msra.mxu0 %v4165_v16 }
 0x38b   : > { %3903 = vmatprep.subr.bf16.mxu0 %v6237_v43 }
 0x38d   : > { %3900 = vmatmul.mubr.msk.bf16.vlgmr.msra.gmra.mxu0 %vm924_vm0, %v1115_v21 }
 0x38e   : > { %3904 = vmatpush3.bf16.msra.mxu0 %v4166_v20  ;;  %3907 = vmatprep.mubr.msk.bf16.mxu0 %vm4901_vm1, %v6237_v43 }
 0x38f   : > { %3905 = vmatprep.subr.bf16.mxu0 %v6237_v43 }
 0x392   : > { %3906 = vmatpush3.bf16.msra.mxu0 %v4167_v24 }
 0x393   : > { %3919 = vmatprep.subr.bf16.mxu0 %v6237_v43 }
 0x395   : > { %3908 = vmatmul.mubr.msk.bf16.vlgmr.msra.gmra.mxu0 %vm924_vm0, %v1176_v28 }
 0x396   : > { %3923 = vmatprep.mubr.msk.bf16.mxu0 %vm4901_vm1, %v6237_v43 }
 0x445   : > { %v1108_v35 = vpop.f32.mrf.mxu0 }
 0x446   : > { %1247 = vst.msk [vmem:[#allocation2] sm:$0xff] %vm924_vm0, %v1108_v35 }
 0x447   : > { %v3893_v38 = vpop.f32.mrf.mxu0 }
 0x449   : > { %v1111_v39 = vpop.f32.mrf.mxu0 }
 0x44a   : > { %1248 = vst.msk [vmem:[#allocation2 + $0x8] sm:$0xff] %vm924_vm0, %v1111_v39 }
 0x44b   : > { %v3894_v44 = vpop.f32.mrf.mxu0 }
 0x44d   : > { %v5340_v46 = vld [vmem:[#allocation2] sm:$0xff]  ;;  %v1169_v48 = vpop.f32.mrf.mxu0 }
 0x44e   : > { %v5343_v49 = vmax.f32 %v1265_v41, %v5340_v46  ;;  %v1376_v50 = vrot.slane %v5340_v46, %v5333_v40  ;;  %v1742_v51 = vcombine.high %v5340_v46, %v5340_v46  ;;  %1249 = vst.msk [vmem:[#allocation3] sm:$0xff] %vm924_vm0, %v1169_v48  ;;  %v5368_v5 = vadd.f32 %v1262_v56, %v5340_v46 }
 0x44f   : > { %v3901_v52 = vpop.f32.mrf.mxu0 }
 0x450   : > { %v1377_v53 = vcombine.high %v1376_v50, %v1376_v50  ;;  %v1280_v54 = vsub.f32 %v1265_v41, %v5343_v49  ;;  %v1749_v55 = vrot.slane %v1742_v51, %v5333_v40  ;;  %v1290_v60 = vadd.f32 %v5343_v49, %v5330_v37 }
 0x451   : > { %v5353_v57 = vld [vmem:[#allocation2 + $0x8] sm:$0xff]  ;;  %v1172_v58 = vpop.f32.mrf.mxu0  ;;  %v1384_v61 = vrot.slane %v1376_v50, %v5333_v40  ;;  %v1283_v63 = vsub.f32 %v5340_v46, %v5343_v49  ;;  %v1266_v19 = vmax.f32 %v5368_v5, -1e+38  ;;  %v1298_v31 = vrot.slane %v5368_v5, %v5333_v40 }
 0x452   : > { %v1391_v62 = vrot.slane %v1377_v53, %v5333_v40  ;;  %1250 = vst.msk [vmem:[#allocation3 + $0x8] sm:$0xff] %vm924_vm0, %v1172_v58  ;;  %v5363_v0 = vadd.f32 %v5353_v57, %v1262_v56  ;;  %v1281_v3 = vmul.f32 1.442695, %v1280_v54  ;;  %v1876_v4 = vcombine.high %v1749_v55, %v1749_v55 }
 0x453   : > { %v3902_v1 = vpop.f32.mrf.mxu0  ;;  %v1502_v9 = vcombine.high %v1384_v61, %v1384_v61  ;;  %v2348_v10 = vrot.slane %v5353_v57, %v5333_v40  ;;  %v1284_v11 = vmul.f32 1.442695, %v1283_v63  ;;  %v5384_v16 = vrot.slane %v1749_v55, %v5333_v40 }
 0x454   : > { %v5365_v2 = vmax.f32 %v1290_v60, %v1391_v62  ;;  %v2270_v12 = vrot.slane %v5363_v0, %v5333_v40  ;;  %4192 = vpow2.f32 %v1281_v3  ;;  %v5387_v17 = vrot.slane %v1876_v4, %v5333_v40 }
 0x455   : > { %v5370_v6 = vpop.f32.mrf.mxu0  ;;  %v1615_v22 = vcombine.high %v1391_v62, %v1391_v62  ;;  %v2349_v23 = vcombine.high %v2348_v10, %v2348_v10  ;;  %4194 = vpow2.f32 %v1284_v11  ;;  %v2714_v27 = vcombine.high %v5353_v57, %v5353_v57 }
 0x456   : > { %6305 = vst [vmem:[#allocation52_spill] sm:$0xff] %v5370_v6  ;;  %v1401_v7 = vrot.slane %v5365_v2, %v5338_v45  ;;  %v1445_v8 = vadd.f32 %v5365_v2, %v5330_v37  ;;  %v1394_v20 = vsub.f32 %v1290_v60, %v5365_v2  ;;  %v2271_v25 = vcombine.high %v2270_v12, %v2270_v12 }
 0x457   : > { %v3909_v13 = vpop.f32.mrf.mxu0  ;;  %v1998_v33 = vcombine.high %v5384_v16, %v5384_v16  ;;  %v2115_v34 = vcombine.high %v5387_v17, %v5387_v17  ;;  %v5411_v35 = vrot.slane %v2270_v12, %v5333_v40  ;;  %v5414_v38 = vrot.slane %v2348_v10, %v5333_v40 }
 0x458   : > { %v1403_v14 = vsub.f32 %v5340_v46, %v1401_v7  ;;  %v5381_v15 = vmax.f32 %v1445_v8, %v1502_v9  ;;  %v1395_v36 = vmul.f32 1.442695, %v1394_v20  ;;  %v5417_v39 = vrot.slane %v2349_v23, %v5333_v40 }
 0x459   : > { %v5389_v18 = vpop.f32.mrf.mxu0  ;;  %v1267_v41 = vsub.f32 -1e+38, %v1266_v19  ;;  %v5425_v47 = vrot.slane %v2271_v25, %v5333_v40  ;;  %v2721_v48 = vrot.slane %v2714_v27, %v5333_v40  ;;  %v1270_v52 = vsub.f32 %v5368_v5, %v1266_v19 }
 0x45a   : > { %6306 = vst [vmem:[#allocation53_spill] sm:$0xff] %v5389_v18  ;;  %v1404_v21 = vmul.f32 1.442695, %v1403_v14  ;;  %v5395_v24 = vadd.f32 %v5381_v15, %v5330_v37  ;;  %v1512_v29 = vrot.slane %v5381_v15, %v5338_v45  ;;  %v1505_v42 = vsub.f32 %v1445_v8, %v5381_v15 }
 0x45b   : > { %v3910_v28 = vpop.f32.mrf.mxu0  ;;  %v1268_v51 = vmul.f32 1.442695, %v1267_v41  ;;  %v1299_v53 = vcombine.high %v1298_v31, %v1298_v31  ;;  %v2418_v56 = vcombine.high %v5411_v35, %v5411_v35  ;;  %v1306_v58 = vrot.slane %v1298_v31, %v5333_v40  ;;  %v5481_v41 = vld [vmem:[#allocation3] sm:$0xff] }
 0x45c   : > { %4196 = vpow2.f32 %v1404_v21  ;;  %v5404_v32 = vmax.f32 %v5395_v24, %v1615_v22  ;;  %v1514_v50 = vsub.f32 %v5340_v46, %v1512_v29  ;;  %v2474_v60 = vcombine.high %v5414_v38, %v5414_v38 }
 0x45d   : > { %4198 = vpow2.f32 %v1395_v36  ;;  %v1271_v61 = vmul.f32 1.442695, %v1270_v52  ;;  %v5442_v62 = vrot.slane %v1299_v53, %v5333_v40  ;;  %v1506_v63 = vmul.f32 1.442695, %v1505_v42 }
 0x45e   : > { %v5422_v44 = vadd.f32 %v5404_v32, %v5330_v37  ;;  %v1625_v54 = vrot.slane %v5404_v32, %v5338_v45  ;;  %4200 = vpow2.f32 %v1268_v51  ;;  %v1515_v4 = vmul.f32 1.442695, %v1514_v50 }
 0x45f   : > { %v2587_v7 = vcombine.high %v5417_v39, %v5417_v39  ;;  %v2848_v8 = vcombine.high %v2721_v48, %v2721_v48  ;;  %v1315_v9 = vmax.f32 %v5343_v49, %v5442_v62  ;;  %v2529_v12 = vcombine.high %v5425_v47, %v5425_v47 }
 0x460   : > { %v5434_v55 = vmax.f32 %v5422_v44, %v5384_v16  ;;  %v1627_v10 = vsub.f32 %v5340_v46, %v1625_v54  ;;  %v1446_v13 = vcombine.high %v1306_v58, %v1306_v58  ;;  %v5462_v16 = vrot.slane %v2721_v48, %v5333_v40 }
 0x461   : > { %v4193_v14 = vpop.eup %4192  ;;  %4202 = vpow2.f32 %v1271_v61  ;;  %v1316_v19 = vsub.f32 %v5343_v49, %v1315_v9  ;;  %v1323_v20 = vrot.slane %v1315_v9, %v5338_v45  ;;  %v5474_v27 = vrot.slane %v2848_v8, %v5333_v40 }
 0x462   : > { %v1766_v1 = vrot.slane %v5434_v55, %v5338_v45  ;;  %v5448_v3 = vadd.f32 %v5434_v55, %v5330_v37  ;;  %4204 = vpow2.f32 %v1506_v63  ;;  %v4195_v25 = vpop.eup %4194  ;;  %v1448_v49 = vmax.f32 %v5365_v2, %v1446_v13 }
 0x463   : > { %4206 = vpow2.f32 %v1515_v4  ;;  %v1325_v28 = vsub.f32 %v5368_v5, %v1323_v20  ;;  %v1628_v31 = vmul.f32 1.442695, %v1627_v10  ;;  %v1286_v42 = vmul.f32 0.0, %v4193_v14 }
 0x464   : > { %v5457_v11 = vmax.f32 %v5448_v3, %v5387_v17  ;;  %v1768_v21 = vsub.f32 %v5340_v46, %v1766_v1  ;;  %v1317_v48 = vmul.f32 1.442695, %v1316_v19  ;;  %v1449_v4 = vsub.f32 %v5365_v2, %v1448_v49 }
 0x465   : > { %v1326_v51 = vmul.f32 1.442695, %v1325_v28  ;;  %v1456_v10 = vrot.slane %v1448_v49, %v5338_v45  ;;  %v5504_v14 = vadd.f32 %v4195_v25, %v1286_v42 }
 0x466   : > { %v1893_v22 = vrot.slane %v5457_v11, %v5338_v45  ;;  %v5471_v23 = vadd.f32 %v5457_v11, %v5330_v37  ;;  %v1769_v54 = vmul.f32 1.442695, %v1768_v21  ;;  %v1450_v49 = vmul.f32 1.442695, %v1449_v4 }
 0x467   : > { %4208 = vpow2.f32 %v1326_v51 }
 0x468   : > { %v5479_v36 = vmax.f32 %v5471_v23, %v1998_v33  ;;  %v1895_v50 = vsub.f32 %v5340_v46, %v1893_v22  ;;  %v1287_v33 = vmul.f32 %v4195_v25, %v5481_v41  ;;  %4210 = vpow2.f32 %v1628_v31 }
 0x469   : > { %v4197_v29 = vpop.eup %4196  ;;  %4212 = vpow2.f32 %v1317_v48  ;;  %v1557_v25 = vcombine.high %v5442_v62, %v5442_v62 }
 0x46a   : > { %v1407_v52 = vmul.f32 %v4197_v29, %v5481_v41  ;;  %v1434_v53 = vrot.slane %v4197_v29, %v5333_v40  ;;  %v2008_v58 = vrot.slane %v5479_v36, %v5338_v45  ;;  %v5490_v61 = vadd.f32 %v5479_v36, %v5330_v37  ;;  %v4199_v20 = vpop.eup %4198 }
 0x46b   : > { %v1896_v13 = vmul.f32 1.442695, %v1895_v50  ;;  %v4201_v22 = vpop.eup %4200  ;;  %4214 = vpow2.f32 %v1769_v54  ;;  %v1458_v50 = vsub.f32 %v5368_v5, %v1456_v10  ;;  %v5524_v62 = vmax.f32 %v5381_v15, %v1557_v25 }
 0x46c   : > { %v1415_v63 = vrot.slane %v1407_v52, %v5333_v40  ;;  %v1435_v1 = vcombine.high %v1434_v53, %v1434_v53  ;;  %v5499_v8 = vmax.f32 %v5490_v61, %v2115_v34  ;;  %v2010_v2 = vsub.f32 %v5340_v46, %v2008_v58 }
 0x46d   : > { %v5511_v34 = vadd.f32 %v1287_v33, %v1286_v42  ;;  %v1273_v48 = vmul.f32 0.0, %v4201_v22  ;;  %4216 = vpow2.f32 %v1896_v13  ;;  %v1426_v52 = vmul.f32 %v4199_v20, %v5504_v14 }
 0x46e   : > { %v1416_v19 = vcombine.high %v1415_v63, %v1415_v63  ;;  %v2125_v21 = vrot.slane %v5499_v8, %v5338_v45  ;;  %v2235_v17 = vadd.f32 %v5499_v8, %v5330_v37  ;;  %v1442_v28 = vrot.slane %v1435_v1, %v5333_v40  ;;  %v4203_v53 = vpop.eup %4202 }
 0x46f   : > { %v1406_v51 = vmul.f32 %v4199_v20, %v5511_v34  ;;  %v2011_v54 = vmul.f32 1.442695, %v2010_v2  ;;  %4218 = vpow2.f32 %v1450_v49  ;;  %v1459_v2 = vmul.f32 1.442695, %v1458_v50 }
 0x470   : > { %v2127_v29 = vsub.f32 %v5340_v46, %v2125_v21  ;;  %v2250_v31 = vmax.f32 %v2235_v17, %v5353_v57  ;;  %v1423_v42 = vrot.slane %v1416_v19, %v5333_v40  ;;  %v5526_v46 = vpop.eup %4204  ;;  %v1276_v19 = vadd.f32 %v4203_v53, %v1273_v48 }
 0x471   : > { %v5530_v10 = vpop.eup %4206  ;;  %v5535_v20 = vadd.f32 %v1442_v28, %v1426_v52  ;;  %v1274_v22 = vmul.f32 %v4203_v53, %v5481_v41  ;;  %4220 = vpow2.f32 %v2011_v54 }
 0x472   : > { %v2251_v58 = vsub.f32 %v2235_v17, %v2250_v31  ;;  %v2262_v33 = vadd.f32 %v2250_v31, %v5330_v37  ;;  %v2128_v63 = vmul.f32 1.442695, %v2127_v29  ;;  %v2254_v1 = vsub.f32 %v5353_v57, %v2250_v31 }
 0x473   : > { %v2287_v4 = vmax.f32 %v2250_v31, %v5425_v47  ;;  %v5539_v25 = vadd.f32 %v1423_v42, %v1406_v51  ;;  %v5548_v50 = vmul.f32 %v5530_v10, %v5481_v41  ;;  %v5559_v54 = vadd.f32 %v1274_v22, %v1273_v48 }
 0x474   : > { %v5533_v13 = vmax.f32 %v2262_v33, %v5417_v39  ;;  %v2252_v21 = vmul.f32 1.442695, %v2251_v58  ;;  %4222 = vpow2.f32 %v2128_v63  ;;  %v2255_v9 = vmul.f32 1.442695, %v2254_v1  ;;  %v4209_v52 = vpop.eup %4208 }
 0x475   : > { %v2295_v17 = vrot.slane %v2287_v4, %v5338_v45  ;;  %v2288_v29 = vsub.f32 %v2250_v31, %v2287_v4  ;;  %4224 = vrcp.f32 %v1276_v19  ;;  %v5557_v53 = vpop.eup %4210  ;;  %v1329_v58 = vmul.f32 %v4209_v52, %v5481_v41 }
 0x476   : > { %v2373_v49 = vrot.slane %v5533_v13, %v5338_v45  ;;  %v2417_v43 = vadd.f32 %v5533_v13, %v5330_v37  ;;  %v2366_v28 = vsub.f32 %v2262_v33, %v5533_v13  ;;  %4226 = vpow2.f32 %v2252_v21  ;;  %v4213_v63 = vpop.eup %4212 }
 0x477   : > { %v2297_v51 = vsub.f32 %v5363_v0, %v2295_v17  ;;  %v5564_v33 = vmul.f32 %v5526_v46, %v5539_v25  ;;  %v2289_v1 = vmul.f32 1.442695, %v2288_v29  ;;  %v5570_v38 = vmax.f32 %v5533_v13, %v2418_v56 }
 0x478   : > { %v2375_v42 = vsub.f32 %v5353_v57, %v2373_v49  ;;  %v5555_v31 = vmax.f32 %v2417_v43, %v2474_v60  ;;  %4228 = vpow2.f32 %v2255_v9  ;;  %v2367_v48 = vmul.f32 1.442695, %v2366_v28  ;;  %v5577_v17 = vpop.eup %4214 }
 0x479   : > { %v1337_v21 = vrot.slane %v1329_v58, %v5333_v40  ;;  %v2298_v22 = vmul.f32 1.442695, %v2297_v51  ;;  %v1328_v49 = vmul.f32 %v4213_v63, %v5511_v34  ;;  %v1356_v28 = vrot.slane %v4209_v52, %v5333_v40 }
 0x47a   : > { %v2376_v4 = vmul.f32 1.442695, %v2375_v42  ;;  %v2484_v60 = vrot.slane %v5555_v31, %v5338_v45  ;;  %v2528_v19 = vadd.f32 %v5555_v31, %v5330_v37  ;;  %v2477_v29 = vsub.f32 %v2417_v43, %v5555_v31  ;;  %v5594_v51 = vpop.eup %4216 }
 0x47b   : > { %v5585_v56 = vmax.f32 %v5555_v31, %v2529_v12  ;;  %v1338_v47 = vcombine.high %v1337_v21, %v1337_v21  ;;  %v1348_v58 = vmul.f32 %v4213_v63, %v5504_v14 }
 0x47c   : > { %4230 = vpow2.f32 %v2376_v4  ;;  %v2486_v35 = vsub.f32 %v5353_v57, %v2484_v60  ;;  %v5590_v9 = vmax.f32 %v2528_v19, %v2587_v7  ;;  %v4219_v34 = vpop.eup %4218  ;;  %v2478_v52 = vmul.f32 1.442695, %v2477_v29 }
 0x47d   : > { %4232 = vpow2.f32 %v2289_v1  ;;  %v1357_v1 = vcombine.high %v1356_v28, %v1356_v28 }
 0x47e   : > { %6307 = vst [vmem:[#allocation54_spill] sm:$0xff] %v5590_v9  ;;  %v2487_v42 = vmul.f32 1.442695, %v2486_v35  ;;  %4234 = vpow2.f32 %v2367_v48  ;;  %v2590_v12 = vsub.f32 %v2528_v19, %v5590_v9  ;;  %v2597_v39 = vrot.slane %v5590_v9, %v5338_v45  ;;  %v5614_v29 = vpop.eup %4220 }
 0x47f   : > { %v2643_v7 = vadd.f32 %v5590_v9, %v5330_v37  ;;  %4236 = vpow2.f32 %v2298_v22  ;;  %v1345_v19 = vrot.slane %v1338_v47, %v5333_v40  ;;  %v1364_v21 = vrot.slane %v1357_v1, %v5333_v40 }
 0x480   : > { %4238 = vpow2.f32 %v2487_v42  ;;  %v2599_v60 = vsub.f32 %v5353_v57, %v2597_v39  ;;  %v1526_v22 = vrot.slane %v5548_v50, %v5333_v40  ;;  %v2591_v14 = vmul.f32 1.442695, %v2590_v12 }
 0x481   : > { %v5608_v48 = vmax.f32 %v2643_v7, %v5462_v16  ;;  %4240 = vpow2.f32 %v1459_v2  ;;  %v5619_v42 = vpop.eup %4222  ;;  %v1366_v2 = vadd.f32 %v1364_v21, %v1348_v58  ;;  %v5626_v39 = vmul.f32 %v4219_v34, %v5539_v25 }
 0x482   : > { %v2600_v63 = vmul.f32 1.442695, %v2599_v60  ;;  %4242 = vpow2.f32 %v2478_v52  ;;  %v4225_v50 = vpop.eup %4224  ;;  %v1545_v1 = vrot.slane %v5530_v10, %v5333_v40  ;;  %v1533_v25 = vrot.slane %v1526_v22, %v5333_v40 }
 0x483   : > { %6308 = vst [vmem:[#allocation55_spill] sm:$0xff] %v5608_v48  ;;  %v2731_v35 = vsub.f32 %v2643_v7, %v5608_v48  ;;  %v2738_v28 = vrot.slane %v5608_v48, %v5338_v45  ;;  %v5623_v47 = vadd.f32 %v5608_v48, %v5330_v37  ;;  %v5630_v7 = vmul.f32 %v4219_v34, %v5535_v20  ;;  %v5634_v60 = vpop.eup %4226 }
 0x484   : > { %4244 = vpow2.f32 %v2600_v63  ;;  %v1560_v58 = vsub.f32 %v5381_v15, %v5524_v62  ;;  %v5643_v21 = vadd.f32 %v1345_v19, %v1328_v49  ;;  %v1537_v34 = vmul.f32 %v5526_v46, %v5535_v20 }
 0x485   : > { %6309 = vst [vmem:[#allocation56_spill] sm:$0xff] %v5623_v47  ;;  %v2740_v12 = vsub.f32 %v5353_v57, %v2738_v28  ;;  %v2732_v52 = vmul.f32 1.442695, %v2731_v35  ;;  %v5638_v4 = vmax.f32 %v5623_v47, %v5474_v27  ;;  %4246 = vpow2.f32 %v2591_v14  ;;  %v5649_v63 = vpop.eup %4228 }
 0x486   : > { %v1567_v10 = vrot.slane %v5524_v62, %v5338_v45  ;;  %v5656_v22 = vmul.f32 %v4225_v50, %v5559_v54  ;;  %4248 = vrcp.f32 %v1366_v2  ;;  %v1552_v46 = vrot.slane %v1545_v1, %v5333_v40 }
 0x487   : > { %6310 = vst [vmem:[#allocation57_spill] sm:$0xff] %v5638_v4  ;;  %v2741_v35 = vmul.f32 1.442695, %v2740_v12  ;;  %v5653_v27 = vadd.f32 %v5638_v4, %v5330_v37  ;;  %v2865_v49 = vrot.slane %v5638_v4, %v5338_v45  ;;  %v1618_v20 = vsub.f32 %v5395_v24, %v5404_v32 }
 0x488   : > { %v1569_v62 = vsub.f32 %v5368_v5, %v1567_v10  ;;  %4250 = vpow2.f32 %v2732_v52  ;;  %v6312_v37 = vcombine.high %v5462_v16, %v5462_v16  ;;  %v1534_v19 = vcombine.high %v1533_v25, %v1533_v25 }
 0x489   : > { %6311 = vst [vmem:[#allocation58_spill] sm:$0xff] %v5653_v27  ;;  %v5658_v15 = vpop.eup %4230  ;;  %v1561_v14 = vmul.f32 1.442695, %v1560_v58  ;;  %v1631_v12 = vmul.f32 %v5557_v53, %v5481_v41  ;;  %v1659_v24 = vrot.slane %v5557_v53, %v5333_v40  ;;  %4252 = vpow2.f32 %v2741_v35 }
 0x48a   : > { %v5670_v54 = vmax.f32 %v5653_v27, %v6312_v37  ;;  %v5672_v28 = vpop.eup %4232  ;;  %v2406_v2 = vrot.slane %v5658_v15, %v5333_v40  ;;  %v1570_v50 = vmul.f32 1.442695, %v1569_v62  ;;  %v1619_v52 = vmul.f32 1.442695, %v1618_v20 }
 0x48b   : > { %v5680_v1 = vpop.eup %4234  ;;  %v1672_v25 = vcombine.high %v5368_v5, %v5368_v5  ;;  %v2867_v10 = vsub.f32 %v5353_v57, %v2865_v49  ;;  %v1553_v62 = vcombine.high %v1552_v46, %v1552_v46  ;;  %v1639_v37 = vrot.slane %v1631_v12, %v5333_v40 }
 0x48c   : > { %6313 = vst [vmem:[#allocation59_spill] sm:$0xff] %v5670_v54  ;;  %v2980_v16 = vrot.slane %v5670_v54, %v5338_v45  ;;  %v5686_v58 = vpop.eup %4236  ;;  %4254 = vpow2.f32 %v1570_v50  ;;  %v5696_v20 = vadd.f32 %v1534_v19, %v5564_v33  ;;  %v2407_v30 = vcombine.high %v2406_v2, %v2406_v2 }
 0x48d   : > { %v5690_v43 = vpop.eup %4238  ;;  %4256 = vpow2.f32 %v1561_v14  ;;  %v1660_v26 = vcombine.high %v1659_v24, %v1659_v24  ;;  %v1679_v49 = vrot.slane %v1672_v25, %v5333_v40  ;;  %v1759_v46 = vsub.f32 %v5422_v44, %v5434_v55 }
 0x48e   : > { %v2982_v35 = vsub.f32 %v5353_v57, %v2980_v16  ;;  %v4241_v59 = vpop.eup %4240  ;;  %4258 = vpow2.f32 %v1619_v52  ;;  %v1640_v53 = vcombine.high %v1639_v37, %v1639_v37  ;;  %v2517_v57 = vrot.slane %v5690_v43, %v5333_v40 }
 0x48f   : > { %v1462_v50 = vmul.f32 %v4241_v59, %v5481_v41  ;;  %v1489_v12 = vrot.slane %v4241_v59, %v5333_v40  ;;  %v5703_v18 = vpop.eup %4242  ;;  %v2868_v33 = vmul.f32 1.442695, %v2867_v10  ;;  %v1555_v19 = vadd.f32 %v1553_v62, %v1537_v34 }
 0x490   : > { %v5708_v14 = vrot.slane %v1679_v49, %v5333_v40  ;;  %v2983_v24 = vmul.f32 1.442695, %v2982_v35  ;;  %v1772_v59 = vmul.f32 %v5577_v17, %v5481_v41  ;;  %v5717_v52 = vrot.slane %v2407_v30, %v5333_v40 }
 0x491   : > { %v5710_v2 = vpop.eup %4244  ;;  %v1470_v44 = vrot.slane %v1462_v50, %v5333_v40  ;;  %v1496_v16 = vrot.slane %v1489_v12, %v5333_v40  ;;  %v5720_v25 = vrot.slane %v1660_v26, %v5333_v40  ;;  %v1760_v10 = vmul.f32 1.442695, %v1759_v46 }
 0x492   : > { %v1688_v34 = vmax.f32 %v5404_v32, %v5708_v14  ;;  %v5724_v62 = vpop.eup %4246  ;;  %v5728_v37 = vrot.slane %v5710_v2, %v5333_v40  ;;  %v1647_v12 = vrot.slane %v1640_v53, %v5333_v40  ;;  %4260 = vpow2.f32 %v2868_v33 }
 0x493   : > { %v1477_v35 = vrot.slane %v1470_v44, %v5333_v40  ;;  %v1497_v50 = vcombine.high %v1496_v16, %v1496_v16  ;;  %v4249_v30 = vpop.eup %4248  ;;  %v1774_v27 = vcombine.high %v1772_v59, %v1772_v59  ;;  %v5735_v46 = vrot.slane %v2517_v57, %v5333_v40 }
 0x494   : > { %v1689_v26 = vsub.f32 %v5404_v32, %v1688_v34  ;;  %v1696_v6 = vrot.slane %v1688_v34, %v5338_v45  ;;  %4262 = vpow2.f32 %v2983_v24  ;;  %v1811_v48 = vcombine.high %v1679_v49, %v1679_v49 }
 0x495   : > { %v1499_v54 = vadd.f32 %v1497_v50, %v5630_v7  ;;  %v5738_v4 = vpop.eup %4250  ;;  %v1668_v44 = vcombine.high %v5720_v25, %v5720_v25  ;;  %4264 = vpow2.f32 %v1760_v10  ;;  %v1793_v32 = vcombine.high %v5577_v17, %v5577_v17 }
 0x496   : > { %6314 = vst [vmem:[#allocation60_spill] sm:$0xff] %v5738_v4  ;;  %v1698_v53 = vsub.f32 %v5368_v5, %v1696_v6  ;;  %v5748_v57 = vmul.f32 %v4249_v30, %v5643_v21  ;;  %v1478_v24 = vcombine.high %v1477_v35, %v1477_v35  ;;  %v1648_v7 = vcombine.high %v1647_v12, %v1647_v12  ;;  %v5750_v49 = vpop.eup %4252 }
 0x497   : > { %4266 = vrcp.f32 %v1499_v54  ;;  %v1690_v16 = vmul.f32 1.442695, %v1689_v26  ;;  %v5753_v25 = vrot.slane %v1774_v27, %v5333_v40  ;;  %v5756_v34 = vrot.slane %v1811_v48, %v5333_v40 }
 0x498   : > { %v1699_v59 = vmul.f32 1.442695, %v1698_v53  ;;  %v1886_v17 = vsub.f32 %v5448_v3, %v5457_v11  ;;  %v1899_v21 = vmul.f32 %v5594_v51, %v5481_v41  ;;  %v1921_v10 = vcombine.high %v5594_v51, %v5594_v51 }
 0x499   : > { %v4255_v6 = vpop.eup %4254  ;;  %v5767_v27 = vrot.slane %v1793_v32, %v5333_v40  ;;  %v1820_v12 = vmax.f32 %v5434_v55, %v5756_v34 }
 0x49a   : > { %v4257_v35 = vpop.eup %4256  ;;  %v1573_v54 = vmul.f32 %v4255_v6, %v5481_v41  ;;  %v1601_v50 = vrot.slane %v4255_v6, %v5333_v40  ;;  %4268 = vpow2.f32 %v1699_v59  ;;  %v1887_v3 = vmul.f32 1.442695, %v1886_v17 }
 0x49b   : > { %v1593_v48 = vmul.f32 %v4257_v35, %v1555_v19  ;;  %v1901_v30 = vcombine.high %v1899_v21, %v1899_v21  ;;  %v4259_v26 = vpop.eup %4258  ;;  %4270 = vpow2.f32 %v1690_v16  ;;  %v1928_v51 = vrot.slane %v1921_v10, %v5333_v40 }
 0x49c   : > { %v1581_v53 = vrot.slane %v1573_v54, %v5333_v40  ;;  %v1602_v33 = vcombine.high %v1601_v50, %v1601_v50  ;;  %v1630_v4 = vmul.f32 %v4259_v26, %v5696_v20  ;;  %v1651_v6 = vmul.f32 %v4259_v26, %v1555_v19 }
 0x49d   : > { %v1821_v59 = vsub.f32 %v5434_v55, %v1820_v12  ;;  %v1828_v32 = vrot.slane %v1820_v12, %v5338_v45  ;;  %4272 = vpow2.f32 %v1887_v3  ;;  %v1908_v17 = vrot.slane %v1901_v30, %v5333_v40 }
 0x49e   : > { %v1582_v47 = vcombine.high %v1581_v53, %v1581_v53  ;;  %v1609_v9 = vrot.slane %v1602_v33, %v5333_v40  ;;  %v1480_v16 = vadd.f32 %v1478_v24, %v5626_v39  ;;  %v1572_v10 = vmul.f32 %v4257_v35, %v5696_v20 }
 0x49f   : > { %v1830_v54 = vsub.f32 %v5368_v5, %v1828_v32  ;;  %v1650_v50 = vadd.f32 %v1648_v7, %v1630_v4  ;;  %v1670_v55 = vadd.f32 %v1668_v44, %v1651_v6  ;;  %v1788_v12 = vrot.slane %v5753_v25, %v5333_v40  ;;  %v5785_v26 = vpop.eup %4260 }
 0x4a0   : > { %v1610_v19 = vcombine.high %v1609_v9, %v1609_v9  ;;  %v1807_v33 = vrot.slane %v5767_v27, %v5333_v40  ;;  %v1822_v3 = vmul.f32 1.442695, %v1821_v59  ;;  %v1940_v39 = vcombine.high %v5708_v14, %v5708_v14 }
 0x4a1   : > { %v1831_v30 = vmul.f32 1.442695, %v1830_v54  ;;  %v5791_v24 = vpop.eup %4262  ;;  %v1589_v20 = vrot.slane %v1582_v47, %v5333_v40  ;;  %v1909_v4 = vcombine.high %v1908_v17, %v1908_v17  ;;  %v1929_v44 = vcombine.high %v1928_v51, %v1928_v51 }
 0x4a2   : > { %v1612_v9 = vadd.f32 %v1610_v19, %v1593_v48  ;;  %v4265_v7 = vpop.eup %4264  ;;  %v1942_v25 = vmax.f32 %v5457_v11, %v1940_v39  ;;  %v2001_v35 = vsub.f32 %v5471_v23, %v5479_v36  ;;  %v2014_v27 = vmul.f32 %v5614_v29, %v5481_v41 }
 0x4a3   : > { %4274 = vpow2.f32 %v1831_v30  ;;  %v1771_v53 = vmul.f32 %v4265_v7, %v1650_v50  ;;  %v1791_v14 = vmul.f32 %v4265_v7, %v1670_v55  ;;  %v2036_v6 = vcombine.high %v5614_v29, %v5614_v29 }
 0x4a4   : > { %4276 = vrcp.f32 %v1612_v9  ;;  %v4267_v47 = vpop.eup %4266  ;;  %v1943_v48 = vsub.f32 %v5457_v11, %v1942_v25  ;;  %v1950_v51 = vrot.slane %v1942_v25, %v5338_v45  ;;  %v2002_v59 = vmul.f32 1.442695, %v2001_v35 }
 0x4a5   : > { %v2055_v32 = vcombine.high %v5756_v34, %v5756_v34  ;;  %v1590_v17 = vcombine.high %v1589_v20, %v1589_v20  ;;  %4278 = vpow2.f32 %v1822_v3  ;;  %v1916_v23 = vrot.slane %v1909_v4, %v5333_v40 }
 0x4a6   : > { %v2016_v54 = vcombine.high %v2014_v27, %v2014_v27  ;;  %v1952_v30 = vsub.f32 %v5368_v5, %v1950_v51  ;;  %4280 = vpow2.f32 %v2002_v59  ;;  %v2043_v29 = vrot.slane %v2036_v6, %v5333_v40 }
 0x4a7   : > { %v4269_v19 = vpop.eup %4268  ;;  %v2057_v39 = vmax.f32 %v5479_v36, %v2055_v32  ;;  %v1790_v9 = vadd.f32 %v1788_v12, %v1771_v53  ;;  %v1936_v7 = vrot.slane %v1929_v44, %v5333_v40  ;;  %v1944_v25 = vmul.f32 1.442695, %v1943_v48 }
 0x4a8   : > { %v1723_v11 = vcombine.high %v4269_v19, %v4269_v19  ;;  %v4271_v35 = vpop.eup %4270  ;;  %v1702_v34 = vmul.f32 %v4269_v19, %v5481_v41  ;;  %v1953_v3 = vmul.f32 1.442695, %v1952_v30  ;;  %v1592_v27 = vadd.f32 %v1590_v17, %v1572_v10 }
 0x4a9   : > { %v2058_v20 = vsub.f32 %v5479_v36, %v2057_v39  ;;  %v2065_v4 = vrot.slane %v2057_v39, %v5338_v45  ;;  %v1721_v51 = vmul.f32 %v4271_v35, %v1670_v55  ;;  %v1809_v6 = vadd.f32 %v1807_v33, %v1791_v14 }
 0x4aa   : > { %v1730_v59 = vrot.slane %v1723_v11, %v5333_v40  ;;  %v4273_v21 = vpop.eup %4272  ;;  %4282 = vpow2.f32 %v1953_v3  ;;  %v2023_v12 = vrot.slane %v2016_v54, %v5333_v40  ;;  %v5816_v44 = vrot.slane %v2043_v29, %v5333_v40 }
 0x4ab   : > { %v2059_v53 = vmul.f32 1.442695, %v2058_v20  ;;  %v1898_v32 = vmul.f32 %v4273_v21, %v1790_v9  ;;  %4284 = vpow2.f32 %v1944_v25  ;;  %v2067_v36 = vsub.f32 %v5368_v5, %v2065_v4 }
 0x4ac   : > { %v1737_v48 = vrot.slane %v1730_v59, %v5333_v40  ;;  %v1501_v19 = vmul.f32 %v4267_v47, %v1480_v16  ;;  %v1701_v10 = vmul.f32 %v4271_v35, %v1650_v50  ;;  %v1704_v55 = vcombine.high %v1702_v34, %v1702_v34 }
 0x4ad   : > { %v2118_v33 = vsub.f32 %v5490_v61, %v5499_v8  ;;  %v1919_v17 = vmul.f32 %v4273_v21, %v1809_v6  ;;  %v2068_v30 = vmul.f32 1.442695, %v2067_v36  ;;  %v2131_v54 = vmul.f32 %v5619_v42, %v5481_v41 }
 0x4ae   : > { %v1739_v14 = vadd.f32 %v1737_v48, %v1721_v51  ;;  %v2030_v29 = vrot.slane %v2023_v12, %v5333_v40  ;;  %4286 = vpow2.f32 %v2059_v53  ;;  %v2154_v11 = vcombine.high %v5619_v42, %v5619_v42 }
 0x4af   : > { %v2119_v39 = vmul.f32 1.442695, %v2118_v33  ;;  %v1918_v16 = vadd.f32 %v1916_v23, %v1898_v32  ;;  %v2051_v50 = vcombine.high %v5816_v44, %v5816_v44  ;;  %v2133_v61 = vcombine.high %v2131_v54, %v2131_v54 }
 0x4b0   : > { %v4275_v5 = vpop.eup %4274  ;;  %4288 = vrcp.f32 %v1739_v14  ;;  %v2161_v35 = vrot.slane %v2154_v11, %v5333_v40  ;;  %v1711_v34 = vrot.slane %v1704_v55, %v5333_v40  ;;  %v1938_v3 = vadd.f32 %v1936_v7, %v1919_v17 }
 0x4b1   : > { %v4277_v47 = vpop.eup %4276  ;;  %v1834_v21 = vmul.f32 %v4275_v5, %v5481_v41  ;;  %v1856_v25 = vcombine.high %v4275_v5, %v4275_v5  ;;  %4290 = vpow2.f32 %v2068_v30  ;;  %v2140_v42 = vrot.slane %v2133_v61, %v5333_v40 }
 0x4b2   : > { %4292 = vpow2.f32 %v2119_v39  ;;  %v4279_v20 = vpop.eup %4278  ;;  %v2031_v51 = vcombine.high %v2030_v29, %v2030_v29  ;;  %v2177_v59 = vrot.slane %v5748_v57, %v5338_v45  ;;  %v1614_v44 = vmul.f32 %v4277_v47, %v1592_v27 }
 0x4b3   : > { %v1836_v4 = vcombine.high %v1834_v21, %v1834_v21  ;;  %v1863_v23 = vrot.slane %v1856_v25, %v5333_v40  ;;  %v4281_v12 = vpop.eup %4280  ;;  %v2141_v53 = vcombine.high %v2140_v42, %v2140_v42  ;;  %v2162_v48 = vcombine.high %v2161_v35, %v2161_v35 }
 0x4b4   : > { %v1854_v36 = vmul.f32 %v4279_v20, %v1809_v6  ;;  %v2013_v55 = vmul.f32 %v4281_v12, %v1918_v16  ;;  %v1718_v33 = vrot.slane %v1711_v34, %v5333_v40  ;;  %v1833_v14 = vmul.f32 %v4279_v20, %v1790_v9 }
 0x4b5   : > { %v1843_v32 = vrot.slane %v1836_v4, %v5333_v40  ;;  %v1864_v7 = vcombine.high %v1863_v23, %v1863_v23  ;;  %v2034_v17 = vmul.f32 %v4281_v12, %v1938_v3  ;;  %v2183_v30 = vrot.slane %v1501_v19, %v5338_v45 }
 0x4b6   : > { %v2216_v57 = vsel %vm2215_vm4, %v5656_v22, %v2177_v59  ;;  %v1720_v39 = vadd.f32 %v1718_v33, %v1701_v10  ;;  %v2148_v11 = vrot.slane %v2141_v53, %v5333_v40  ;;  %v2169_v6 = vrot.slane %v2162_v48, %v5333_v40 }
 0x4b7   : > { %v1844_v54 = vcombine.high %v1843_v32, %v1843_v32  ;;  %v1871_v29 = vrot.slane %v1864_v7, %v5333_v40  ;;  %v4283_v27 = vpop.eup %4282  ;;  %v2189_v5 = vrot.slane %v1614_v44, %v5338_v45  ;;  %v2033_v21 = vadd.f32 %v2031_v51, %v2013_v55 }
 0x4b8   : > { %v4285_v61 = vpop.eup %4284  ;;  %v1956_v47 = vmul.f32 %v4283_v27, %v5481_v41  ;;  %v1978_v19 = vcombine.high %v4283_v27, %v4283_v27  ;;  %v2053_v35 = vadd.f32 %v2051_v50, %v2034_v17  ;;  %v2218_v22 = vsel %vm2217_vm5, %v2216_v57, %v2183_v30 }
 0x4b9   : > { %v1873_v9 = vadd.f32 %v1871_v29, %v1854_v36  ;;  %v5846_v25 = vmul.f32 %v4285_v61, %v1918_v16  ;;  %v1851_v10 = vrot.slane %v1844_v54, %v5333_v40  ;;  %v1976_v4 = vmul.f32 %v4285_v61, %v1938_v3  ;;  %v5853_v16 = vld [vmem:[#allocation3 + $0x8] sm:$0xff] }
 0x4ba   : > { %v1958_v34 = vcombine.high %v1956_v47, %v1956_v47  ;;  %v1985_v42 = vrot.slane %v1978_v19, %v5333_v40  ;;  %v2149_v23 = vcombine.high %v2148_v11, %v2148_v11  ;;  %v2170_v59 = vcombine.high %v2169_v6, %v2169_v6 }
 0x4bb   : > { %4294 = vrcp.f32 %v1873_v9  ;;  %v4287_v20 = vpop.eup %4286  ;;  %v2236_v12 = vmax.f32 %v5499_v8, %v5363_v0  ;;  %v1853_v50 = vadd.f32 %v1851_v10, %v1833_v14  ;;  %v5859_v48 = vsel %vm2219_vm6, %v2218_v22, %v2189_v5 }
 0x4bc   : > { %v1992_v44 = vrot.slane %v1985_v42, %v5333_v40  ;;  %v5856_v53 = vmul.f32 %v4287_v20, %v2033_v21  ;;  %v1965_v36 = vrot.slane %v1958_v34, %v5333_v40  ;;  %v2092_v3 = vmul.f32 %v4287_v20, %v2053_v35 }
 0x4bd   : > { %v4289_v51 = vpop.eup %4288  ;;  %v2237_v7 = vsub.f32 %v5499_v8, %v2236_v12  ;;  %v2258_v55 = vmul.f32 %v5649_v63, %v5853_v16  ;;  %v2301_v54 = vmul.f32 %v5686_v58, %v5853_v16  ;;  %v2240_v11 = vsub.f32 %v5363_v0, %v2236_v12 }
 0x4be   : > { %v4291_v32 = vpop.eup %4290  ;;  %v1993_v17 = vcombine.high %v1992_v44, %v1992_v44  ;;  %v2328_v61 = vrot.slane %v5686_v58, %v5333_v40  ;;  %v5872_v9 = vmul.f32 %v4289_v51, %v1720_v39  ;;  %v1972_v19 = vrot.slane %v1965_v36, %v5333_v40 }
 0x4bf   : > { %v4293_v33 = vpop.eup %4292  ;;  %v2071_v14 = vmul.f32 %v4291_v32, %v5481_v41  ;;  %v2094_v30 = vcombine.high %v4291_v32, %v4291_v32  ;;  %v2238_v27 = vmul.f32 1.442695, %v2237_v7  ;;  %v2241_v22 = vmul.f32 1.442695, %v2240_v11 }
 0x4c0   : > { %v2130_v29 = vmul.f32 %v4293_v33, %v2033_v21  ;;  %v2152_v57 = vmul.f32 %v4293_v33, %v2053_v35  ;;  %v1995_v6 = vadd.f32 %v1993_v17, %v1976_v4  ;;  %v2309_v42 = vrot.slane %v2301_v54, %v5333_v40 }
 0x4c1   : > { %v2073_v5 = vcombine.high %v2071_v14, %v2071_v14  ;;  %v2101_v8 = vrot.slane %v2094_v30, %v5333_v40  ;;  %4296 = vpow2.f32 %v2238_v27  ;;  %v2329_v39 = vcombine.high %v2328_v61, %v2328_v61 }
 0x4c2   : > { %v2151_v47 = vadd.f32 %v2149_v23, %v2130_v29  ;;  %v2172_v41 = vadd.f32 %v2170_v59, %v2152_v57  ;;  %4298 = vrcp.f32 %v1995_v6  ;;  %v2379_v4 = vmul.f32 %v5658_v15, %v5853_v16 }
 0x4c3   : > { %v2080_v21 = vrot.slane %v2073_v5, %v5333_v40  ;;  %v2102_v35 = vcombine.high %v2101_v8, %v2101_v8  ;;  %4300 = vpow2.f32 %v2241_v22  ;;  %v2310_v12 = vcombine.high %v2309_v42, %v2309_v42 }
 0x4c4   : > { %v2257_v10 = vmul.f32 %v5634_v60, %v2151_v47  ;;  %v2260_v34 = vmul.f32 %v5634_v60, %v2172_v41  ;;  %v1973_v51 = vcombine.high %v1972_v19, %v1972_v19  ;;  %v2195_v32 = vrot.slane %v5872_v9, %v5338_v45 }
 0x4c5   : > { %v2081_v20 = vcombine.high %v2080_v21, %v2080_v21  ;;  %v2109_v58 = vrot.slane %v2102_v35, %v5333_v40  ;;  %v2387_v60 = vrot.slane %v2379_v4, %v5333_v40  ;;  %v2317_v33 = vrot.slane %v2310_v12, %v5333_v40 }
 0x4c6   : > { %v2259_v23 = vadd.f32 %v2258_v55, %v2257_v10  ;;  %v2261_v59 = vadd.f32 %v5649_v63, %v2260_v34  ;;  %v2336_v15 = vrot.slane %v2329_v39, %v5333_v40  ;;  %v2421_v27 = vsub.f32 %v5533_v13, %v5570_v38 }
 0x4c7   : > { %v2110_v44 = vcombine.high %v2109_v58, %v2109_v58  ;;  %v2088_v55 = vrot.slane %v2081_v20, %v5333_v40  ;;  %v2388_v30 = vcombine.high %v2387_v60, %v2387_v60  ;;  %v1975_v6 = vadd.f32 %v1973_v51, %v5846_v25 }
 0x4c8   : > { %v4295_v36 = vpop.eup %4294  ;;  %v2300_v7 = vmul.f32 %v5672_v28, %v2259_v23  ;;  %v2320_v17 = vmul.f32 %v5672_v28, %v2261_v59  ;;  %v2378_v14 = vmul.f32 %v5680_v1, %v2259_v23  ;;  %v2398_v57 = vmul.f32 %v5680_v1, %v2261_v59 }
 0x4c9   : > { %v2112_v63 = vadd.f32 %v2110_v44, %v2092_v3  ;;  %v1875_v11 = vmul.f32 %v4295_v36, %v1853_v50  ;;  %v2395_v28 = vrot.slane %v2388_v30, %v5333_v40  ;;  %v2422_v5 = vmul.f32 1.442695, %v2421_v27 }
 0x4ca   : > { %v5892_v54 = vadd.f32 %v2317_v33, %v2300_v7  ;;  %v2338_v29 = vadd.f32 %v2336_v15, %v2320_v17  ;;  %v5900_v3 = vadd.f32 %v5717_v52, %v2398_v57  ;;  %v6315_v8 = vrot.slane %v5570_v38, %v5338_v45 }
 0x4cb   : > { %4302 = vrcp.f32 %v2112_v63  ;;  %v2089_v61 = vcombine.high %v2088_v55, %v2088_v55  ;;  %v5906_v13 = vadd.f32 %v2395_v28, %v2378_v14  ;;  %v2490_v25 = vmul.f32 %v5690_v43, %v5853_v16 }
 0x4cc   : > { %4304 = vrcp.f32 %v2338_v29  ;;  %v2430_v1 = vsub.f32 %v5363_v0, %v6315_v8  ;;  %v2525_v50 = vcombine.high %v5735_v46, %v5735_v46  ;;  %v2509_v52 = vmul.f32 %v5703_v18, %v5900_v3 }
 0x4cd   : > { %4306 = vpow2.f32 %v2422_v5  ;;  %v2532_v21 = vsub.f32 %v5555_v31, %v5585_v56  ;;  %v2489_v35 = vmul.f32 %v5703_v18, %v5906_v13  ;;  %v2498_v22 = vrot.slane %v2490_v25, %v5333_v40  ;;  %v6318_v5 = vld [vmem:[#allocation54_spill] sm:$0xff] }
 0x4ce   : > { %v2431_v19 = vmul.f32 1.442695, %v2430_v1  ;;  %v4297_v38 = vpop.eup %4296  ;;  %v6316_v43 = vrot.slane %v5585_v56, %v5338_v45  ;;  %v2603_v46 = vmul.f32 %v5710_v2, %v5853_v16  ;;  %v5925_v58 = vadd.f32 %v2525_v50, %v2509_v52  ;;  %v6321_v52 = vld [vmem:[#allocation57_spill] sm:$0xff] }
 0x4cf   : > { %v4299_v34 = vpop.eup %4298  ;;  %v2243_v42 = vmul.f32 %v4297_v38, %v2151_v47  ;;  %v2246_v20 = vmul.f32 %v4297_v38, %v2172_v41  ;;  %v2505_v39 = vrot.slane %v2498_v22, %v5333_v40  ;;  %v2533_v18 = vmul.f32 1.442695, %v2532_v21 }
 0x4d0   : > { %v2541_v10 = vsub.f32 %v5363_v0, %v6316_v43  ;;  %4308 = vpow2.f32 %v2431_v19  ;;  %v1997_v31 = vmul.f32 %v4299_v34, %v1975_v6  ;;  %v2201_v23 = vrot.slane %v1875_v11, %v5338_v45  ;;  %v4301_v41 = vpop.eup %4300  ;;  %v6320_v19 = vld [vmem:[#allocation56_spill] sm:$0xff]  ;;  %v6323_v34 = vld [vmem:[#allocation55_spill] sm:$0xff] }
 0x4d1   : > { %v2611_v56 = vrot.slane %v2603_v46, %v5333_v40  ;;  %v6317_v59 = vcombine.high %v5728_v37, %v5728_v37  ;;  %v2644_v47 = vcombine.high %v5363_v0, %v5363_v0  ;;  %v2506_v51 = vcombine.high %v2505_v39, %v2505_v39 }
 0x4d2   : > { %v2542_v4 = vmul.f32 1.442695, %v2541_v10  ;;  %v2207_v12 = vrot.slane %v1997_v31, %v5338_v45  ;;  %4310 = vpow2.f32 %v2533_v18  ;;  %v2744_v44 = vmul.f32 %v5750_v49, %v5853_v16 }
 0x4d3   : > { %v2639_v2 = vrot.slane %v6317_v59, %v5333_v40  ;;  %v2244_v60 = vmul.f32 %v4301_v41, %v5853_v16  ;;  %v2247_v36 = vadd.f32 %v4301_v41, %v2246_v20  ;;  %v2612_v7 = vcombine.high %v2611_v56, %v2611_v56 }
 0x4d4   : > { %4312 = vpow2.f32 %v2542_v4  ;;  %v2508_v33 = vadd.f32 %v2506_v51, %v2489_v35  ;;  %v2623_v37 = vmul.f32 %v5724_v62, %v5925_v58  ;;  %v2651_v17 = vrot.slane %v2644_v47, %v5333_v40  ;;  %v6324_v4 = vld [vmem:[#allocation60_spill] sm:$0xff] }
 0x4d5   : > { %v2091_v15 = vadd.f32 %v2089_v61, %v5856_v53  ;;  %v2222_v55 = vsel %vm2221_vm7, %v5859_v48, %v2195_v32  ;;  %v2245_v63 = vadd.f32 %v2244_v60, %v2243_v42  ;;  %4314 = vrcp.f32 %v2247_v36 }
 0x4d6   : > { %v2224_v14 = vsel %vm2223_vm8, %v2222_v55, %v2201_v23  ;;  %v2619_v30 = vrot.slane %v2612_v7, %v5333_v40  ;;  %v2640_v29 = vcombine.high %v2639_v2, %v2639_v2  ;;  %v5952_v57 = vrot.slane %v2651_v17, %v5333_v40 }
 0x4d7   : > { %v2226_v11 = vsel %vm2225_vm9, %v2224_v14, %v2207_v12  ;;  %v2746_v53 = vcombine.high %v2744_v44, %v2744_v44  ;;  %v2783_v6 = vcombine.high %v2651_v17, %v2651_v17  ;;  %v2602_v48 = vmul.f32 %v5724_v62, %v2508_v33 }
 0x4d8   : > { %v4303_v27 = vpop.eup %4302  ;;  %v5956_v32 = vadd.f32 %v2640_v29, %v2623_v37  ;;  %v2660_v8 = vmax.f32 %v6318_v5, %v5952_v57  ;;  %v6319_v61 = vcombine.high %v5750_v49, %v5750_v49  ;;  %v6322_v62 = vsub.f32 %v6320_v19, %v6321_v52 }
 0x4d9   : > { %v4305_v9 = vpop.eup %4304  ;;  %v2114_v28 = vmul.f32 %v4303_v27, %v2091_v15  ;;  %v5970_v50 = vrot.slane %v2783_v6, %v5333_v40  ;;  %v2620_v22 = vcombine.high %v2619_v30, %v2619_v30  ;;  %v5981_v46 = vrot.slane %v2746_v53, %v5333_v40 }
 0x4da   : > { %v5961_v1 = vmul.f32 %v4305_v9, %v5892_v54  ;;  %v5967_v25 = vrot.slane %v6319_v61, %v5333_v40  ;;  %v2859_v21 = vmul.f32 1.442695, %v6322_v62  ;;  %v4307_v38 = vpop.eup %4306  ;;  %v2661_v54 = vsub.f32 %v6318_v5, %v2660_v8 }
 0x4db   : > { %v2213_v35 = vrot.slane %v2114_v28, %v5338_v45  ;;  %v2668_v43 = vrot.slane %v2660_v8, %v5338_v45  ;;  %v2433_v10 = vmul.f32 %v4307_v38, %v5906_v13  ;;  %v2453_v49 = vmul.f32 %v4307_v38, %v5900_v3  ;;  %v6326_v38 = vld [vmem:[#allocation58_spill] sm:$0xff] }
 0x4dc   : > { %v2792_v42 = vmax.f32 %v6323_v34, %v5970_v50  ;;  %v2662_v39 = vmul.f32 1.442695, %v2661_v54  ;;  %v2763_v23 = vmul.f32 %v6324_v4, %v5956_v32  ;;  %4316 = vpow2.f32 %v2859_v21  ;;  %v6325_v21 = vld [vmem:[#allocation59_spill] sm:$0xff] }
 0x4dd   : > { %v4309_v20 = vpop.eup %4308  ;;  %v2228_v31 = vsel %vm2227_vm10, %v2226_v11, %v2213_v35  ;;  %v2670_v18 = vsub.f32 %v5363_v0, %v2668_v43  ;;  %v2871_v47 = vmul.f32 %v5785_v26, %v5853_v16  ;;  %v2893_v60 = vcombine.high %v5785_v26, %v5785_v26 }
 0x4de   : > { %2229 = vst.msk [vmem:[#allocation4] sm:$0xff] %vm924_vm0, %v2228_v31  ;;  %v2434_v13 = vmul.f32 %v4309_v20, %v5853_v16  ;;  %v2461_v3 = vrot.slane %v4309_v20, %v5333_v40  ;;  %v2793_v56 = vsub.f32 %v6323_v34, %v2792_v42  ;;  %4318 = vpow2.f32 %v2662_v39 }
 0x4df   : > { %v2671_v59 = vmul.f32 1.442695, %v2670_v18  ;;  %v2800_v2 = vrot.slane %v2792_v42, %v5338_v45  ;;  %v4311_v41 = vpop.eup %4310  ;;  %v2622_v27 = vadd.f32 %v2620_v22, %v2602_v48  ;;  %v2873_v53 = vcombine.high %v2871_v47, %v2871_v47 }
 0x4e0   : > { %v2442_v12 = vrot.slane %v2434_v13, %v5333_v40  ;;  %v2468_v51 = vrot.slane %v2461_v3, %v5333_v40  ;;  %v2794_v44 = vmul.f32 1.442695, %v2793_v56  ;;  %v2544_v7 = vmul.f32 %v4311_v41, %v2508_v33 }
 0x4e1   : > { %v4313_v36 = vpop.eup %4312  ;;  %v2565_v37 = vmul.f32 %v4311_v41, %v5925_v58  ;;  %4320 = vpow2.f32 %v2671_v59  ;;  %v2802_v17 = vsub.f32 %v5363_v0, %v2800_v2  ;;  %v2779_v28 = vrot.slane %v5967_v25, %v5333_v40 }
 0x4e2   : > { %v2449_v15 = vrot.slane %v2442_v12, %v5333_v40  ;;  %v2469_v55 = vcombine.high %v2468_v51, %v2468_v51  ;;  %v2545_v14 = vmul.f32 %v4313_v36, %v5853_v16  ;;  %v2573_v30 = vrot.slane %v4313_v36, %v5333_v40  ;;  %v4315_v29 = vpop.eup %4314 }
 0x4e3   : > { %4322 = vpow2.f32 %v2794_v44  ;;  %v2803_v11 = vmul.f32 1.442695, %v2802_v17  ;;  %v6005_v26 = vmul.f32 %v4315_v29, %v2245_v63  ;;  %v2900_v5 = vrot.slane %v2893_v60, %v5333_v40 }
 0x4e4   : > { %v2450_v33 = vcombine.high %v2449_v15, %v2449_v15  ;;  %v2471_v6 = vadd.f32 %v2469_v55, %v2453_v49  ;;  %v2553_v58 = vrot.slane %v2545_v14, %v5333_v40  ;;  %v2574_v9 = vcombine.high %v2573_v30, %v2573_v30 }
 0x4e5   : > { %4324 = vpow2.f32 %v2803_v11  ;;  %v2912_v48 = vcombine.high %v5952_v57, %v5952_v57  ;;  %v2743_v19 = vmul.f32 %v6324_v4, %v2622_v27  ;;  %v2880_v62 = vrot.slane %v2873_v53, %v5333_v40 }
 0x4e6   : > { %v2452_v8 = vadd.f32 %v2450_v33, %v2433_v10  ;;  %4326 = vrcp.f32 %v2471_v6  ;;  %v2554_v61 = vcombine.high %v2553_v58, %v2553_v58  ;;  %v2581_v63 = vrot.slane %v2574_v9, %v5333_v40 }
 0x4e7   : > { %v2973_v35 = vsub.f32 %v6326_v38, %v6325_v21  ;;  %v2914_v22 = vmax.f32 %v6321_v52, %v2912_v48  ;;  %v2760_v43 = vrot.slane %v5981_v46, %v5333_v40  ;;  %v2781_v10 = vadd.f32 %v2779_v28, %v2763_v23 }
 0x4e8   : > { %v2561_v25 = vrot.slane %v2554_v61, %v5333_v40  ;;  %v2582_v54 = vcombine.high %v2581_v63, %v2581_v63  ;;  %v2901_v34 = vcombine.high %v2900_v5, %v2900_v5  ;;  %v2881_v4 = vcombine.high %v2880_v62, %v2880_v62 }
 0x4e9   : > { %v2974_v49 = vmul.f32 1.442695, %v2973_v35  ;;  %v2915_v42 = vsub.f32 %v6321_v52, %v2914_v22  ;;  %v2922_v20 = vrot.slane %v2914_v22, %v5338_v45  ;;  %v4317_v31 = vpop.eup %4316  ;;  %v2762_v18 = vadd.f32 %v2760_v43, %v2743_v19 }
 0x4ea   : > { %v2562_v57 = vcombine.high %v2561_v25, %v2561_v25  ;;  %v2584_v39 = vadd.f32 %v2582_v54, %v2565_v37  ;;  %v2986_v13 = vmul.f32 %v5791_v24, %v5853_v16  ;;  %v3026_v2 = vcombine.high %v5970_v50, %v5970_v50 }
 0x4eb   : > { %v4319_v3 = vpop.eup %4318  ;;  %v2916_v59 = vmul.f32 1.442695, %v2915_v42  ;;  %v2924_v46 = vsub.f32 %v5363_v0, %v2922_v20  ;;  %4328 = vpow2.f32 %v2974_v49  ;;  %v2908_v41 = vrot.slane %v2901_v34, %v5333_v40 }
 0x4ec   : > { %v6026_v56 = vadd.f32 %v2562_v57, %v2544_v7  ;;  %4330 = vrcp.f32 %v2584_v39  ;;  %v2673_v23 = vmul.f32 %v4319_v3, %v2622_v27  ;;  %v2693_v52 = vmul.f32 %v4319_v3, %v5956_v32 }
 0x4ed   : > { %4332 = vpow2.f32 %v2916_v59  ;;  %v2925_v12 = vmul.f32 1.442695, %v2924_v46  ;;  %v3008_v51 = vcombine.high %v5791_v24, %v5791_v24  ;;  %v2888_v36 = vrot.slane %v2881_v4, %v5333_v40 }
 0x4ee   : > { %v4321_v47 = vpop.eup %4320  ;;  %v3028_v7 = vmax.f32 %v6325_v21, %v3026_v2  ;;  %v2870_v32 = vmul.f32 %v4317_v31, %v2762_v18  ;;  %v2988_v17 = vcombine.high %v2986_v13, %v2986_v13  ;;  %v3090_v50 = vrot.slane %v5961_v1, %v5338_v45 }
 0x4ef   : > { %v2674_v44 = vmul.f32 %v4321_v47, %v5853_v16  ;;  %v2695_v60 = vcombine.high %v4321_v47, %v4321_v47  ;;  %4334 = vpow2.f32 %v2925_v12  ;;  %v2891_v29 = vmul.f32 %v4317_v31, %v2781_v10 }
 0x4f0   : > { %v4323_v37 = vpop.eup %4322  ;;  %v3029_v27 = vsub.f32 %v6325_v21, %v3028_v7  ;;  %v3036_v11 = vrot.slane %v3028_v7, %v5338_v45  ;;  %v3128_v53 = vsel %vm2215_vm4, %v6005_v26, %v3090_v50  ;;  %v2995_v5 = vrot.slane %v2988_v17, %v5333_v40 }
 0x4f1   : > { %v2676_v15 = vcombine.high %v2674_v44, %v2674_v44  ;;  %v2702_v55 = vrot.slane %v2695_v60, %v5333_v40  ;;  %v2805_v14 = vmul.f32 %v4323_v37, %v2762_v18  ;;  %v2826_v30 = vmul.f32 %v4323_v37, %v2781_v10  ;;  %v6327_v37 = vld [vmem:[#allocation52_spill] sm:$0xff] }
 0x4f2   : > { %v4325_v24 = vpop.eup %4324  ;;  %v3030_v61 = vmul.f32 1.442695, %v3029_v27  ;;  %v3038_v48 = vsub.f32 %v5363_v0, %v3036_v11  ;;  %v3015_v21 = vrot.slane %v3008_v51, %v5333_v40  ;;  %v2890_v54 = vadd.f32 %v2888_v36, %v2870_v32 }
 0x4f3   : > { %v4327_v33 = vpop.eup %4326  ;;  %v2683_v6 = vrot.slane %v2676_v15, %v5333_v40  ;;  %v2709_v58 = vrot.slane %v2702_v55, %v5333_v40  ;;  %v2806_v1 = vmul.f32 %v4325_v24, %v5853_v16  ;;  %v2828_v9 = vcombine.high %v4325_v24, %v4325_v24  ;;  %v6328_v55 = vld [vmem:[#allocation53_spill] sm:$0xff] }
 0x4f4   : > { %v2473_v28 = vmul.f32 %v4327_v33, %v2452_v8  ;;  %4336 = vpow2.f32 %v3030_v61  ;;  %v3039_v38 = vmul.f32 1.442695, %v3038_v48  ;;  %v2910_v43 = vadd.f32 %v2908_v41, %v2891_v29 }
 0x4f5   : > { %v2690_v63 = vrot.slane %v2683_v6, %v5333_v40  ;;  %v2711_v19 = vadd.f32 %v2709_v58, %v2693_v52  ;;  %v2808_v62 = vcombine.high %v2806_v1, %v2806_v1  ;;  %v2835_v26 = vrot.slane %v2828_v9, %v5333_v40 }
 0x4f6   : > { %v3096_v35 = vrot.slane %v2473_v28, %v5338_v45  ;;  %v3002_v42 = vrot.slane %v2995_v5, %v5333_v40  ;;  %v3022_v20 = vrot.slane %v3015_v21, %v5333_v40  ;;  %v1237_v32 = vsub.f32 0.0, %v6327_v37 }
 0x4f7   : > { %v2692_v25 = vadd.f32 %v2690_v63, %v2673_v23  ;;  %4338 = vrcp.f32 %v2711_v19  ;;  %v2815_v8 = vrot.slane %v2808_v62, %v5333_v40  ;;  %v2836_v22 = vcombine.high %v2835_v26, %v2835_v26 }
 0x4f8   : > { %4340 = vpow2.f32 %v3039_v38  ;;  %v3129_v0 = vsel %vm2217_vm5, %v3128_v53, %v3096_v35  ;;  %v4329_v10 = vpop.eup %4328  ;;  %v3003_v12 = vcombine.high %v3002_v42, %v3002_v42  ;;  %v3023_v51 = vcombine.high %v3022_v20, %v3022_v20 }
 0x4f9   : > { %v2816_v49 = vcombine.high %v2815_v8, %v2815_v8  ;;  %v2843_v57 = vrot.slane %v2836_v22, %v5333_v40  ;;  %v4331_v34 = vpop.eup %4330  ;;  %v2985_v59 = vmul.f32 %v4329_v10, %v2890_v54  ;;  %v3006_v46 = vmul.f32 %v4329_v10, %v2910_v43 }
 0x4fa   : > { %v4333_v31 = vpop.eup %4332  ;;  %v2586_v39 = vmul.f32 %v4331_v34, %v6026_v56  ;;  %v1239_v33 = vmul.f32 1.442695, %v1237_v32 }
 0x4fb   : > { %v2823_v18 = vrot.slane %v2816_v49, %v5333_v40  ;;  %v2845_v4 = vadd.f32 %v2843_v57, %v2826_v30  ;;  %v2927_v13 = vmul.f32 %v4333_v31, %v2890_v54  ;;  %v2948_v3 = vmul.f32 %v4333_v31, %v2910_v43 }
 0x4fc   : > { %v4335_v23 = vpop.eup %4334  ;;  %v3102_v2 = vrot.slane %v2586_v39, %v5338_v45  ;;  %v3005_v36 = vadd.f32 %v3003_v12, %v2985_v59  ;;  %v3025_v7 = vadd.f32 %v3023_v51, %v3006_v46  ;;  %v3137_v46 = vld [vmem:[#allocation4] sm:$0xff]  ;;  %v6329_v51 = vmov 0.0  }
 0x4fd   : > { %v2825_v52 = vadd.f32 %v2823_v18, %v2805_v14  ;;  %4342 = vrcp.f32 %v2845_v4  ;;  %v2928_v47 = vmul.f32 %v4335_v23, %v5853_v16  ;;  %v2950_v41 = vcombine.high %v4335_v23, %v4335_v23 }
 0x4fe   : > { %v3130_v44 = vsel %vm2219_vm6, %v3129_v0, %v3102_v2  ;;  %v1238_v14 = vsub.f32 0.0, %v6328_v55 }
 0x4ff   : > { %v2930_v56 = vcombine.high %v2928_v47, %v2928_v47  ;;  %v2957_v60 = vrot.slane %v2950_v41, %v5333_v40 }
 0x500   : > { %v1241_v5 = vmul.f32 1.442695, %v1238_v14 }
 0x501   : > { %v2937_v17 = vrot.slane %v2930_v56, %v5333_v40  ;;  %v2964_v50 = vrot.slane %v2957_v60, %v5333_v40  ;;  %v4337_v15 = vpop.eup %4336 }
 0x502   : > { %v3041_v27 = vmul.f32 %v4337_v15, %v3005_v36  ;;  %v3063_v11 = vmul.f32 %v4337_v15, %v3025_v7  ;;  %v6330_v36 = vld [vmem:[#allocation49_spill] sm:$0xff]  ;;  %v6331_v15 = vld [vmem:[#allocation50_spill] sm:$0xff] }
 0x503   : > { %v2944_v24 = vrot.slane %v2937_v17, %v5333_v40  ;;  %v2965_v29 = vcombine.high %v2964_v50, %v2964_v50 }
 0x504   : > { %v4339_v30 = vpop.eup %4338 }
 0x505   : > { %v4341_v53 = vpop.eup %4340  ;;  %v2713_v6 = vmul.f32 %v4339_v30, %v2692_v25  ;;  %v2945_v58 = vcombine.high %v2944_v24, %v2944_v24  ;;  %v2967_v1 = vadd.f32 %v2965_v29, %v2948_v3 }
 0x506   : > { %v3042_v9 = vmul.f32 %v4341_v53, %v5853_v16  ;;  %v3065_v28 = vcombine.high %v4341_v53, %v4341_v53 }
 0x507   : > { %v3108_v61 = vrot.slane %v2713_v6, %v5338_v45  ;;  %v2947_v48 = vadd.f32 %v2945_v58, %v2927_v13  ;;  %4344 = vrcp.f32 %v2967_v1 }
 0x508   : > { %v3044_v63 = vcombine.high %v3042_v9, %v3042_v9  ;;  %v3072_v19 = vrot.slane %v3065_v28, %v5333_v40  ;;  %4346 = vpow2.f32 %v1239_v33  ;;  %v4172_v9 = vld [vmem:[#allocation28 + $0x8] sm:$0xff]   ;;  %v4173_v28 = vld [vmem:[#allocation28] sm:$0xff]  }
 0x509   : > { %v3131_v62 = vsel %vm2221_vm7, %v3130_v44, %v3108_v61  ;;  %4348 = vpow2.f32 %v1241_v5  ;;  %v3833_v44 = vld [vmem:[#allocation16] ss:$0 sm:$0xff]  ;;  %3920 = vmatpush3.bf16.msra.mxu0 %v4172_v9  ;;  %v4177_v61 = vld [vmem:[%s6222_s21 + $0x30] sm:$0xff]  }
 0x50a   : > { %v4343_v26 = vpop.eup %4342  ;;  %v3051_v21 = vrot.slane %v3044_v63, %v5333_v40  ;;  %v3073_v38 = vcombine.high %v3072_v19, %v3072_v19  ;;  %3921 = vmatprep.subr.bf16.mxu0 %v6329_v51  ;;  %v4176_v5 = vld [vmem:[%s6222_s21 + $0x38] sm:$0xff]   ;;  %v4179_v63 = vld [vmem:[%s6222_s21 + $0x20] sm:$0xff]  }
 0x50b   : > { %v2847_v35 = vmul.f32 %v4343_v26, %v2825_v52  ;;  %v4180_v19 = vld [vmem:[%s6222_s21 + $0x18] sm:$0xff]  }
 0x50c   : > { %v3052_v25 = vcombine.high %v3051_v21, %v3051_v21  ;;  %v3080_v16 = vrot.slane %v3073_v38, %v5333_v40 }
 0x50d   : > { %v3114_v8 = vrot.slane %v2847_v35, %v5338_v45  ;;  %3922 = vmatpush3.bf16.msra.mxu0 %v4173_v28 }
 0x50e   : > { %v3059_v22 = vrot.slane %v3052_v25, %v5333_v40  ;;  %v3081_v54 = vcombine.high %v3080_v16, %v3080_v16  ;;  %3947 = vmatprep.subr.bf16.mxu0 %v6329_v51 }
 0x50f   : > { %v3132_v43 = vsel %vm2223_vm8, %v3131_v62, %v3114_v8  ;;  %v3834_v8 = vld [vmem:[#allocation13] ss:$0 sm:$0xff] }
 0x510   : > { %v3060_v0 = vcombine.high %v3059_v22, %v3059_v22  ;;  %v3083_v10 = vadd.f32 %v3081_v54, %v3063_v11 }
 0x512   : > { %v3062_v49 = vadd.f32 %v3060_v0, %v3041_v27  ;;  %4350 = vrcp.f32 %v3083_v10  ;;  %v3835_v0 = vld [vmem:[#allocation14] ss:$0 sm:$0xff] }
 0x514   : > { %v4345_v57 = vpop.eup %4344 }
 0x515   : > { %v2969_v34 = vmul.f32 %v4345_v57, %v2947_v48  ;;  %v4347_v42 = vpop.eup %4346  ;;  %v4178_v48 = vld [vmem:[%s6222_s21 + $0x28] sm:$0xff]  }
 0x516   : > { %v4349_v20 = vpop.eup %4348  ;;  %v1243_v39 = vadd.f32 1.0, %v4347_v42 }
 0x517   : > { %v3120_v31 = vrot.slane %v2969_v34, %v5338_v45  ;;  %v1244_v4 = vadd.f32 1.0, %v4349_v20 }
 0x518   : > { %4352 = vrcp.f32 %v1243_v39 }
 0x519   : > { %v3133_v18 = vsel %vm2225_vm9, %v3132_v43, %v3120_v31  ;;  %4354 = vrcp.f32 %v1244_v4  ;;  %v3836_v4 = vld [vmem:[#allocation26] ss:$0 sm:$0xff] }
 0x51f   : > { %v4351_v13 = vpop.eup %4350 }
 0x520   : > { %v3085_v40 = vmul.f32 %v4351_v13, %v3062_v49 }
 0x522   : > { %v3126_v3 = vrot.slane %v3085_v40, %v5338_v45 }
 0x524   : > { %v3134_v59 = vsel %vm2227_vm10, %v3133_v18, %v3126_v3 }
 0x525   : > { %3136 = vst.msk [vmem:[#allocation4 + $0x8] sm:$0xff] %vm924_vm0, %v3134_v59  ;;  %v4353_v23 = vpop.eup %4352 }
 0x526   : > { %v4355_v52 = vpop.eup %4354  ;;  %v3139_v47 = vmul.f32 %v4353_v23, %v3137_v46 }
 0x52c   : > { %v3138_v2 = vld [vmem:[#allocation4 + $0x8] sm:$0xff] }
 0x52d   : > { %v3140_v41 = vmul.f32 %v4355_v52, %v3138_v2  ;;  %v3837_v52 = vld [vmem:[%s6220_s19] ss:$0 sm:$0xff] }
 0x52f   : > { %v3141_v12 = vpack.c.bf16 %v3140_v41, %v3139_v47  ;;  %v4174_v47 = vld [vmem:[#allocation29 + $0x8] sm:$0xff]  }
 0x531   : > { %3916 = vmatmul.mubr.msk.bf16.vlgmr.msra.gmra.mxu1 %vm924_vm0, %v3141_v12 }
 0x532   : > { %3943 = vmatprep.mubr.msk.bf16.mxu1 %vm4901_vm1, %v6329_v51  ;;  %3928 = vmatpush3.bf16.msra.mxu1 %v4176_v5 }
 0x533   : > { %3929 = vmatprep.subr.bf16.mxu1 %v6329_v51 }
 0x536   : > { %3930 = vmatpush3.bf16.msra.mxu1 %v4177_v61 }
 0x537   : > { %3931 = vmatprep.subr.bf16.mxu1 %v6329_v51 }
 0x53a   : > { %3932 = vmatpush3.bf16.msra.mxu1 %v4178_v48 }
 0x53b   : > { %3933 = vmatprep.subr.bf16.mxu1 %v6329_v51 }
 0x53e   : > { %3934 = vmatpush3.bf16.msra.mxu1 %v4179_v63 }
 0x53f   : > { %3935 = vmatprep.subr.bf16.mxu1 %v6329_v51 }
 0x542   : > { %3936 = vmatpush3.bf16.msra.mxu1 %v4180_v19 }
 0x543   : > { %3937 = vmatprep.subr.bf16.mxu1 %v6329_v51 }
 0x5f1   : > { %v3195_v56 = vpop.f32.mrf.mxu1 }
 0x5f2   : > { %v3209_v60 = vmul.f32 %v3833_v44, %v3195_v56  ;;  %v4175_v56 = vld [vmem:[#allocation29] sm:$0xff]  }
 0x5f3   : > { %v3917_v45 = vpop.f32.mrf.mxu1 }
 0x5f4   : > { %v6088_v7 = vadd.f32 %v3209_v60, %v6330_v36 }
 0x5f5   : > { %v3198_v37 = vpop.f32.mrf.mxu1 }
 0x5f6   : > { %v3210_v32 = vmul.f32 %v3833_v44, %v3198_v37  ;;  %v3215_v17 = vsel %vm924_vm0, %v6088_v7, 0.0  ;;  %v4181_v37 = vld [vmem:[%s6222_s21 + $0x10] sm:$0xff]  }
 0x5f7   : > { %3216 = vadd.xlane.f32.xlu0 %v3215_v17  ;;  %v3918_v50 = vpop.f32.mrf.mxu1  ;;  %3938 = vmatpush3.bf16.msra.mxu1 %v4181_v37  ;;  %v4183_v17 = vld [vmem:[%s6222_s21] sm:$0xff]  }
 0x5f8   : > { %v6093_v55 = vadd.f32 %v3210_v32, %v6331_v15  ;;  %3939 = vmatprep.subr.bf16.mxu1 %v6329_v51  ;;  %v4182_v32 = vld [vmem:[%s6222_s21 + $0x8] sm:$0xff]  }
 0x5fa   : > { %v3218_v14 = vsel %vm924_vm0, %v6093_v55, 0.0 }
 0x5fb   : > { %3219 = vadd.xlane.f32.xlu1 %v3218_v14  ;;  %3940 = vmatpush3.bf16.msra.mxu1 %v4182_v32 }
 0x5fc   : > { %3941 = vmatprep.subr.bf16.mxu1 %v6329_v51 }
 0x5ff   : > { %3942 = vmatpush3.bf16.msra.mxu1 %v4183_v17 }
 0x680   : > { %v3217_v30 = vpop.xlane.xlu0 %3216 }
 0x681   : > { %v3221_v24 = vmul.f32 0.03125, %v3217_v30 }
 0x683   : > { %v3223_v29 = vsub.f32 %v6088_v7, %v3221_v24 }
 0x684   : > { %v3220_v27 = vpop.xlane.xlu1 %3219 }
 0x685   : > { %v3222_v11 = vmul.f32 0.03125, %v3220_v27  ;;  %v3225_v53 = vmul.f32 %v3223_v29, %v3223_v29 }
 0x687   : > { %v3224_v33 = vsub.f32 %v6093_v55, %v3222_v11  ;;  %v3227_v6 = vsel %vm924_vm0, %v3225_v53, 0.0 }
 0x688   : > { %3228 = vadd.xlane.f32.xlu0 %v3227_v6 }
 0x689   : > { %v3226_v58 = vmul.f32 %v3224_v33, %v3224_v33 }
 0x68b   : > { %v3230_v1 = vsel %vm924_vm0, %v3226_v58, 0.0 }
 0x68c   : > { %3231 = vadd.xlane.f32.xlu1 %v3230_v1 }
 0x711   : > { %v3229_v62 = vpop.xlane.xlu0 %3228 }
 0x712   : > { %v3233_v26 = vmul.f32 0.03125, %v3229_v62 }
 0x714   : > { %v3235_v21 = vadd.f32 1e-05, %v3233_v26 }
 0x715   : > { %v3232_v38 = vpop.xlane.xlu1 %3231 }
 0x716   : > { %4356 = vrsqrt.f32 %v3235_v21  ;;  %v3234_v35 = vmul.f32 0.03125, %v3232_v38  ;;  %v3852_v21 = vld [vmem:[#allocation17] ss:$0 sm:$0xff] }
 0x718   : > { %v3236_v25 = vadd.f32 1e-05, %v3234_v35 }
 0x71a   : > { %4358 = vrsqrt.f32 %v3236_v25 }
 0x723   : > { %v4357_v16 = vpop.eup %4356 }
 0x724   : > { %v3239_v22 = vmul.f32 %v4357_v16, %v3223_v29 }
 0x726   : > { %v3247_v54 = vmul.f32 %v3834_v8, %v3239_v22 }
 0x727   : > { %v4359_v43 = vpop.eup %4358 }
 0x728   : > { %v3240_v10 = vmul.f32 %v4359_v43, %v3224_v33  ;;  %v3255_v49 = vadd.f32 %v3835_v0, %v3247_v54 }
 0x72a   : > { %v3248_v57 = vmul.f32 %v3834_v8, %v3240_v10  ;;  %v3257_v42 = vrot.slane %v3255_v49, 7 }
 0x72c   : > { %v3256_v34 = vadd.f32 %v3835_v0, %v3248_v57 }
 0x72e   : > { %v3258_v20 = vrot.slane %v3256_v34, 7 }
 0x730   : > { %v3259_v39 = vsel %vm1014_vm2, %v3257_v42, %v3258_v20  ;;  %v3260_v18 = vsel %vm1014_vm2, %v3258_v20, %v3257_v42 }
 0x731   : > { %v3261_v13 = vsel %vm920_vm3, 0.0, %v3260_v18  ;;  %v3264_v40 = vsub.f32 %v3256_v34, %v3259_v39 }
 0x732   : > { %v3263_v3 = vsub.f32 %v3255_v49, %v3261_v13 }
 0x733   : > { %v3273_v59 = vmul.f32 %v3836_v4, %v3264_v40  ;;  %v3284_v44 = vmul.f32 %v3837_v52, %v3264_v40 }
 0x734   : > { %v3272_v46 = vmul.f32 %v3836_v4, %v3263_v3  ;;  %v3283_v12 = vmul.f32 %v3837_v52, %v3263_v3 }
 0x735   : > { %v3275_v23 = vadd.f32 %v3273_v59, %v3259_v39  ;;  %v3286_v45 = vadd.f32 %v3284_v44, %v3259_v39 }
 0x736   : > { %v3274_v2 = vadd.f32 %v3272_v46, %v3261_v13  ;;  %v3285_v60 = vadd.f32 %v3283_v12, %v3261_v13 }
 0x738   : > { %v3287_v41 = vpack.c.bf16 %v3275_v23, %v3274_v2  ;;  %v3458_v36 = vpack.c.bf16 %v3286_v45, %v3285_v60 }
 0x73a   : > { %3924 = vmatmul.mubr.msk.bf16.vlgmr.msra.gmra.mxu0 %vm924_vm0, %v3287_v41 }
 0x73b   : > { %3948 = vmatpush3.bf16.msra.mxu0 %v4174_v47  ;;  %3951 = vmatprep.mubr.msk.bf16.mxu0 %vm4901_vm1, %v6329_v51 }
 0x73c   : > { %3949 = vmatprep.subr.bf16.mxu0 %v6329_v51 }
 0x73f   : > { %3950 = vmatpush3.bf16.msra.mxu0 %v4175_v56 }
 0x742   : > { %3952 = vmatmul.mubr.msk.bf16.vlgmr.msra.gmra.mxu0 %vm924_vm0, %v3458_v36 }
 0x7fa   : > { %v3341_v50 = vpop.f32.mrf.mxu0 }
 0x7fb   : > { %v3348_v14 = vmax.f32 %v3341_v50, 0.0 }
 0x7fc   : > { %v3925_v15 = vpop.f32.mrf.mxu0 }
 0x7fd   : > { %v3350_v27 = vmul.f32 %v3348_v14, %v3348_v14 }
 0x7fe   : > { %v3344_v30 = vpop.f32.mrf.mxu0 }
 0x7ff   : > { %v3349_v24 = vmax.f32 %v3344_v30, 0.0 }
 0x800   : > { %v3926_v29 = vpop.f32.mrf.mxu0 }
 0x801   : > { %v3351_v11 = vmul.f32 %v3349_v24, %v3349_v24 }
 0x802   : > { %v3512_v53 = vpop.f32.mrf.mxu0 }
 0x803   : > { %v3352_v33 = vpack.c.bf16 %v3351_v11, %v3350_v27  ;;  %v3519_v9 = vsub.f32 0.0, %v3512_v53 }
 0x804   : > { %v3953_v6 = vpop.f32.mrf.mxu0 }
 0x805   : > { %3944 = vmatmul.mubr.bf16.vlgmr.msra.gmra.mxu1 %v3352_v33  ;;  %v3521_v28 = vmul.f32 1.442695, %v3519_v9 }
 0x806   : > { %v3515_v58 = vpop.f32.mrf.mxu0 }
 0x807   : > { %v3520_v5 = vsub.f32 0.0, %v3515_v58  ;;  %4360 = vpow2.f32 %v3521_v28 }
 0x808   : > { %v3954_v1 = vpop.f32.mrf.mxu0 }
 0x809   : > { %v3523_v51 = vmul.f32 1.442695, %v3520_v5 }
 0x80b   : > { %4362 = vpow2.f32 %v3523_v51 }
 0x814   : > { %v4361_v61 = vpop.eup %4360 }
 0x815   : > { %v3525_v48 = vadd.f32 1.0, %v4361_v61 }
 0x817   : > { %4364 = vrcp.f32 %v3525_v48 }
 0x818   : > { %v4363_v63 = vpop.eup %4362 }
 0x819   : > { %v3526_v19 = vadd.f32 1.0, %v4363_v63 }
 0x81b   : > { %4366 = vrcp.f32 %v3526_v19 }
 0x824   : > { %v4365_v62 = vpop.eup %4364 }
 0x828   : > { %v4367_v16 = vpop.eup %4366 }
 0x8c5   : > { %v3451_v26 = vpop.f32.mrf.mxu1 }
 0x8c6   : > { %v3530_v38 = vmul.f32 %v4365_v62, %v3451_v26 }
 0x8c7   : > { %v3945_v35 = vpop.f32.mrf.mxu1 }
 0x8c8   : > { %v3538_v25 = vmul.f32 %v3852_v21, %v3530_v38 }
 0x8c9   : > { %v3454_v8 = vpop.f32.mrf.mxu1 }
 0x8ca   : > { %v3540_v22 = vadd.f32 %v3538_v25, %v6088_v7  ;;  %v3531_v54 = vmul.f32 %v4367_v16, %v3454_v8 }
 0x8cb   : > { %v3946_v43 = vpop.f32.mrf.mxu1 }
 0x8cc   : > { %3542 = vst.msk [vmem:[%s908_s6] sm:$0xff] %vm924_vm0, %v3540_v22  ;;  %v3539_v0 = vmul.f32 %v3852_v21, %v3531_v54 }
 0x8ce   : > { %v3541_v7 = vadd.f32 %v3539_v0, %v6093_v55 }
 0x8d0   : > { %3543 = vst.msk [vmem:[%s908_s6 + $0x8] sm:$0xff] %vm924_vm0, %v3541_v7 }
 0x8d1   : > { %4797 = shalt.err (!%p4794_p9)
}
 0x8d2   : > { %s4798_s1 = scalar_lea.hbm %s6155_s7, 256  ;;  %s4802_s6 = scalar_lea.hbm %s6334_s3, 512 }
 0x8d3   : > { %p4799_p3 = scmp.ne.s32.totalorder %s6155_s7, %s4798_s1  ;;  %p4803_p6 = scmp.lt.s32.totalorder %s6155_s7, %s6334_s3 }
 0x8d4   : > { %p4804_p10 = scmp.lt.s32.totalorder %s4802_s6, %s4798_s1 }
 0x8d5   : > { %p4800_p5 = pnand %p4799_p3, %p6335_p7 }
 0x8d6   : > { %p4805_p4 = por %p4804_p10, %p4803_p6 }
 0x8d7   : > { %p4801_p13 = pneg %p4800_p5 }
 0x8d9   : > { %p4806_p12 = pnand %p4805_p4, %p4801_p13 }
 0x8db   : > { %4809 = shalt.err (!%p4806_p12)
}
 0x8dc   : > { %s4904_s27 = smov 128   ;;  %s4905_s2 = smov 8  }
 0x8dd   : > { %4019 = dma.vmem_to_hbm [thread:$0]  (%p6335_p7), %s6157_s23, 256, %s6155_s7, %s6161_s5, %s4904_s27, %s4904_s27, %s4905_s2  }
 0x8de PF: > { %s6336_s25 = sld [smem:[#allocation44_spill]] }
 0x8df   : > { %s6337_s4 = sld [smem:[#allocation42_spill]] }
 0x8e0   : > { %s6338_s24 = sld [smem:[#allocation48_spill]] }
 0x8e4   : > { %p4106_p8 = scmp.ge.s32.totalorder %s6336_s25, 2 }
 0x8e5   : > { %s3573_s29 = sand.u32 1, %s6337_s4  }
 0x8e6   : > { %p6339_p11 = scmp.ne.s32.totalorder %s6338_s24, 0  ;;  %s3574_s1 = scalar_lea.sflag [#allocation7], %s3573_s29 }
 0x8e8   : > { %p4071_p0 = pnand %p4106_p8, %p6339_p11 }
 0x8ea   : > { %p4072_p1 = pneg %p4071_p0 }
 0x8ec   : > { %4863 = dma.done.wait (%p4072_p1), %s3574_s1, 256  }
 0x8ed   : > { %4865 = vsyncadd (%p4072_p1), %s3574_s1, 4294967040  ;;  %s6340_s25 = sld [smem:[#allocation45_spill]]  ;;  %s6343_s4 = smov %s4872_s30 }
 0x8ee   : > { %s6341_s6 = sld [smem:[#allocation43_spill]] }
 0x8ef   : > { %s6342_s24 = sld [smem:[#allocation46_spill]] }
 0x8f3   : > { %p42_p2 = scmp.ge.s32.totalorder %s6340_s25, 4  }
 0x8f4   : > { %s6344_s30 = smov %s6341_s6 }
 0x8f5   :  { %44 = sbr.rel (!%p42_p2) target bundleno = 22 (0x16), region = 215 }
 0x8fa   :  { %3579 = vsyncpa [#allocation6], 1 }
 0x8fb   :  { %3581 = vsyncpa [#allocation6 + $0x1], 1 }
 0x8fc   :  { %3582 = vsyncpa [#allocation9], 1 }
 0x8fd   :  { %3583 = vsyncpa [#allocation12], 1 }
 0x8fe   :  { %3584 = vsyncpa [#allocation15], 1 }
 0x8ff   :  { %3585 = vsyncpa [#allocation18], 1 }
 0x900   :  { %3586 = vsyncpa [#allocation21], 1 }
 0x901   :  { %3587 = vsyncpa [#allocation24], 1 }
 0x902   :  { %3588 = vsyncpa [#allocation27], 1 }
 0x903   :  { %3589 = vsyncpa [#allocation30], 1 }
 0x904   :  { %3590 = vsyncpa [#allocation7], 1 }
 0x905   :  { %3592 = vsyncpa [#allocation7 + $0x1], 1 }

</bundles_post_ra>
